<compile_context>
chip_gen: v7x
topology: tpu7x:2x2x1
jax: 0.10.0
libtpu: 0.0.40
codegen_flags: <defaults>
</compile_context>

<pallas_src>
import functools

import jax
import jax.numpy as jnp
from jax.experimental import pallas as pl
from jax.experimental.pallas import tpu as pltpu


# ----------------------------------------------------------------------------
# Kernel 1: tiled fused  y = relu(x @ w + b)   (conv-as-matmul path)
#   x, w are bf16; accumulate f32 on the MXU; bias + ReLU in f32; store bf16.
# ----------------------------------------------------------------------------
def _matmul_bias_relu_kernel(x_ref, w_ref, b_ref, o_ref):
    y = jnp.dot(x_ref[...], w_ref[...], preferred_element_type=jnp.float32)
    o_ref[...] = jnp.maximum(y + b_ref[...], 0.0).astype(o_ref.dtype)


def _pick_tm(m, cap=512):
    """~ceil(m/2) rounded up to 8, capped: >=2 grid steps (v7x megacore) while
    keeping per-call step count (and its ~0.35us/step overhead) minimal."""
    if m <= 8:
        return m
    half = -(-m // 2)
    tm = -(-half // 8) * 8
    return min(cap, tm)


def fused_linear_relu(x, w, b2, out_dtype=jnp.bfloat16):
    """x: (M, K) bf16, w: (K, N) bf16, b2: (1, N) f32 -> relu(x @ w + b2)."""
    M, K = x.shape
    N = w.shape[1]
    tm = _pick_tm(M)
    return pl.pallas_call(
        _matmul_bias_relu_kernel,
        out_shape=jax.ShapeDtypeStruct((M, N), out_dtype),
        grid=(pl.cdiv(M, tm),),                       # remainder block is masked
        in_specs=[
            pl.BlockSpec((tm, K), lambda i: (i, 0)),
            pl.BlockSpec((K, N), lambda i: (0, 0)),
            pl.BlockSpec((1, N), lambda i: (0, 0)),
        ],
        out_specs=pl.BlockSpec((tm, N), lambda i: (i, 0)),
        compiler_params=pltpu.CompilerParams(
            dimension_semantics=("parallel",)),
    )(x, w, b2)


# ----------------------------------------------------------------------------
# Kernel 2: fully fused post-conv head (Linear(2592,200) -> concat -> fcs -> last)
# ----------------------------------------------------------------------------
def _mlp_head_kernel(*refs, n_hidden):
    # refs = (x, action, lin_w, lin_b, cat_w_obs, cat_w_act, cat_b,
    #         [fc_w, fc_b] * (n_hidden - 1), [last_w, last_b], out)
    x_ref, a_ref = refs[0], refs[1]
    o_ref = refs[-1]
    w = refs[2:-1]
    bf = jnp.bfloat16

    def dotf(a, b):
        return jnp.dot(a, b, preferred_element_type=jnp.float32)

    # Linear(2592 -> D_out) + ReLU   (lin_w rows pre-permuted to the NHWC
    # flatten order produced by the conv pipeline; f32 accumulator, bf16 feed)
    obs = jnp.maximum(dotf(x_ref[...], w[0][...]) + w[1][...], 0.0)
    # cat([obs, action], 1) @ W  ==  obs @ W[:D_out] + action @ W[D_out:]
    h = dotf(obs.astype(bf), w[2][...]) + dotf(a_ref[...], w[3][...]) + w[4][...]
    if n_hidden == 0:
        o_ref[...] = h.astype(o_ref.dtype)
        return
    h = jnp.maximum(h, 0.0)
    k = 5
    for _ in range(n_hidden - 1):
        h = jnp.maximum(dotf(h.astype(bf), w[k][...]) + w[k + 1][...], 0.0)
        k += 2
    o_ref[...] = (dotf(h.astype(bf), w[k][...]) + w[k + 1][...]).astype(o_ref.dtype)


def mlp_head(x, action, weight_args, out_dim, n_hidden):
    B = x.shape[0]
    args = [x, action] + list(weight_args)
    return pl.pallas_call(
        functools.partial(_mlp_head_kernel, n_hidden=n_hidden),
        out_shape=jax.ShapeDtypeStruct((B, out_dim), jnp.float32),
        grid=(1,),
        in_specs=[pl.BlockSpec(a.shape, lambda i: (0, 0)) for a in args],
        out_specs=pl.BlockSpec((B, out_dim), lambda i: (0, 0)),
        compiler_params=pltpu.CompilerParams(
            dimension_semantics=("arbitrary",)),
    )(*args)


# ----------------------------------------------------------------------------
# Glue: im2col (pure slicing/stack in bf16) + conv wrappers
# ----------------------------------------------------------------------------
def _im2col_nchw(x, kh, kw, sh, sw):
    """x: (B,C,H,W) -> (B*oh*ow, C*kh*kw) patches, feature order (C, kh, kw).
    Avoids any standalone NCHW->NHWC transpose of the raw observation."""
    B, C, H, W = x.shape
    oh = (H - kh) // sh + 1
    ow = (W - kw) // sw + 1
    cols = []
    for i in range(kh):
        for j in range(kw):
            cols.append(x[:, :, i:i + sh * oh:sh, j:j + sw * ow:sw])  # (B,C,oh,ow)
    p = jnp.stack(cols, axis=2)                       # (B, C, kh*kw, oh, ow)
    p = p.transpose(0, 3, 4, 1, 2)                    # (B, oh, ow, C, kh*kw)
    return p.reshape(B * oh * ow, C * kh * kw), oh, ow


def _im2col_nhwc(x, kh, kw, sh, sw):
    """x: (B,H,W,C) -> (B*oh*ow, C*kh*kw) patches, feature order (C, kh, kw)."""
    B, H, W, C = x.shape
    oh = (H - kh) // sh + 1
    ow = (W - kw) // sw + 1
    cols = []
    for i in range(kh):
        for j in range(kw):
            cols.append(x[:, i:i + sh * oh:sh, j:j + sw * ow:sw, :])  # (B,oh,ow,C)
    p = jnp.stack(cols, axis=-1)                      # (B, oh, ow, C, kh*kw)
    return p.reshape(B * oh * ow, C * kh * kw), oh, ow


# ----------------------------------------------------------------------------
# Forward (matches the PyTorch module semantics for 4-D obs)
# ----------------------------------------------------------------------------
def mlp_forward(pp, obs, action, meta):
    """obs: (B, 3, H, W) NCHW (torch convention), action: (B, action_dim)."""
    # TODO(synk): the 5-D (if_high_dim) branch of the torch module is a pure
    #             view/reshape wrapper around this path; only 4-D is handled.
    B = obs.shape[0]
    x = obs.astype(jnp.bfloat16)                      # halves all im2col bytes
    (k1, s1), (k2, s2) = meta["convs"]

    # conv1: im2col directly on NCHW (feature order C,kh,kw) + fused matmul
    p1, oh1, ow1 = _im2col_nchw(x, k1, k1, s1, s1)
    y1 = fused_linear_relu(p1, pp["conv1_w"], pp["conv1_b"])   # (B*oh1*ow1, 16) bf16
    x1 = y1.reshape(B, oh1, ow1, -1)                  # NHWC rows, no transpose

    # conv2: im2col on the NHWC conv1 output + fused matmul
    p2, oh2, ow2 = _im2col_nhwc(x1, k2, k2, s2, s2)
    y2 = fused_linear_relu(p2, pp["conv2_w"], pp["conv2_b"])   # (B*oh2*ow2, 32) bf16

    # Flatten for Linear(2592, D_out): left to XLA (tiny array); lin_w rows are
    # pre-permuted to this NHWC flatten order, so no further layout work.
    x2 = y2.reshape(B, -1)                            # (B, 2592) bf16
    a_bf = action.astype(jnp.bfloat16)

    weight_args = [pp["lin_w"], pp["lin_b"],
                   pp["cat_w_obs"], pp["cat_w_act"], pp["cat_b"]]
    for w, b in pp["fcs"]:
        weight_args += [w, b]
    if meta["n_hidden"] > 0:
        weight_args += [pp["last_w"], pp["last_b"]]
    return mlp_head(x2, a_bf, weight_args, meta["out_dim"], meta["n_hidden"])


# ----------------------------------------------------------------------------
# Parameters: torch-layout construction + one-time layout/dtype preprocessing
# ----------------------------------------------------------------------------
def make_params(key, action_dim, hidden_sizes, output_size, D_out=200,
                conv_channels=(16, 32), kernel_sizes=(8, 4)):
    ks = jax.random.split(key, 6 + 2 * len(hidden_sizes) + 2)
    it = iter(ks)
    s = 0.05
    params = {
        "conv1_w": s * jax.random.normal(next(it), (conv_channels[0], 3, kernel_sizes[0], kernel_sizes[0]), jnp.float32),
        "conv1_b": s * jax.random.normal(next(it), (conv_channels[0],), jnp.float32),
        "conv2_w": s * jax.random.normal(next(it), (conv_channels[1], conv_channels[0], kernel_sizes[1], kernel_sizes[1]), jnp.float32),
        "conv2_b": s * jax.random.normal(next(it), (conv_channels[1],), jnp.float32),
        "lin_w":   s * jax.random.normal(next(it), (2592, D_out), jnp.float32),
        "lin_b":   s * jax.random.normal(next(it), (D_out,), jnp.float32),
    }
    fcs = []
    in_size = D_out + action_dim  # == input_size of the torch module
    for h in hidden_sizes:
        w = s * jax.random.normal(next(it), (in_size, h), jnp.float32)
        b = s * jax.random.normal(next(it), (h,), jnp.float32)
        fcs.append((w, b))
        in_size = h
    params["fcs"] = fcs
    params["last_w"] = s * jax.random.normal(next(it), (in_size, output_size), jnp.float32)
    params["last_b"] = s * jax.random.normal(next(it), (output_size,), jnp.float32)
    return params


def preprocess_params(params, D_out=200, strides=(4, 2)):
    """One-time layout + dtype transforms: zero weight reshapes in the forward
    path; all matmul weights in bf16, biases kept f32 for the f32 accumulator."""
    bf = jnp.bfloat16
    pp = {}
    for i in (1, 2):
        w = params[f"conv{i}_w"]                      # (OC, C, kh, kw) torch layout
        OC = w.shape[0]
        # Flatten (C, kh, kw) in torch order -> rows match the (C,kh,kw) im2col.
        pp[f"conv{i}_w"] = w.reshape(OC, -1).T.astype(bf)            # (C*kh*kw, OC)
        pp[f"conv{i}_b"] = params[f"conv{i}_b"].reshape(1, OC).astype(jnp.float32)
    # Permute lin_w rows from torch NCHW-flatten order (c, h, w) to the NHWC
    # flatten order (h, w, c) produced by the conv pipeline above.
    lw = params["lin_w"]                              # (2592, D_out)
    OC2 = params["conv2_w"].shape[0]
    hw = int(round((lw.shape[0] // OC2) ** 0.5))
    pp["lin_w"] = (lw.reshape(OC2, hw, hw, -1).transpose(1, 2, 0, 3)
                     .reshape(lw.shape[0], -1).astype(bf))
    pp["lin_b"] = params["lin_b"].reshape(1, -1).astype(jnp.float32)

    fcs = params["fcs"]
    w0, b0 = (fcs[0] if fcs else (params["last_w"], params["last_b"]))
    pp["cat_w_obs"] = w0[:D_out].astype(bf)           # consumes Linear(2592,D_out) output
    pp["cat_w_act"] = w0[D_out:].astype(bf)           # consumes the action half of the concat
    pp["cat_b"] = b0.reshape(1, -1).astype(jnp.float32)
    pp["fcs"] = [(w.astype(bf), b.reshape(1, -1).astype(jnp.float32)) for w, b in fcs[1:]]
    if fcs:
        pp["last_w"] = params["last_w"].astype(bf)
        pp["last_b"] = params["last_b"].reshape(1, -1).astype(jnp.float32)
    meta = {
        "n_hidden": len(fcs),
        "out_dim": params["last_w"].shape[1],
        "convs": ((params["conv1_w"].shape[2], strides[0]),
                  (params["conv2_w"].shape[2], strides[1])),
    }
    return pp, meta


# ----------------------------------------------------------------------------
# Test harness
# ----------------------------------------------------------------------------
if __name__ == "__main__":
    key = jax.random.PRNGKey(0)
    k_obs, k_act, k_par = jax.random.split(key, 3)

    B = 2
    action_dim = 4
    hidden_sizes = [64, 64]
    output_size = 5

    # 84x84 spatial is forced by Linear(2592, D_out):
    #   (84-8)//4+1 = 20, (20-4)//2+1 = 9, 32*9*9 = 2592.
    obs = jax.random.normal(k_obs, (B, 3, 84, 84), jnp.float32)
    action = jax.random.normal(k_act, (B, action_dim), jnp.float32)

    params = make_params(k_par, action_dim, hidden_sizes, output_size)
    pp, meta = preprocess_params(params)

    fwd = jax.jit(lambda pp_, o_, a_: mlp_forward(pp_, o_, a_, meta))
    out = jax.block_until_ready(fwd(pp, obs, action))
    assert out.shape == (B, output_size), out.shape
    assert out.dtype == jnp.float32
    print("KERNEL_OK")
</pallas_src>

<mosaic_0001>
module attributes {stable_mosaic.version = 11 : i64} {
  func.func @_matmul_bias_relu_kernel(%arg0: i32, %arg1: memref<400x192xbf16, #tpu.memory_space<vmem>>, %arg2: memref<192x16xbf16, #tpu.memory_space<vmem>>, %arg3: memref<1x16xf32, #tpu.memory_space<vmem>>, %arg4: memref<400x16xbf16, #tpu.memory_space<vmem>>) attributes {dimension_semantics = [#tpu.dimension_semantics<parallel>], iteration_bounds = array<i64: 2>, scalar_prefetch = 0 : i64, scratch_operands = 0 : i64, tpu.core_type = #tpu.core_type<tc>, window_params = [{transform_indices = @transform_0, window_bounds = array<i64: 400, 192>}, {pipeline_mode = #tpu.pipeline_mode<synchronous>, transform_indices = @transform_1, window_bounds = array<i64: 192, 16>}, {pipeline_mode = #tpu.pipeline_mode<synchronous>, transform_indices = @transform_2, window_bounds = array<i64: 1, 16>}, {transform_indices = @transform_3, window_bounds = array<i64: 400, 16>}]} {
    %c0 = arith.constant 0 : index
    %c0_0 = arith.constant 0 : index
    %0 = vector.load %arg1[%c0, %c0_0] : memref<400x192xbf16, #tpu.memory_space<vmem>>, vector<400x192xbf16>
    %c0_1 = arith.constant 0 : index
    %c0_2 = arith.constant 0 : index
    %1 = vector.load %arg2[%c0_1, %c0_2] : memref<192x16xbf16, #tpu.memory_space<vmem>>, vector<192x16xbf16>
    %cst = arith.constant dense<0.000000e+00> : vector<400x16xf32>
    %2 = tpu.matmul %0, %1, %cst {dimension_numbers = #tpu.dot_dimension_numbers<[1], [0], [0], [1], [0, 0, 1, 1], [], []>} : vector<400x192xbf16>, vector<192x16xbf16>, vector<400x16xf32> -> vector<400x16xf32>
    %c0_3 = arith.constant 0 : index
    %c0_4 = arith.constant 0 : index
    %3 = vector.load %arg3[%c0_3, %c0_4] : memref<1x16xf32, #tpu.memory_space<vmem>>, vector<1x16xf32>
    %4 = vector.broadcast %3 : vector<1x16xf32> to vector<400x16xf32>
    %5 = arith.addf %2, %4 : vector<400x16xf32>
    %cst_5 = arith.constant 0.000000e+00 : f32
    %6 = vector.broadcast %cst_5 : f32 to vector<400x16xf32>
    %7 = arith.maximumf %5, %6 : vector<400x16xf32>
    %8 = arith.truncf %7 : vector<400x16xf32> to vector<400x16xbf16>
    %c0_6 = arith.constant 0 : index
    %c0_7 = arith.constant 0 : index
    %9 = vector.load %arg4[%c0_6, %c0_7] : memref<400x16xbf16, #tpu.memory_space<vmem>>, vector<400x16xbf16>
    tpu.vector_store %arg4[%c0_6, %c0_7], %8 {strides = array<i32>} : memref<400x16xbf16, #tpu.memory_space<vmem>>, vector<400x16xbf16>,
    return
  }
  func.func @transform_0(%arg0: i32) -> (i32, i32) {
    %c0_i32 = arith.constant 0 : i32
    %c0_i32_0 = arith.constant 0 : i32
    return %arg0, %c0_i32 : i32, i32
  }
  func.func @transform_1(%arg0: i32) -> (i32, i32) {
    %c0_i32 = arith.constant 0 : i32
    %c0_i32_0 = arith.constant 0 : i32
    %c0_i32_1 = arith.constant 0 : i32
    return %c0_i32, %c0_i32_0 : i32, i32
  }
  func.func @transform_2(%arg0: i32) -> (i32, i32) {
    %c0_i32 = arith.constant 0 : i32
    %c0_i32_0 = arith.constant 0 : i32
    %c0_i32_1 = arith.constant 0 : i32
    return %c0_i32, %c0_i32_0 : i32, i32
  }
  func.func @transform_3(%arg0: i32) -> (i32, i32) {
    %c0_i32 = arith.constant 0 : i32
    %c0_i32_0 = arith.constant 0 : i32
    return %arg0, %c0_i32 : i32, i32
  }
}

module attributes {stable_mosaic.version = 11 : i64} {
  func.func @_matmul_bias_relu_kernel(%arg0: i32, %arg1: memref<88x256xbf16, #tpu.memory_space<vmem>>, %arg2: memref<256x32xbf16, #tpu.memory_space<vmem>>, %arg3: memref<1x32xf32, #tpu.memory_space<vmem>>, %arg4: memref<88x32xbf16, #tpu.memory_space<vmem>>) attributes {dimension_semantics = [#tpu.dimension_semantics<parallel>], iteration_bounds = array<i64: 2>, scalar_prefetch = 0 : i64, scratch_operands = 0 : i64, tpu.core_type = #tpu.core_type<tc>, window_params = [{transform_indices = @transform_0, window_bounds = array<i64: 88, 256>}, {pipeline_mode = #tpu.pipeline_mode<synchronous>, transform_indices = @transform_1, window_bounds = array<i64: 256, 32>}, {pipeline_mode = #tpu.pipeline_mode<synchronous>, transform_indices = @transform_2, window_bounds = array<i64: 1, 32>}, {transform_indices = @transform_3, window_bounds = array<i64: 88, 32>}]} {
    %c0 = arith.constant 0 : index
    %c0_0 = arith.constant 0 : index
    %0 = vector.load %arg1[%c0, %c0_0] : memref<88x256xbf16, #tpu.memory_space<vmem>>, vector<88x256xbf16>
    %c0_1 = arith.constant 0 : index
    %c0_2 = arith.constant 0 : index
    %1 = vector.load %arg2[%c0_1, %c0_2] : memref<256x32xbf16, #tpu.memory_space<vmem>>, vector<256x32xbf16>
    %cst = arith.constant dense<0.000000e+00> : vector<88x32xf32>
    %2 = tpu.matmul %0, %1, %cst {dimension_numbers = #tpu.dot_dimension_numbers<[1], [0], [0], [1], [0, 0, 1, 1], [], []>} : vector<88x256xbf16>, vector<256x32xbf16>, vector<88x32xf32> -> vector<88x32xf32>
    %c0_3 = arith.constant 0 : index
    %c0_4 = arith.constant 0 : index
    %3 = vector.load %arg3[%c0_3, %c0_4] : memref<1x32xf32, #tpu.memory_space<vmem>>, vector<1x32xf32>
    %4 = vector.broadcast %3 : vector<1x32xf32> to vector<88x32xf32>
    %5 = arith.addf %2, %4 : vector<88x32xf32>
    %cst_5 = arith.constant 0.000000e+00 : f32
    %6 = vector.broadcast %cst_5 : f32 to vector<88x32xf32>
    %7 = arith.maximumf %5, %6 : vector<88x32xf32>
    %8 = arith.truncf %7 : vector<88x32xf32> to vector<88x32xbf16>
    %c0_6 = arith.constant 0 : index
    %c0_7 = arith.constant 0 : index
    %9 = vector.load %arg4[%c0_6, %c0_7] : memref<88x32xbf16, #tpu.memory_space<vmem>>, vector<88x32xbf16>
    tpu.vector_store %arg4[%c0_6, %c0_7], %8 {strides = array<i32>} : memref<88x32xbf16, #tpu.memory_space<vmem>>, vector<88x32xbf16>,
    return
  }
  func.func @transform_0(%arg0: i32) -> (i32, i32) {
    %c0_i32 = arith.constant 0 : i32
    %c0_i32_0 = arith.constant 0 : i32
    return %arg0, %c0_i32 : i32, i32
  }
  func.func @transform_1(%arg0: i32) -> (i32, i32) {
    %c0_i32 = arith.constant 0 : i32
    %c0_i32_0 = arith.constant 0 : i32
    %c0_i32_1 = arith.constant 0 : i32
    return %c0_i32, %c0_i32_0 : i32, i32
  }
  func.func @transform_2(%arg0: i32) -> (i32, i32) {
    %c0_i32 = arith.constant 0 : i32
    %c0_i32_0 = arith.constant 0 : i32
    %c0_i32_1 = arith.constant 0 : i32
    return %c0_i32, %c0_i32_0 : i32, i32
  }
  func.func @transform_3(%arg0: i32) -> (i32, i32) {
    %c0_i32 = arith.constant 0 : i32
    %c0_i32_0 = arith.constant 0 : i32
    return %arg0, %c0_i32 : i32, i32
  }
}

module attributes {stable_mosaic.version = 11 : i64} {
  func.func @_mlp_head_kernel(%arg0: i32, %arg1: memref<2x2592xbf16, #tpu.memory_space<vmem>>, %arg2: memref<2x4xbf16, #tpu.memory_space<vmem>>, %arg3: memref<2592x200xbf16, #tpu.memory_space<vmem>>, %arg4: memref<1x200xf32, #tpu.memory_space<vmem>>, %arg5: memref<200x64xbf16, #tpu.memory_space<vmem>>, %arg6: memref<4x64xbf16, #tpu.memory_space<vmem>>, %arg7: memref<1x64xf32, #tpu.memory_space<vmem>>, %arg8: memref<64x64xbf16, #tpu.memory_space<vmem>>, %arg9: memref<1x64xf32, #tpu.memory_space<vmem>>, %arg10: memref<64x5xbf16, #tpu.memory_space<vmem>>, %arg11: memref<1x5xf32, #tpu.memory_space<vmem>>, %arg12: memref<2x5xf32, #tpu.memory_space<vmem>>) attributes {dimension_semantics = [#tpu.dimension_semantics<arbitrary>], iteration_bounds = array<i64: 1>, scalar_prefetch = 0 : i64, scratch_operands = 0 : i64, tpu.core_type = #tpu.core_type<tc>, window_params = [{pipeline_mode = #tpu.pipeline_mode<synchronous>, transform_indices = @transform_0, window_bounds = array<i64: 2, 2592>}, {pipeline_mode = #tpu.pipeline_mode<synchronous>, transform_indices = @transform_1, window_bounds = array<i64: 2, 4>}, {pipeline_mode = #tpu.pipeline_mode<synchronous>, transform_indices = @transform_2, window_bounds = array<i64: 2592, 200>}, {pipeline_mode = #tpu.pipeline_mode<synchronous>, transform_indices = @transform_3, window_bounds = array<i64: 1, 200>}, {pipeline_mode = #tpu.pipeline_mode<synchronous>, transform_indices = @transform_4, window_bounds = array<i64: 200, 64>}, {pipeline_mode = #tpu.pipeline_mode<synchronous>, transform_indices = @transform_5, window_bounds = array<i64: 4, 64>}, {pipeline_mode = #tpu.pipeline_mode<synchronous>, transform_indices = @transform_6, window_bounds = array<i64: 1, 64>}, {pipeline_mode = #tpu.pipeline_mode<synchronous>, transform_indices = @transform_7, window_bounds = array<i64: 64, 64>}, {pipeline_mode = #tpu.pipeline_mode<synchronous>, transform_indices = @transform_8, window_bounds = array<i64: 1, 64>}, {pipeline_mode = #tpu.pipeline_mode<synchronous>, transform_indices = @transform_9, window_bounds = array<i64: 64, 5>}, {pipeline_mode = #tpu.pipeline_mode<synchronous>, transform_indices = @transform_10, window_bounds = array<i64: 1, 5>}, {pipeline_mode = #tpu.pipeline_mode<synchronous>, transform_indices = @transform_11, window_bounds = array<i64: 2, 5>}]} {
    %c0 = arith.constant 0 : index
    %c0_0 = arith.constant 0 : index
    %0 = vector.load %arg1[%c0, %c0_0] : memref<2x2592xbf16, #tpu.memory_space<vmem>>, vector<2x2592xbf16>
    %c0_1 = arith.constant 0 : index
    %c0_2 = arith.constant 0 : index
    %1 = vector.load %arg3[%c0_1, %c0_2] : memref<2592x200xbf16, #tpu.memory_space<vmem>>, vector<2592x200xbf16>
    %cst = arith.constant dense<0.000000e+00> : vector<2x200xf32>
    %2 = tpu.matmul %0, %1, %cst {dimension_numbers = #tpu.dot_dimension_numbers<[1], [0], [0], [1], [0, 0, 1, 1], [], []>} : vector<2x2592xbf16>, vector<2592x200xbf16>, vector<2x200xf32> -> vector<2x200xf32>
    %c0_3 = arith.constant 0 : index
    %c0_4 = arith.constant 0 : index
    %3 = vector.load %arg4[%c0_3, %c0_4] : memref<1x200xf32, #tpu.memory_space<vmem>>, vector<1x200xf32>
    %4 = vector.broadcast %3 : vector<1x200xf32> to vector<2x200xf32>
    %5 = arith.addf %2, %4 : vector<2x200xf32>
    %cst_5 = arith.constant 0.000000e+00 : f32
    %6 = vector.broadcast %cst_5 : f32 to vector<2x200xf32>
    %7 = arith.maximumf %5, %6 : vector<2x200xf32>
    %8 = arith.truncf %7 : vector<2x200xf32> to vector<2x200xbf16>
    %c0_6 = arith.constant 0 : index
    %c0_7 = arith.constant 0 : index
    %9 = vector.load %arg5[%c0_6, %c0_7] : memref<200x64xbf16, #tpu.memory_space<vmem>>, vector<200x64xbf16>
    %cst_8 = arith.constant dense<0.000000e+00> : vector<2x64xf32>
    %10 = tpu.matmul %8, %9, %cst_8 {dimension_numbers = #tpu.dot_dimension_numbers<[1], [0], [0], [1], [0, 0, 1, 1], [], []>} : vector<2x200xbf16>, vector<200x64xbf16>, vector<2x64xf32> -> vector<2x64xf32>
    %c0_9 = arith.constant 0 : index
    %c0_10 = arith.constant 0 : index
    %11 = vector.load %arg2[%c0_9, %c0_10] : memref<2x4xbf16, #tpu.memory_space<vmem>>, vector<2x4xbf16>
    %c0_11 = arith.constant 0 : index
    %c0_12 = arith.constant 0 : index
    %12 = vector.load %arg6[%c0_11, %c0_12] : memref<4x64xbf16, #tpu.memory_space<vmem>>, vector<4x64xbf16>
    %cst_13 = arith.constant dense<0.000000e+00> : vector<2x64xf32>
    %13 = tpu.matmul %11, %12, %cst_13 {dimension_numbers = #tpu.dot_dimension_numbers<[1], [0], [0], [1], [0, 0, 1, 1], [], []>} : vector<2x4xbf16>, vector<4x64xbf16>, vector<2x64xf32> -> vector<2x64xf32>
    %14 = arith.addf %10, %13 : vector<2x64xf32>
    %c0_14 = arith.constant 0 : index
    %c0_15 = arith.constant 0 : index
    %15 = vector.load %arg7[%c0_14, %c0_15] : memref<1x64xf32, #tpu.memory_space<vmem>>, vector<1x64xf32>
    %16 = vector.broadcast %15 : vector<1x64xf32> to vector<2x64xf32>
    %17 = arith.addf %14, %16 : vector<2x64xf32>
    %cst_16 = arith.constant 0.000000e+00 : f32
    %18 = vector.broadcast %cst_16 : f32 to vector<2x64xf32>
    %19 = arith.maximumf %17, %18 : vector<2x64xf32>
    %20 = arith.truncf %19 : vector<2x64xf32> to vector<2x64xbf16>
    %c0_17 = arith.constant 0 : index
    %c0_18 = arith.constant 0 : index
    %21 = vector.load %arg8[%c0_17, %c0_18] : memref<64x64xbf16, #tpu.memory_space<vmem>>, vector<64x64xbf16>
    %cst_19 = arith.constant dense<0.000000e+00> : vector<2x64xf32>
    %22 = tpu.matmul %20, %21, %cst_19 {dimension_numbers = #tpu.dot_dimension_numbers<[1], [0], [0], [1], [0, 0, 1, 1], [], []>} : vector<2x64xbf16>, vector<64x64xbf16>, vector<2x64xf32> -> vector<2x64xf32>
    %c0_20 = arith.constant 0 : index
    %c0_21 = arith.constant 0 : index
    %23 = vector.load %arg9[%c0_20, %c0_21] : memref<1x64xf32, #tpu.memory_space<vmem>>, vector<1x64xf32>
    %24 = vector.broadcast %23 : vector<1x64xf32> to vector<2x64xf32>
    %25 = arith.addf %22, %24 : vector<2x64xf32>
    %cst_22 = arith.constant 0.000000e+00 : f32
    %26 = vector.broadcast %cst_22 : f32 to vector<2x64xf32>
    %27 = arith.maximumf %25, %26 : vector<2x64xf32>
    %28 = arith.truncf %27 : vector<2x64xf32> to vector<2x64xbf16>
    %c0_23 = arith.constant 0 : index
    %c0_24 = arith.constant 0 : index
    %29 = vector.load %arg10[%c0_23, %c0_24] : memref<64x5xbf16, #tpu.memory_space<vmem>>, vector<64x5xbf16>
    %cst_25 = arith.constant dense<0.000000e+00> : vector<2x5xf32>
    %30 = tpu.matmul %28, %29, %cst_25 {dimension_numbers = #tpu.dot_dimension_numbers<[1], [0], [0], [1], [0, 0, 1, 1], [], []>} : vector<2x64xbf16>, vector<64x5xbf16>, vector<2x5xf32> -> vector<2x5xf32>
    %c0_26 = arith.constant 0 : index
    %c0_27 = arith.constant 0 : index
    %31 = vector.load %arg11[%c0_26, %c0_27] : memref<1x5xf32, #tpu.memory_space<vmem>>, vector<1x5xf32>
    %32 = vector.broadcast %31 : vector<1x5xf32> to vector<2x5xf32>
    %33 = arith.addf %30, %32 : vector<2x5xf32>
    %c0_28 = arith.constant 0 : index
    %c0_29 = arith.constant 0 : index
    %34 = vector.load %arg12[%c0_28, %c0_29] : memref<2x5xf32, #tpu.memory_space<vmem>>, vector<2x5xf32>
    tpu.vector_store %arg12[%c0_28, %c0_29], %33 {strides = array<i32>} : memref<2x5xf32, #tpu.memory_space<vmem>>, vector<2x5xf32>,
    return
  }
  func.func @transform_0(%arg0: i32) -> (i32, i32) {
    %c0_i32 = arith.constant 0 : i32
    %c0_i32_0 = arith.constant 0 : i32
    %c0_i32_1 = arith.constant 0 : i32
    return %c0_i32, %c0_i32_0 : i32, i32
  }
  func.func @transform_1(%arg0: i32) -> (i32, i32) {
    %c0_i32 = arith.constant 0 : i32
    %c0_i32_0 = arith.constant 0 : i32
    %c0_i32_1 = arith.constant 0 : i32
    return %c0_i32, %c0_i32_0 : i32, i32
  }
  func.func @transform_2(%arg0: i32) -> (i32, i32) {
    %c0_i32 = arith.constant 0 : i32
    %c0_i32_0 = arith.constant 0 : i32
    %c0_i32_1 = arith.constant 0 : i32
    return %c0_i32, %c0_i32_0 : i32, i32
  }
  func.func @transform_3(%arg0: i32) -> (i32, i32) {
    %c0_i32 = arith.constant 0 : i32
    %c0_i32_0 = arith.constant 0 : i32
    %c0_i32_1 = arith.constant 0 : i32
    return %c0_i32, %c0_i32_0 : i32, i32
  }
  func.func @transform_4(%arg0: i32) -> (i32, i32) {
    %c0_i32 = arith.constant 0 : i32
    %c0_i32_0 = arith.constant 0 : i32
    %c0_i32_1 = arith.constant 0 : i32
    return %c0_i32, %c0_i32_0 : i32, i32
  }
  func.func @transform_5(%arg0: i32) -> (i32, i32) {
    %c0_i32 = arith.constant 0 : i32
    %c0_i32_0 = arith.constant 0 : i32
    %c0_i32_1 = arith.constant 0 : i32
    return %c0_i32, %c0_i32_0 : i32, i32
  }
  func.func @transform_6(%arg0: i32) -> (i32, i32) {
    %c0_i32 = arith.constant 0 : i32
    %c0_i32_0 = arith.constant 0 : i32
    %c0_i32_1 = arith.constant 0 : i32
    return %c0_i32, %c0_i32_0 : i32, i32
  }
  func.func @transform_7(%arg0: i32) -> (i32, i32) {
    %c0_i32 = arith.constant 0 : i32
    %c0_i32_0 = arith.constant 0 : i32
    %c0_i32_1 = arith.constant 0 : i32
    return %c0_i32, %c0_i32_0 : i32, i32
  }
  func.func @transform_8(%arg0: i32) -> (i32, i32) {
    %c0_i32 = arith.constant 0 : i32
    %c0_i32_0 = arith.constant 0 : i32
    %c0_i32_1 = arith.constant 0 : i32
    return %c0_i32, %c0_i32_0 : i32, i32
  }
  func.func @transform_9(%arg0: i32) -> (i32, i32) {
    %c0_i32 = arith.constant 0 : i32
    %c0_i32_0 = arith.constant 0 : i32
    %c0_i32_1 = arith.constant 0 : i32
    return %c0_i32, %c0_i32_0 : i32, i32
  }
  func.func @transform_10(%arg0: i32) -> (i32, i32) {
    %c0_i32 = arith.constant 0 : i32
    %c0_i32_0 = arith.constant 0 : i32
    %c0_i32_1 = arith.constant 0 : i32
    return %c0_i32, %c0_i32_0 : i32, i32
  }
  func.func @transform_11(%arg0: i32) -> (i32, i32) {
    %c0_i32 = arith.constant 0 : i32
    %c0_i32_0 = arith.constant 0 : i32
    %c0_i32_1 = arith.constant 0 : i32
    return %c0_i32, %c0_i32_0 : i32, i32
  }
}

</mosaic_0001>

<bundles_post_ra>
// kernel: _lambda_.3
= control target key start
LH: loop header
LB: loop body
LE: loop exit
PB: predicated region body
PF: predicated region fallthrough
CT: control target
= control target key end

     0   :  { %s1570_s12 = smov 0   ;;  %s1885_s0 = inlined_call_operand.vmem [shape: bf16[800,192], index: 0, kind: input, shape index: {}]   ;;  %s1886_s1 = inlined_call_operand.vmem [shape: bf16[192,16], index: 1, kind: input, shape index: {}]   ;;  %s1887_s2 = inlined_call_operand.vmem [shape: f32[1,16], index: 2, kind: input, shape index: {}]   ;;  %s1888_s3 = inlined_call_operand.vmem [shape: bf16[800,16], index: 3, kind: output, shape index: {}]  }
   0x1 LB: > { %s1222_s13 = sadd.s32 4294967295, %s1547_s12   ;;  %p1226_p0 = scmp.ge.s32.totalorder %s1547_s12, 1  ;;  %s1547_s12 = sphi %s1570_s12, %s13_s12  }
   0x2   : > { %p139_p1 = scmp.lt.s32.totalorder %s1547_s12, 3 }
   0x4   : > { %p140_p2 = pnand %p1226_p0, %p139_p1 }
   0x5   : > { %v1454_v0 = vld [vmem:[%s1886_s1] sm:$0xff] (!%p140_p2)   ;;  %v1549_v1 = vmov (!%p140_p2), 0   ;;  %s164_s16 = smul.u32 (!%p140_p2), 50, %s1222_s13  ;;  %v1455_v2 = vld [vmem:[%s1886_s1 + $0x8] sm:$0xff] (!%p140_p2)   ;;  %v1456_v3 = vld [vmem:[%s1886_s1 + $0x10] sm:$0xff] (!%p140_p2)   ;;  %vm556_vm0 = vcmask (!%p140_p2), 523264  }
   0x6   : > { %143 = sbr.rel (%p140_p2) target bundleno = 371 (0x173), region = 32  ;;  %632 = vmatprep.subr.bf16.mxu0 (!%p140_p2), %v1549_v1  ;;  %1421 = vmatprep.subr.bf16.mxu1 (!%p140_p2), %v1549_v1  ;;  %v1457_v4 = vld [vmem:[%s1886_s1 + $0x18] sm:$0xff] (!%p140_p2)   ;;  %v1458_v6 = vld [vmem:[%s1886_s1 + $0x20] sm:$0xff] (!%p140_p2)   ;;  %v1459_v8 = vld [vmem:[%s1886_s1 + $0x28] sm:$0xff] (!%p140_p2)   ;;  %vm1115_vm1 = vcmask (!%p140_p2), 125952  }
   0x7   : > { %633 = vmatpush1.bf16.msra.mxu0 (!%p140_p2), %v1454_v0  ;;  %1433 = vmatpush1.bf16.msra.mxu1 (!%p140_p2), %v1454_v0  ;;  %p165_p3 = scmp.lt.s32.totalorder (!%p140_p2), %s164_s16, 99  ;;  %v1460_v9 = vld [vmem:[%s1886_s1 + $0x30] sm:$0xff] (!%p140_p2)   ;;  %v1461_v10 = vld [vmem:[%s1886_s1 + $0x38] sm:$0xff] (!%p140_p2)   ;;  %v1462_v11 = vld [vmem:[%s1886_s1 + $0x40] sm:$0xff] (!%p140_p2)  }
   0x8   : > { %634 = vmatprep.subr.bf16.mxu0 (!%p140_p2), %v1549_v1  ;;  %1422 = vmatprep.subr.bf16.mxu1 (!%p140_p2), %v1549_v1  ;;  %v1463_v12 = vld [vmem:[%s1886_s1 + $0x48] sm:$0xff] (!%p140_p2)   ;;  %v1464_v13 = vld [vmem:[%s1886_s1 + $0x50] sm:$0xff] (!%p140_p2)   ;;  %v1465_v14 = vld [vmem:[%s1886_s1 + $0x58] sm:$0xff] (!%p140_p2)  }
   0x9   : > { %v1724_v63 = vld [vmem:[%s1887_s2] ss:$0 sm:$0xff] (!%p140_p2) }
   0xb   : > { %635 = vmatpush1.bf16.msra.mxu0 (!%p140_p2), %v1455_v2  ;;  %1434 = vmatpush1.bf16.msra.mxu1 (!%p140_p2), %v1455_v2 }
   0xc   : > { %636 = vmatprep.subr.bf16.mxu0 (!%p140_p2), %v1549_v1  ;;  %1423 = vmatprep.subr.bf16.mxu1 (!%p140_p2), %v1549_v1 }
   0xd   : > { %s1890_s16 = smov (!%p165_p3, %s164_s16), 99 }
   0xe   : > { %s1370_s21 = sshll.u32 %s1890_s16, 3  ;;  %s1229_s20 = sshll.u32 %s1890_s16, 2 }
   0xf   : > { %637 = vmatpush1.bf16.msra.mxu0 %v1456_v3  ;;  %1435 = vmatpush1.bf16.msra.mxu1 %v1456_v3  ;;  %s1602_s26 = scalar_lea.vmem %s1885_s0, %s1370_s21  ;;  %s1734_s16 = scalar_lea.vmem %s1888_s3, %s1229_s20 }
  0x10   : > { %638 = vmatprep.subr.bf16.mxu0 %v1549_v1  ;;  %1424 = vmatprep.subr.bf16.mxu1 %v1549_v1  ;;  %v1468_v5 = vld [vmem:[%s1602_s26 + $0x4] ss:$8 sps:$4 sm:$0xff]   ;;  %v1471_v7 = vld [vmem:[%s1602_s26 + $0xd4] ss:$8 sps:$4 sm:$0xff]   ;;  %v1466_v15 = vld [vmem:[%s1602_s26] ss:$8 sps:$4 sm:$0xff]  }
  0x11   : > { %1293 = vmatprep.mubr.msk.bf16.mxu0 %vm556_vm0, %v1468_v5  ;;  %1306 = vmatprep.mubr.msk.bf16.mxu1 %vm556_vm0, %v1471_v7  ;;  %v1469_v16 = vld [vmem:[%s1602_s26 + $0xd0] ss:$8 sps:$4 sm:$0xff]   ;;  %v1472_v17 = vld [vmem:[%s1602_s26 + $0x14] ss:$8 sps:$4 sm:$0xff]   ;;  %v1475_v18 = vld [vmem:[%s1602_s26 + $0xe4] ss:$8 sps:$4 sm:$0xff]  }
  0x12   : > { %v1474_v19 = vld [vmem:[%s1602_s26 + $0x10] ss:$8 sps:$4 sm:$0xff]   ;;  %v1477_v20 = vld [vmem:[%s1602_s26 + $0xe0] ss:$8 sps:$4 sm:$0xff]   ;;  %v1478_v21 = vld [vmem:[%s1602_s26 + $0x24] ss:$8 sps:$4 sm:$0xff]  }
  0x13   : > { %639 = vmatpush1.bf16.msra.mxu0 %v1457_v4  ;;  %1436 = vmatpush1.bf16.msra.mxu1 %v1457_v4  ;;  %v1481_v22 = vld [vmem:[%s1602_s26 + $0xf4] ss:$8 sps:$4 sm:$0xff]   ;;  %v1480_v23 = vld [vmem:[%s1602_s26 + $0x20] ss:$8 sps:$4 sm:$0xff]   ;;  %v1483_v24 = vld [vmem:[%s1602_s26 + $0xf0] ss:$8 sps:$4 sm:$0xff]  }
  0x14   : > { %640 = vmatprep.subr.bf16.mxu0 %v1549_v1  ;;  %1425 = vmatprep.subr.bf16.mxu1 %v1549_v1  ;;  %v1484_v25 = vld [vmem:[%s1602_s26 + $0x34] ss:$8 sps:$4 sm:$0xff]   ;;  %v1487_v26 = vld [vmem:[%s1602_s26 + $0x104] ss:$8 sps:$4 sm:$0xff]   ;;  %v1486_v27 = vld [vmem:[%s1602_s26 + $0x30] ss:$8 sps:$4 sm:$0xff]  }
  0x15   : > { %v1489_v28 = vld [vmem:[%s1602_s26 + $0x100] ss:$8 sps:$4 sm:$0xff]   ;;  %v1490_v29 = vld [vmem:[%s1602_s26 + $0x44] ss:$8 sps:$4 sm:$0xff]   ;;  %v1493_v30 = vld [vmem:[%s1602_s26 + $0x114] ss:$8 sps:$4 sm:$0xff]  }
  0x16   : > { %v1492_v31 = vld [vmem:[%s1602_s26 + $0x40] ss:$8 sps:$4 sm:$0xff]   ;;  %v1495_v32 = vld [vmem:[%s1602_s26 + $0x110] ss:$8 sps:$4 sm:$0xff]   ;;  %v1496_v33 = vld [vmem:[%s1602_s26 + $0x54] ss:$8 sps:$4 sm:$0xff]  }
  0x17   : > { %641 = vmatpush1.bf16.msra.mxu0 %v1458_v6  ;;  %1437 = vmatpush1.bf16.msra.mxu1 %v1458_v6  ;;  %v1499_v34 = vld [vmem:[%s1602_s26 + $0x124] ss:$8 sps:$4 sm:$0xff]   ;;  %v1498_v35 = vld [vmem:[%s1602_s26 + $0x50] ss:$8 sps:$4 sm:$0xff]   ;;  %v1501_v36 = vld [vmem:[%s1602_s26 + $0x120] ss:$8 sps:$4 sm:$0xff]  }
  0x18   : > { %642 = vmatprep.subr.bf16.mxu0 %v1549_v1  ;;  %1426 = vmatprep.subr.bf16.mxu1 %v1549_v1  ;;  %v1502_v37 = vld [vmem:[%s1602_s26 + $0x64] ss:$8 sps:$4 sm:$0xff]   ;;  %v1505_v38 = vld [vmem:[%s1602_s26 + $0x134] ss:$8 sps:$4 sm:$0xff]   ;;  %v1504_v39 = vld [vmem:[%s1602_s26 + $0x60] ss:$8 sps:$4 sm:$0xff]  }
  0x19   : > { %v1507_v40 = vld [vmem:[%s1602_s26 + $0x130] ss:$8 sps:$4 sm:$0xff]   ;;  %v1508_v41 = vld [vmem:[%s1602_s26 + $0x74] ss:$8 sps:$4 sm:$0xff]   ;;  %v1511_v42 = vld [vmem:[%s1602_s26 + $0x144] ss:$8 sps:$4 sm:$0xff]  }
  0x1a   : > { %v1510_v43 = vld [vmem:[%s1602_s26 + $0x70] ss:$8 sps:$4 sm:$0xff]   ;;  %v1513_v44 = vld [vmem:[%s1602_s26 + $0x140] ss:$8 sps:$4 sm:$0xff]   ;;  %v1514_v45 = vld [vmem:[%s1602_s26 + $0x84] ss:$8 sps:$4 sm:$0xff]  }
  0x1b   : > { %643 = vmatpush1.bf16.msra.mxu0 %v1459_v8  ;;  %1438 = vmatpush1.bf16.msra.mxu1 %v1459_v8  ;;  %v1517_v46 = vld [vmem:[%s1602_s26 + $0x154] ss:$8 sps:$4 sm:$0xff]   ;;  %v1516_v47 = vld [vmem:[%s1602_s26 + $0x80] ss:$8 sps:$4 sm:$0xff]   ;;  %v1519_v48 = vld [vmem:[%s1602_s26 + $0x150] ss:$8 sps:$4 sm:$0xff]  }
  0x1c   : > { %644 = vmatprep.subr.bf16.mxu0 %v1549_v1  ;;  %1427 = vmatprep.subr.bf16.mxu1 %v1549_v1  ;;  %v1520_v49 = vld [vmem:[%s1602_s26 + $0x94] ss:$8 sps:$4 sm:$0xff]   ;;  %v1523_v50 = vld [vmem:[%s1602_s26 + $0x164] ss:$8 sps:$4 sm:$0xff]   ;;  %v1522_v51 = vld [vmem:[%s1602_s26 + $0x90] ss:$8 sps:$4 sm:$0xff]  }
  0x1d   : > { %v1525_v52 = vld [vmem:[%s1602_s26 + $0x160] ss:$8 sps:$4 sm:$0xff]   ;;  %v1526_v53 = vld [vmem:[%s1602_s26 + $0xa4] ss:$8 sps:$4 sm:$0xff]   ;;  %v1529_v54 = vld [vmem:[%s1602_s26 + $0x174] ss:$8 sps:$4 sm:$0xff]  }
  0x1e   : > { %v1528_v55 = vld [vmem:[%s1602_s26 + $0xa0] ss:$8 sps:$4 sm:$0xff]   ;;  %v1531_v56 = vld [vmem:[%s1602_s26 + $0x170] ss:$8 sps:$4 sm:$0xff]   ;;  %v1532_v57 = vld [vmem:[%s1602_s26 + $0xb4] ss:$8 sps:$4 sm:$0xff]  }
  0x1f   : > { %645 = vmatpush1.bf16.msra.mxu0 %v1460_v9  ;;  %1439 = vmatpush1.bf16.msra.mxu1 %v1460_v9  ;;  %v1535_v58 = vld [vmem:[%s1602_s26 + $0x184] ss:$8 sps:$4 sm:$0xff]   ;;  %v1534_v59 = vld [vmem:[%s1602_s26 + $0xb0] ss:$8 sps:$4 sm:$0xff]   ;;  %v1537_v60 = vld [vmem:[%s1602_s26 + $0x180] ss:$8 sps:$4 sm:$0xff]  }
  0x20   : > { %646 = vmatprep.subr.bf16.mxu0 %v1549_v1  ;;  %1428 = vmatprep.subr.bf16.mxu1 %v1549_v1  ;;  %v1538_v61 = vld [vmem:[%s1602_s26 + $0xc4] ss:$8 sps:$4 sm:$0xff]   ;;  %v1540_v62 = vld [vmem:[%s1602_s26 + $0xc0] ss:$8 sps:$4 sm:$0xff]  }
  0x23   : > { %647 = vmatpush1.bf16.msra.mxu0 %v1461_v10  ;;  %1440 = vmatpush1.bf16.msra.mxu1 %v1461_v10 }
  0x24   : > { %648 = vmatprep.subr.bf16.mxu0 %v1549_v1  ;;  %1429 = vmatprep.subr.bf16.mxu1 %v1549_v1 }
  0x27   : > { %649 = vmatpush1.bf16.msra.mxu0 %v1462_v11  ;;  %1441 = vmatpush1.bf16.msra.mxu1 %v1462_v11 }
  0x28   : > { %650 = vmatprep.subr.bf16.mxu0 %v1549_v1  ;;  %1430 = vmatprep.subr.bf16.mxu1 %v1549_v1 }
  0x2b   : > { %651 = vmatpush1.bf16.msra.mxu0 %v1463_v12  ;;  %1442 = vmatpush1.bf16.msra.mxu1 %v1463_v12 }
  0x2c   : > { %652 = vmatprep.subr.bf16.mxu0 %v1549_v1  ;;  %1431 = vmatprep.subr.bf16.mxu1 %v1549_v1 }
  0x2f   : > { %653 = vmatpush1.bf16.msra.mxu0 %v1464_v13  ;;  %1443 = vmatpush1.bf16.msra.mxu1 %v1464_v13 }
  0x30   : > { %654 = vmatprep.subr.bf16.mxu0 %v1549_v1  ;;  %1432 = vmatprep.subr.bf16.mxu1 %v1549_v1 }
  0x33   : > { %655 = vmatpush1.bf16.msra.mxu0 %v1465_v14  ;;  %1444 = vmatpush1.bf16.msra.mxu1 %v1465_v14 }
  0x36   : > { %665 = vmatmul.mubr.bf16.vlgmr.msra.gmra.mrb[0].mxu0 %v1466_v15  ;;  %769 = vmatmul.mubr.bf16.vlgmr.msra.gmra.mrb[0].mxu1 %v1469_v16 }
  0x37   : > { %1294 = vmatprep.mubr.msk.bf16.mxu0 %vm556_vm0, %v1472_v17  ;;  %1307 = vmatprep.mubr.msk.bf16.mxu1 %vm556_vm0, %v1475_v18 }
  0x3e   : > { %673 = vmatmul.mubr.bf16.gmra.mrb[4].mxu0 %v1474_v19  ;;  %777 = vmatmul.mubr.bf16.gmra.mrb[4].mxu1 %v1477_v20 }
  0x3f   : > { %1295 = vmatprep.mubr.msk.bf16.mxu0 %vm556_vm0, %v1478_v21  ;;  %1308 = vmatprep.mubr.msk.bf16.mxu1 %vm556_vm0, %v1481_v22 }
  0x46   : > { %681 = vmatmul.mubr.bf16.gmra.mrb[8].mxu0 %v1480_v23  ;;  %785 = vmatmul.mubr.bf16.gmra.mrb[8].mxu1 %v1483_v24 }
  0x47   : > { %1296 = vmatprep.mubr.msk.bf16.mxu0 %vm556_vm0, %v1484_v25  ;;  %1309 = vmatprep.mubr.msk.bf16.mxu1 %vm556_vm0, %v1487_v26 }
  0x4e   : > { %689 = vmatmul.mubr.bf16.gmra.mrb[12].mxu0 %v1486_v27  ;;  %793 = vmatmul.mubr.bf16.gmra.mrb[12].mxu1 %v1489_v28 }
  0x4f   : > { %1297 = vmatprep.mubr.msk.bf16.mxu0 %vm556_vm0, %v1490_v29  ;;  %1310 = vmatprep.mubr.msk.bf16.mxu1 %vm556_vm0, %v1493_v30 }
  0x56   : > { %697 = vmatmul.mubr.bf16.gmra.mrb[16].mxu0 %v1492_v31  ;;  %801 = vmatmul.mubr.bf16.gmra.mrb[16].mxu1 %v1495_v32 }
  0x57   : > { %1298 = vmatprep.mubr.msk.bf16.mxu0 %vm556_vm0, %v1496_v33  ;;  %1311 = vmatprep.mubr.msk.bf16.mxu1 %vm556_vm0, %v1499_v34 }
  0x5e   : > { %705 = vmatmul.mubr.bf16.gmra.mrb[20].mxu0 %v1498_v35  ;;  %809 = vmatmul.mubr.bf16.gmra.mrb[20].mxu1 %v1501_v36 }
  0x5f   : > { %1299 = vmatprep.mubr.msk.bf16.mxu0 %vm556_vm0, %v1502_v37  ;;  %1312 = vmatprep.mubr.msk.bf16.mxu1 %vm556_vm0, %v1505_v38 }
  0x66   : > { %713 = vmatmul.mubr.bf16.gmra.mrb[24].mxu0 %v1504_v39  ;;  %817 = vmatmul.mubr.bf16.gmra.mrb[24].mxu1 %v1507_v40 }
  0x67   : > { %1300 = vmatprep.mubr.msk.bf16.mxu0 %vm556_vm0, %v1508_v41  ;;  %1313 = vmatprep.mubr.msk.bf16.mxu1 %vm556_vm0, %v1511_v42 }
  0x6e   : > { %721 = vmatmul.mubr.bf16.gmra.mrb[28].mxu0 %v1510_v43  ;;  %825 = vmatmul.mubr.bf16.gmra.mrb[28].mxu1 %v1513_v44 }
  0x6f   : > { %1301 = vmatprep.mubr.msk.bf16.mxu0 %vm556_vm0, %v1514_v45  ;;  %1314 = vmatprep.mubr.msk.bf16.mxu1 %vm556_vm0, %v1517_v46 }
  0x76   : > { %729 = vmatmul.mubr.bf16.gmra.mrb[32].mxu0 %v1516_v47  ;;  %833 = vmatmul.mubr.bf16.gmra.mrb[32].mxu1 %v1519_v48 }
  0x77   : > { %1302 = vmatprep.mubr.msk.bf16.mxu0 %vm556_vm0, %v1520_v49  ;;  %1315 = vmatprep.mubr.msk.bf16.mxu1 %vm556_vm0, %v1523_v50 }
  0x7e   : > { %737 = vmatmul.mubr.bf16.gmra.mrb[36].mxu0 %v1522_v51  ;;  %841 = vmatmul.mubr.bf16.gmra.mrb[36].mxu1 %v1525_v52 }
  0x7f   : > { %1303 = vmatprep.mubr.msk.bf16.mxu0 %vm556_vm0, %v1526_v53  ;;  %1316 = vmatprep.mubr.msk.bf16.mxu1 %vm556_vm0, %v1529_v54 }
  0x86   : > { %745 = vmatmul.mubr.bf16.gmra.mrb[40].mxu0 %v1528_v55  ;;  %849 = vmatmul.mubr.bf16.gmra.mrb[40].mxu1 %v1531_v56 }
  0x87   : > { %1304 = vmatprep.mubr.msk.bf16.mxu0 %vm556_vm0, %v1532_v57  ;;  %1317 = vmatprep.mubr.msk.bf16.mxu1 %vm556_vm0, %v1535_v58 }
  0x8e   : > { %753 = vmatmul.mubr.bf16.gmra.mrb[44].mxu0 %v1534_v59  ;;  %857 = vmatmul.mubr.bf16.gmra.mrb[44].mxu1 %v1537_v60 }
  0x8f   : > { %1305 = vmatprep.mubr.msk.bf16.mxu0 %vm556_vm0, %v1538_v61 }
  0x96   : > { %761 = vmatmul.mubr.bf16.gmra.mrb[48].mxu0 %v1540_v62 }
 0x109   : > { %v666_v0 = vpop.f32.mrb[0].mxu0  ;;  %v770_v1 = vpop.f32.mrb[0].mxu1 }
 0x10a   : > { %v667_v2 = vadd.f32 %v1724_v63, %v666_v0  ;;  %v668_v3 = vpop.f32.mrb[1].mxu0  ;;  %v771_v4 = vadd.f32 %v1724_v63, %v770_v1  ;;  %v772_v5 = vpop.f32.mrb[1].mxu1 }
 0x10b   : > { %v669_v6 = vpop.f32.mrb[2].mxu0  ;;  %v773_v7 = vpop.f32.mrb[2].mxu1 }
 0x10c   : > { %v865_v8 = vmax.f32 %v667_v2, 0.0  ;;  %v670_v9 = vadd.f32 %v1724_v63, %v669_v6  ;;  %v671_v10 = vpop.f32.mrb[3].mxu0  ;;  %v891_v11 = vmax.f32 %v771_v4, 0.0  ;;  %v774_v12 = vadd.f32 %v1724_v63, %v773_v7  ;;  %v775_v13 = vpop.f32.mrb[3].mxu1 }
 0x10e   : > { %v1371_v14 = vpack.c.bf16 %v865_v8, %v865_v8  ;;  %v866_v15 = vmax.f32 %v670_v9, 0.0  ;;  %v1397_v16 = vpack.c.bf16 %v891_v11, %v891_v11  ;;  %v892_v17 = vmax.f32 %v774_v12, 0.0 }
 0x110   : > { %1116 = vst.msk [vmem:[%s1734_s16] sm:$0xf] %vm1115_vm1, %v1371_v14  ;;  %v1372_v18 = vpack.c.bf16 %v866_v15, %v866_v15  ;;  %1142 = vst.msk [vmem:[%s1734_s16 + $0x68] sm:$0xf] %vm1115_vm1, %v1397_v16  ;;  %v1398_v19 = vpack.c.bf16 %v892_v17, %v892_v17 }
 0x111   : > { %v674_v20 = vpop.f32.mrb[4].mxu0  ;;  %v778_v21 = vpop.f32.mrb[4].mxu1 }
 0x112   : > { %1117 = vst.msk [vmem:[%s1734_s16 + $0x4] sm:$0xf] %vm1115_vm1, %v1372_v18  ;;  %1143 = vst.msk [vmem:[%s1734_s16 + $0x6c] sm:$0xf] %vm1115_vm1, %v1398_v19  ;;  %v675_v22 = vadd.f32 %v1724_v63, %v674_v20  ;;  %v676_v23 = vpop.f32.mrb[5].mxu0  ;;  %v779_v24 = vadd.f32 %v1724_v63, %v778_v21  ;;  %v780_v25 = vpop.f32.mrb[5].mxu1 }
 0x113   : > { %v677_v26 = vpop.f32.mrb[6].mxu0  ;;  %v781_v27 = vpop.f32.mrb[6].mxu1 }
 0x114   : > { %v867_v28 = vmax.f32 %v675_v22, 0.0  ;;  %v678_v29 = vadd.f32 %v1724_v63, %v677_v26  ;;  %v679_v30 = vpop.f32.mrb[7].mxu0  ;;  %v893_v31 = vmax.f32 %v779_v24, 0.0  ;;  %v782_v32 = vadd.f32 %v1724_v63, %v781_v27  ;;  %v783_v33 = vpop.f32.mrb[7].mxu1 }
 0x116   : > { %v1373_v34 = vpack.c.bf16 %v867_v28, %v867_v28  ;;  %v868_v35 = vmax.f32 %v678_v29, 0.0  ;;  %v1399_v36 = vpack.c.bf16 %v893_v31, %v893_v31  ;;  %v894_v37 = vmax.f32 %v782_v32, 0.0 }
 0x118   : > { %1118 = vst.msk [vmem:[%s1734_s16 + $0x8] sm:$0xf] %vm1115_vm1, %v1373_v34  ;;  %v1374_v38 = vpack.c.bf16 %v868_v35, %v868_v35  ;;  %1144 = vst.msk [vmem:[%s1734_s16 + $0x70] sm:$0xf] %vm1115_vm1, %v1399_v36  ;;  %v1400_v39 = vpack.c.bf16 %v894_v37, %v894_v37 }
 0x119   : > { %v682_v40 = vpop.f32.mrb[8].mxu0  ;;  %v786_v41 = vpop.f32.mrb[8].mxu1 }
 0x11a   : > { %1119 = vst.msk [vmem:[%s1734_s16 + $0xc] sm:$0xf] %vm1115_vm1, %v1374_v38  ;;  %1145 = vst.msk [vmem:[%s1734_s16 + $0x74] sm:$0xf] %vm1115_vm1, %v1400_v39  ;;  %v683_v42 = vadd.f32 %v1724_v63, %v682_v40  ;;  %v684_v43 = vpop.f32.mrb[9].mxu0  ;;  %v787_v44 = vadd.f32 %v1724_v63, %v786_v41  ;;  %v788_v45 = vpop.f32.mrb[9].mxu1 }
 0x11b   : > { %v685_v46 = vpop.f32.mrb[10].mxu0  ;;  %v789_v47 = vpop.f32.mrb[10].mxu1 }
 0x11c   : > { %v869_v48 = vmax.f32 %v683_v42, 0.0  ;;  %v686_v49 = vadd.f32 %v1724_v63, %v685_v46  ;;  %v687_v50 = vpop.f32.mrb[11].mxu0  ;;  %v895_v51 = vmax.f32 %v787_v44, 0.0  ;;  %v790_v52 = vadd.f32 %v1724_v63, %v789_v47  ;;  %v791_v53 = vpop.f32.mrb[11].mxu1 }
 0x11e   : > { %v1375_v54 = vpack.c.bf16 %v869_v48, %v869_v48  ;;  %v870_v55 = vmax.f32 %v686_v49, 0.0  ;;  %v1401_v56 = vpack.c.bf16 %v895_v51, %v895_v51  ;;  %v896_v57 = vmax.f32 %v790_v52, 0.0 }
 0x120   : > { %1120 = vst.msk [vmem:[%s1734_s16 + $0x10] sm:$0xf] %vm1115_vm1, %v1375_v54  ;;  %v1376_v58 = vpack.c.bf16 %v870_v55, %v870_v55  ;;  %1146 = vst.msk [vmem:[%s1734_s16 + $0x78] sm:$0xf] %vm1115_vm1, %v1401_v56  ;;  %v1402_v59 = vpack.c.bf16 %v896_v57, %v896_v57 }
 0x121   : > { %v690_v60 = vpop.f32.mrb[12].mxu0  ;;  %v794_v61 = vpop.f32.mrb[12].mxu1 }
 0x122   : > { %1121 = vst.msk [vmem:[%s1734_s16 + $0x14] sm:$0xf] %vm1115_vm1, %v1376_v58  ;;  %1147 = vst.msk [vmem:[%s1734_s16 + $0x7c] sm:$0xf] %vm1115_vm1, %v1402_v59  ;;  %v691_v62 = vadd.f32 %v1724_v63, %v690_v60  ;;  %v692_v0 = vpop.f32.mrb[13].mxu0  ;;  %v795_v1 = vadd.f32 %v1724_v63, %v794_v61  ;;  %v796_v2 = vpop.f32.mrb[13].mxu1 }
 0x123   : > { %v693_v3 = vpop.f32.mrb[14].mxu0  ;;  %v797_v4 = vpop.f32.mrb[14].mxu1 }
 0x124   : > { %v871_v5 = vmax.f32 %v691_v62, 0.0  ;;  %v694_v6 = vadd.f32 %v1724_v63, %v693_v3  ;;  %v695_v7 = vpop.f32.mrb[15].mxu0  ;;  %v897_v8 = vmax.f32 %v795_v1, 0.0  ;;  %v798_v9 = vadd.f32 %v1724_v63, %v797_v4  ;;  %v799_v10 = vpop.f32.mrb[15].mxu1 }
 0x126   : > { %v1377_v11 = vpack.c.bf16 %v871_v5, %v871_v5  ;;  %v872_v12 = vmax.f32 %v694_v6, 0.0  ;;  %v1403_v13 = vpack.c.bf16 %v897_v8, %v897_v8  ;;  %v898_v14 = vmax.f32 %v798_v9, 0.0 }
 0x128   : > { %1122 = vst.msk [vmem:[%s1734_s16 + $0x18] sm:$0xf] %vm1115_vm1, %v1377_v11  ;;  %v1378_v15 = vpack.c.bf16 %v872_v12, %v872_v12  ;;  %1148 = vst.msk [vmem:[%s1734_s16 + $0x80] sm:$0xf] %vm1115_vm1, %v1403_v13  ;;  %v1404_v16 = vpack.c.bf16 %v898_v14, %v898_v14 }
 0x129   : > { %v698_v17 = vpop.f32.mrb[16].mxu0  ;;  %v802_v18 = vpop.f32.mrb[16].mxu1 }
 0x12a   : > { %1123 = vst.msk [vmem:[%s1734_s16 + $0x1c] sm:$0xf] %vm1115_vm1, %v1378_v15  ;;  %1149 = vst.msk [vmem:[%s1734_s16 + $0x84] sm:$0xf] %vm1115_vm1, %v1404_v16  ;;  %v699_v19 = vadd.f32 %v1724_v63, %v698_v17  ;;  %v700_v20 = vpop.f32.mrb[17].mxu0  ;;  %v803_v21 = vadd.f32 %v1724_v63, %v802_v18  ;;  %v804_v22 = vpop.f32.mrb[17].mxu1 }
 0x12b   : > { %v701_v23 = vpop.f32.mrb[18].mxu0  ;;  %v805_v24 = vpop.f32.mrb[18].mxu1 }
 0x12c   : > { %v873_v25 = vmax.f32 %v699_v19, 0.0  ;;  %v702_v26 = vadd.f32 %v1724_v63, %v701_v23  ;;  %v703_v27 = vpop.f32.mrb[19].mxu0  ;;  %v899_v28 = vmax.f32 %v803_v21, 0.0  ;;  %v806_v29 = vadd.f32 %v1724_v63, %v805_v24  ;;  %v807_v30 = vpop.f32.mrb[19].mxu1 }
 0x12e   : > { %v1379_v31 = vpack.c.bf16 %v873_v25, %v873_v25  ;;  %v874_v32 = vmax.f32 %v702_v26, 0.0  ;;  %v1405_v33 = vpack.c.bf16 %v899_v28, %v899_v28  ;;  %v900_v34 = vmax.f32 %v806_v29, 0.0 }
 0x130   : > { %1124 = vst.msk [vmem:[%s1734_s16 + $0x20] sm:$0xf] %vm1115_vm1, %v1379_v31  ;;  %v1380_v35 = vpack.c.bf16 %v874_v32, %v874_v32  ;;  %1150 = vst.msk [vmem:[%s1734_s16 + $0x88] sm:$0xf] %vm1115_vm1, %v1405_v33  ;;  %v1406_v36 = vpack.c.bf16 %v900_v34, %v900_v34 }
 0x131   : > { %v706_v37 = vpop.f32.mrb[20].mxu0  ;;  %v810_v38 = vpop.f32.mrb[20].mxu1 }
 0x132   : > { %1125 = vst.msk [vmem:[%s1734_s16 + $0x24] sm:$0xf] %vm1115_vm1, %v1380_v35  ;;  %1151 = vst.msk [vmem:[%s1734_s16 + $0x8c] sm:$0xf] %vm1115_vm1, %v1406_v36  ;;  %v707_v39 = vadd.f32 %v1724_v63, %v706_v37  ;;  %v708_v40 = vpop.f32.mrb[21].mxu0  ;;  %v811_v41 = vadd.f32 %v1724_v63, %v810_v38  ;;  %v812_v42 = vpop.f32.mrb[21].mxu1 }
 0x133   : > { %v709_v43 = vpop.f32.mrb[22].mxu0  ;;  %v813_v44 = vpop.f32.mrb[22].mxu1 }
 0x134   : > { %v875_v45 = vmax.f32 %v707_v39, 0.0  ;;  %v710_v46 = vadd.f32 %v1724_v63, %v709_v43  ;;  %v711_v47 = vpop.f32.mrb[23].mxu0  ;;  %v901_v48 = vmax.f32 %v811_v41, 0.0  ;;  %v814_v49 = vadd.f32 %v1724_v63, %v813_v44  ;;  %v815_v50 = vpop.f32.mrb[23].mxu1 }
 0x136   : > { %v1381_v51 = vpack.c.bf16 %v875_v45, %v875_v45  ;;  %v876_v52 = vmax.f32 %v710_v46, 0.0  ;;  %v1407_v53 = vpack.c.bf16 %v901_v48, %v901_v48  ;;  %v902_v54 = vmax.f32 %v814_v49, 0.0 }
 0x138   : > { %1126 = vst.msk [vmem:[%s1734_s16 + $0x28] sm:$0xf] %vm1115_vm1, %v1381_v51  ;;  %v1382_v55 = vpack.c.bf16 %v876_v52, %v876_v52  ;;  %1152 = vst.msk [vmem:[%s1734_s16 + $0x90] sm:$0xf] %vm1115_vm1, %v1407_v53  ;;  %v1408_v56 = vpack.c.bf16 %v902_v54, %v902_v54 }
 0x139   : > { %v714_v57 = vpop.f32.mrb[24].mxu0  ;;  %v818_v58 = vpop.f32.mrb[24].mxu1 }
 0x13a   : > { %1127 = vst.msk [vmem:[%s1734_s16 + $0x2c] sm:$0xf] %vm1115_vm1, %v1382_v55  ;;  %1153 = vst.msk [vmem:[%s1734_s16 + $0x94] sm:$0xf] %vm1115_vm1, %v1408_v56  ;;  %v715_v59 = vadd.f32 %v1724_v63, %v714_v57  ;;  %v716_v60 = vpop.f32.mrb[25].mxu0  ;;  %v819_v61 = vadd.f32 %v1724_v63, %v818_v58  ;;  %v820_v62 = vpop.f32.mrb[25].mxu1 }
 0x13b   : > { %v717_v0 = vpop.f32.mrb[26].mxu0  ;;  %v821_v1 = vpop.f32.mrb[26].mxu1 }
 0x13c   : > { %v877_v2 = vmax.f32 %v715_v59, 0.0  ;;  %v718_v3 = vadd.f32 %v1724_v63, %v717_v0  ;;  %v719_v4 = vpop.f32.mrb[27].mxu0  ;;  %v903_v5 = vmax.f32 %v819_v61, 0.0  ;;  %v822_v6 = vadd.f32 %v1724_v63, %v821_v1  ;;  %v823_v7 = vpop.f32.mrb[27].mxu1 }
 0x13e   : > { %v1383_v8 = vpack.c.bf16 %v877_v2, %v877_v2  ;;  %v878_v9 = vmax.f32 %v718_v3, 0.0  ;;  %v1409_v10 = vpack.c.bf16 %v903_v5, %v903_v5  ;;  %v904_v11 = vmax.f32 %v822_v6, 0.0 }
 0x140   : > { %1128 = vst.msk [vmem:[%s1734_s16 + $0x30] sm:$0xf] %vm1115_vm1, %v1383_v8  ;;  %v1384_v12 = vpack.c.bf16 %v878_v9, %v878_v9  ;;  %1154 = vst.msk [vmem:[%s1734_s16 + $0x98] sm:$0xf] %vm1115_vm1, %v1409_v10  ;;  %v1410_v13 = vpack.c.bf16 %v904_v11, %v904_v11 }
 0x141   : > { %v722_v14 = vpop.f32.mrb[28].mxu0  ;;  %v826_v15 = vpop.f32.mrb[28].mxu1 }
 0x142   : > { %1129 = vst.msk [vmem:[%s1734_s16 + $0x34] sm:$0xf] %vm1115_vm1, %v1384_v12  ;;  %1155 = vst.msk [vmem:[%s1734_s16 + $0x9c] sm:$0xf] %vm1115_vm1, %v1410_v13  ;;  %v723_v16 = vadd.f32 %v1724_v63, %v722_v14  ;;  %v724_v17 = vpop.f32.mrb[29].mxu0  ;;  %v827_v18 = vadd.f32 %v1724_v63, %v826_v15  ;;  %v828_v19 = vpop.f32.mrb[29].mxu1 }
 0x143   : > { %v725_v20 = vpop.f32.mrb[30].mxu0  ;;  %v829_v21 = vpop.f32.mrb[30].mxu1 }
 0x144   : > { %v879_v22 = vmax.f32 %v723_v16, 0.0  ;;  %v726_v23 = vadd.f32 %v1724_v63, %v725_v20  ;;  %v727_v24 = vpop.f32.mrb[31].mxu0  ;;  %v905_v25 = vmax.f32 %v827_v18, 0.0  ;;  %v830_v26 = vadd.f32 %v1724_v63, %v829_v21  ;;  %v831_v27 = vpop.f32.mrb[31].mxu1 }
 0x146   : > { %v1385_v28 = vpack.c.bf16 %v879_v22, %v879_v22  ;;  %v880_v29 = vmax.f32 %v726_v23, 0.0  ;;  %v1411_v30 = vpack.c.bf16 %v905_v25, %v905_v25  ;;  %v906_v31 = vmax.f32 %v830_v26, 0.0 }
 0x148   : > { %1130 = vst.msk [vmem:[%s1734_s16 + $0x38] sm:$0xf] %vm1115_vm1, %v1385_v28  ;;  %v1386_v32 = vpack.c.bf16 %v880_v29, %v880_v29  ;;  %1156 = vst.msk [vmem:[%s1734_s16 + $0xa0] sm:$0xf] %vm1115_vm1, %v1411_v30  ;;  %v1412_v33 = vpack.c.bf16 %v906_v31, %v906_v31 }
 0x149   : > { %v730_v34 = vpop.f32.mrb[32].mxu0  ;;  %v834_v35 = vpop.f32.mrb[32].mxu1 }
 0x14a   : > { %1131 = vst.msk [vmem:[%s1734_s16 + $0x3c] sm:$0xf] %vm1115_vm1, %v1386_v32  ;;  %1157 = vst.msk [vmem:[%s1734_s16 + $0xa4] sm:$0xf] %vm1115_vm1, %v1412_v33  ;;  %v731_v36 = vadd.f32 %v1724_v63, %v730_v34  ;;  %v732_v37 = vpop.f32.mrb[33].mxu0  ;;  %v835_v38 = vadd.f32 %v1724_v63, %v834_v35  ;;  %v836_v39 = vpop.f32.mrb[33].mxu1 }
 0x14b   : > { %v733_v40 = vpop.f32.mrb[34].mxu0  ;;  %v837_v41 = vpop.f32.mrb[34].mxu1 }
 0x14c   : > { %v881_v42 = vmax.f32 %v731_v36, 0.0  ;;  %v734_v43 = vadd.f32 %v1724_v63, %v733_v40  ;;  %v735_v44 = vpop.f32.mrb[35].mxu0  ;;  %v907_v45 = vmax.f32 %v835_v38, 0.0  ;;  %v838_v46 = vadd.f32 %v1724_v63, %v837_v41  ;;  %v839_v47 = vpop.f32.mrb[35].mxu1 }
 0x14e   : > { %v1387_v48 = vpack.c.bf16 %v881_v42, %v881_v42  ;;  %v882_v49 = vmax.f32 %v734_v43, 0.0  ;;  %v1413_v50 = vpack.c.bf16 %v907_v45, %v907_v45  ;;  %v908_v51 = vmax.f32 %v838_v46, 0.0 }
 0x150   : > { %1132 = vst.msk [vmem:[%s1734_s16 + $0x40] sm:$0xf] %vm1115_vm1, %v1387_v48  ;;  %v1388_v52 = vpack.c.bf16 %v882_v49, %v882_v49  ;;  %1158 = vst.msk [vmem:[%s1734_s16 + $0xa8] sm:$0xf] %vm1115_vm1, %v1413_v50  ;;  %v1414_v53 = vpack.c.bf16 %v908_v51, %v908_v51 }
 0x151   : > { %v738_v54 = vpop.f32.mrb[36].mxu0  ;;  %v842_v55 = vpop.f32.mrb[36].mxu1 }
 0x152   : > { %1133 = vst.msk [vmem:[%s1734_s16 + $0x44] sm:$0xf] %vm1115_vm1, %v1388_v52  ;;  %1159 = vst.msk [vmem:[%s1734_s16 + $0xac] sm:$0xf] %vm1115_vm1, %v1414_v53  ;;  %v739_v56 = vadd.f32 %v1724_v63, %v738_v54  ;;  %v740_v57 = vpop.f32.mrb[37].mxu0  ;;  %v843_v58 = vadd.f32 %v1724_v63, %v842_v55  ;;  %v844_v59 = vpop.f32.mrb[37].mxu1 }
 0x153   : > { %v741_v60 = vpop.f32.mrb[38].mxu0  ;;  %v845_v61 = vpop.f32.mrb[38].mxu1 }
 0x154   : > { %v883_v62 = vmax.f32 %v739_v56, 0.0  ;;  %v742_v0 = vadd.f32 %v1724_v63, %v741_v60  ;;  %v743_v1 = vpop.f32.mrb[39].mxu0  ;;  %v909_v2 = vmax.f32 %v843_v58, 0.0  ;;  %v846_v3 = vadd.f32 %v1724_v63, %v845_v61  ;;  %v847_v4 = vpop.f32.mrb[39].mxu1 }
 0x156   : > { %v1389_v5 = vpack.c.bf16 %v883_v62, %v883_v62  ;;  %v884_v6 = vmax.f32 %v742_v0, 0.0  ;;  %v1415_v7 = vpack.c.bf16 %v909_v2, %v909_v2  ;;  %v910_v8 = vmax.f32 %v846_v3, 0.0 }
 0x158   : > { %1134 = vst.msk [vmem:[%s1734_s16 + $0x48] sm:$0xf] %vm1115_vm1, %v1389_v5  ;;  %v1390_v9 = vpack.c.bf16 %v884_v6, %v884_v6  ;;  %1160 = vst.msk [vmem:[%s1734_s16 + $0xb0] sm:$0xf] %vm1115_vm1, %v1415_v7  ;;  %v1416_v10 = vpack.c.bf16 %v910_v8, %v910_v8 }
 0x159   : > { %v746_v11 = vpop.f32.mrb[40].mxu0  ;;  %v850_v12 = vpop.f32.mrb[40].mxu1 }
 0x15a   : > { %1135 = vst.msk [vmem:[%s1734_s16 + $0x4c] sm:$0xf] %vm1115_vm1, %v1390_v9  ;;  %1161 = vst.msk [vmem:[%s1734_s16 + $0xb4] sm:$0xf] %vm1115_vm1, %v1416_v10  ;;  %v747_v13 = vadd.f32 %v1724_v63, %v746_v11  ;;  %v748_v14 = vpop.f32.mrb[41].mxu0  ;;  %v851_v15 = vadd.f32 %v1724_v63, %v850_v12  ;;  %v852_v16 = vpop.f32.mrb[41].mxu1 }
 0x15b   : > { %v749_v17 = vpop.f32.mrb[42].mxu0  ;;  %v853_v18 = vpop.f32.mrb[42].mxu1 }
 0x15c   : > { %v885_v19 = vmax.f32 %v747_v13, 0.0  ;;  %v750_v20 = vadd.f32 %v1724_v63, %v749_v17  ;;  %v751_v21 = vpop.f32.mrb[43].mxu0  ;;  %v911_v22 = vmax.f32 %v851_v15, 0.0  ;;  %v854_v23 = vadd.f32 %v1724_v63, %v853_v18  ;;  %v855_v24 = vpop.f32.mrb[43].mxu1 }
 0x15e   : > { %v1391_v25 = vpack.c.bf16 %v885_v19, %v885_v19  ;;  %v886_v26 = vmax.f32 %v750_v20, 0.0  ;;  %v1417_v27 = vpack.c.bf16 %v911_v22, %v911_v22  ;;  %v912_v28 = vmax.f32 %v854_v23, 0.0 }
 0x160   : > { %1136 = vst.msk [vmem:[%s1734_s16 + $0x50] sm:$0xf] %vm1115_vm1, %v1391_v25  ;;  %v1392_v29 = vpack.c.bf16 %v886_v26, %v886_v26  ;;  %1162 = vst.msk [vmem:[%s1734_s16 + $0xb8] sm:$0xf] %vm1115_vm1, %v1417_v27  ;;  %v1418_v30 = vpack.c.bf16 %v912_v28, %v912_v28 }
 0x161   : > { %v754_v31 = vpop.f32.mrb[44].mxu0  ;;  %v858_v32 = vpop.f32.mrb[44].mxu1 }
 0x162   : > { %1137 = vst.msk [vmem:[%s1734_s16 + $0x54] sm:$0xf] %vm1115_vm1, %v1392_v29  ;;  %1163 = vst.msk [vmem:[%s1734_s16 + $0xbc] sm:$0xf] %vm1115_vm1, %v1418_v30  ;;  %v755_v33 = vadd.f32 %v1724_v63, %v754_v31  ;;  %v756_v34 = vpop.f32.mrb[45].mxu0  ;;  %v859_v35 = vadd.f32 %v1724_v63, %v858_v32  ;;  %v860_v36 = vpop.f32.mrb[45].mxu1 }
 0x163   : > { %v757_v37 = vpop.f32.mrb[46].mxu0  ;;  %v861_v38 = vpop.f32.mrb[46].mxu1 }
 0x164   : > { %v887_v39 = vmax.f32 %v755_v33, 0.0  ;;  %v758_v40 = vadd.f32 %v1724_v63, %v757_v37  ;;  %v759_v41 = vpop.f32.mrb[47].mxu0  ;;  %v913_v42 = vmax.f32 %v859_v35, 0.0  ;;  %v862_v43 = vadd.f32 %v1724_v63, %v861_v38  ;;  %v863_v44 = vpop.f32.mrb[47].mxu1 }
 0x166   : > { %v1393_v45 = vpack.c.bf16 %v887_v39, %v887_v39  ;;  %v888_v46 = vmax.f32 %v758_v40, 0.0  ;;  %v1419_v47 = vpack.c.bf16 %v913_v42, %v913_v42  ;;  %v914_v48 = vmax.f32 %v862_v43, 0.0 }
 0x168   : > { %1138 = vst.msk [vmem:[%s1734_s16 + $0x58] sm:$0xf] %vm1115_vm1, %v1393_v45  ;;  %v1394_v49 = vpack.c.bf16 %v888_v46, %v888_v46  ;;  %1164 = vst.msk [vmem:[%s1734_s16 + $0xc0] sm:$0xf] %vm1115_vm1, %v1419_v47  ;;  %v1420_v50 = vpack.c.bf16 %v914_v48, %v914_v48 }
 0x169   : > { %v762_v51 = vpop.f32.mrb[48].mxu0 }
 0x16a   : > { %1139 = vst.msk [vmem:[%s1734_s16 + $0x5c] sm:$0xf] %vm1115_vm1, %v1394_v49  ;;  %1165 = vst.msk [vmem:[%s1734_s16 + $0xc4] sm:$0xf] %vm1115_vm1, %v1420_v50  ;;  %v763_v52 = vadd.f32 %v1724_v63, %v762_v51  ;;  %v764_v53 = vpop.f32.mrb[49].mxu0 }
 0x16b   : > { %v765_v54 = vpop.f32.mrb[50].mxu0 }
 0x16c   : > { %v889_v55 = vmax.f32 %v763_v52, 0.0  ;;  %v766_v56 = vadd.f32 %v1724_v63, %v765_v54  ;;  %v767_v57 = vpop.f32.mrb[51].mxu0 }
 0x16e   : > { %v1395_v58 = vpack.c.bf16 %v889_v55, %v889_v55  ;;  %v890_v59 = vmax.f32 %v766_v56, 0.0 }
 0x170   : > { %1140 = vst.msk [vmem:[%s1734_s16 + $0x60] sm:$0xf] %vm1115_vm1, %v1395_v58  ;;  %v1396_v60 = vpack.c.bf16 %v890_v59, %v890_v59 }
 0x172   : > { %1141 = vst.msk [vmem:[%s1734_s16 + $0x64] sm:$0xf] %vm1115_vm1, %v1396_v60 }
 0x173 PF: > { %s13_s12 = sadd.s32 1, %s1547_s12  }
 0x174   : > { %p10_p4 = scmp.ge.s32.totalorder %s13_s12, 4  }
 0x176   :  { %12 = sbr.rel (!%p10_p4) target bundleno = 1 (0x1), region = 62 }

// kernel: _lambda_.4
= control target key start
LH: loop header
LB: loop body
LE: loop exit
PB: predicated region body
PF: predicated region fallthrough
CT: control target
= control target key end

     0   :  { %s1182_s12 = smov 0   ;;  %s1184_s13 = smov 0   ;;  %s1380_s0 = inlined_call_operand.vmem [shape: bf16[162,256], index: 0, kind: input, shape index: {}]   ;;  %s1381_s1 = inlined_call_operand.vmem [shape: bf16[256,32], index: 1, kind: input, shape index: {}]   ;;  %s1382_s2 = inlined_call_operand.vmem [shape: f32[1,32], index: 2, kind: input, shape index: {}]   ;;  %s1383_s3 = inlined_call_operand.vmem [shape: bf16[162,32], index: 3, kind: output, shape index: {}]  }
   0x1   :  { %s1186_s14 = smov 0  }
   0x2 LB: > { %s1195_s15 = sadd.s32 4294967295, %s1128_s14   ;;  %s1197_s16 = sadd.s32 1, %s1128_s14   ;;  %s1128_s14 = sphi %s1186_s14, %s1390_s14   ;;  %s1124_s13 = sphi %s1184_s13, %s1389_s13   ;;  %s1120_s12 = sphi %s1182_s12, %s1388_s12  }
   0x3   : > { %s85_s17 = ssub.s32 %s1128_s14, %s1197_s16  ;;  %s88_s18 = sadd.s32 1, %s1124_s13 }
   0x4   : > { %p86_p0 = scmp.eq.s32.totalorder %s85_s17, 0  ;;  %p98_p1 = scmp.ne.s32.totalorder %s1124_s13, %s1120_s12 }
   0x5   : > { %p99_p2 = scmp.eq.s32.totalorder %s1195_s15, 1  ;;  %p811_p3 = scmp.ge.s32.totalorder %s1128_s14, 1 }
   0x6   : > { %s1205_s19 = scalar_select %p86_p0, %s1124_s13, %s88_s18  }
   0x7   : > { %p1207_p4 = por %p99_p2, %p98_p1  ;;  %p149_p5 = scmp.lt.s32.totalorder %s1128_s14, 3 }
   0x9   : > { %p150_p6 = pnand %p811_p3, %p149_p5 }
   0xa   : > { %v1037_v0 = vld [vmem:[%s1381_s1 + $0x40] sm:$0xff] (!%p150_p6)   ;;  %s1215_s23 = smul.u32 (!%p150_p6), 11, %s1195_s15  ;;  %v1039_v2 = vld [vmem:[%s1381_s1 + $0x48] sm:$0xff] (!%p150_p6)   ;;  %v1041_v4 = vld [vmem:[%s1381_s1 + $0x50] sm:$0xff] (!%p150_p6)   ;;  %vm540_vm0 = vcmask (!%p150_p6), 257024  }
   0xb   : > { %153 = sbr.rel (%p150_p6) target bundleno = 352 (0x160), region = 32  ;;  %v1038_v1 = vld [vmem:[%s1381_s1] sm:$0xff] (!%p150_p6)   ;;  %879 = vmatprep.subr.bf16.mxu0 (!%p150_p6), %v1037_v0  ;;  %931 = vmatprep.subr.bf16.mxu1 (!%p150_p6), %v1037_v0  ;;  %v1040_v3 = vld [vmem:[%s1381_s1 + $0x8] sm:$0xff] (!%p150_p6)   ;;  %v1042_v5 = vld [vmem:[%s1381_s1 + $0x10] sm:$0xff] (!%p150_p6)  }
   0xc   : > { %880 = vmatpush3.bf16.msra.mxu0 (!%p150_p6), %v1038_v1  ;;  %939 = vmatpush3.bf16.msra.mxu1 (!%p150_p6), %v1038_v1  ;;  %p184_p7 = scmp.lt.s32.totalorder (!%p150_p6), %s1215_s23, 20  ;;  %v1043_v6 = vld [vmem:[%s1381_s1 + $0x58] sm:$0xff] (!%p150_p6)   ;;  %v1045_v8 = vld [vmem:[%s1381_s1 + $0x60] sm:$0xff] (!%p150_p6)   ;;  %v1047_v10 = vld [vmem:[%s1381_s1 + $0x68] sm:$0xff] (!%p150_p6)  }
   0xd   : > { %881 = vmatprep.subr.bf16.mxu0 (!%p150_p6), %v1039_v2  ;;  %932 = vmatprep.subr.bf16.mxu1 (!%p150_p6), %v1039_v2  ;;  %v1044_v7 = vld [vmem:[%s1381_s1 + $0x18] sm:$0xff] (!%p150_p6)   ;;  %v1046_v9 = vld [vmem:[%s1381_s1 + $0x20] sm:$0xff] (!%p150_p6)   ;;  %v1048_v13 = vld [vmem:[%s1381_s1 + $0x28] sm:$0xff] (!%p150_p6)  }
   0xe   : > { %v1049_v14 = vld [vmem:[%s1381_s1 + $0x70] sm:$0xff] (!%p150_p6)   ;;  %v1051_v16 = vld [vmem:[%s1381_s1 + $0x78] sm:$0xff] (!%p150_p6)   ;;  %v1284_v31 = vld [vmem:[%s1382_s2] ss:$0 sm:$0xff] (!%p150_p6) }
   0xf   : > { %v1050_v15 = vld [vmem:[%s1381_s1 + $0x30] sm:$0xff] (!%p150_p6)   ;;  %v1052_v17 = vld [vmem:[%s1381_s1 + $0x38] sm:$0xff] (!%p150_p6)  }
  0x10   : > { %882 = vmatpush3.bf16.msra.mxu0 (!%p150_p6), %v1040_v3  ;;  %940 = vmatpush3.bf16.msra.mxu1 (!%p150_p6), %v1040_v3 }
  0x11   : > { %883 = vmatprep.subr.bf16.mxu0 (!%p150_p6), %v1041_v4  ;;  %933 = vmatprep.subr.bf16.mxu1 (!%p150_p6), %v1041_v4 }
  0x12   : > { %s185_s7 = scalar_select %p184_p7, %s1215_s23, 20 }
  0x13   : > { %s560_s22 = ssub.s32 (%p1207_p4), 21, %s1215_s23 }
  0x14   : > { %884 = vmatpush3.bf16.msra.mxu0 %v1042_v5  ;;  %941 = vmatpush3.bf16.msra.mxu1 %v1042_v5  ;;  %s866_s14 = sshll.u32 %s185_s7, 3  ;;  %p561_p8 = scmp.lt.s32.totalorder (%p1207_p4), %s560_s22, 11 }
  0x15   : > { %885 = vmatprep.subr.bf16.mxu0 %v1043_v6  ;;  %934 = vmatprep.subr.bf16.mxu1 %v1043_v6  ;;  %s1246_s24 = scalar_lea.vmem %s1380_s0, %s866_s14  ;;  %s175_s14 = sand.u32 1, %s1120_s12  }
  0x16   : > { %v1055_v11 = vld [vmem:[%s1246_s24 + $0x4] ss:$8 sps:$4 sm:$0xff]   ;;  %v1058_v12 = vld [vmem:[%s1246_s24 + $0x34] ss:$8 sps:$4 sm:$0xff]   ;;  %v1053_v18 = vld [vmem:[%s1246_s24] ss:$8 sps:$4 sm:$0xff]  }
  0x17   : > { %436 = vmatprep.mubr.bf16.mxu0 %v1055_v11  ;;  %460 = vmatprep.mubr.bf16.mxu1 %v1058_v12  ;;  %v1056_v19 = vld [vmem:[%s1246_s24 + $0x30] ss:$8 sps:$4 sm:$0xff]   ;;  %v1059_v20 = vld [vmem:[%s1246_s24 + $0x14] ss:$8 sps:$4 sm:$0xff]   ;;  %v1061_v21 = vld [vmem:[%s1246_s24 + $0x44] ss:$8 sps:$4 sm:$0xff]  }
  0x18   : > { %886 = vmatpush3.bf16.msra.mxu0 %v1044_v7  ;;  %942 = vmatpush3.bf16.msra.mxu1 %v1044_v7  ;;  %v211_v22 = vld [vmem:[%s1246_s24 + $0x50] sm:$0xff]  ;;  %v1064_v24 = vld [vmem:[%s1246_s24 + $0x40] ss:$8 sps:$4 sm:$0xff]   ;;  %v1065_v25 = vld [vmem:[%s1246_s24 + $0x24] ss:$8 sps:$4 sm:$0xff]   ;;  %s947_s21 = smul.u32 44, %s175_s14 }
  0x19   : > { %887 = vmatprep.subr.bf16.mxu0 %v1045_v8  ;;  %935 = vmatprep.subr.bf16.mxu1 %v1045_v8  ;;  %v1063_v23 = vld [vmem:[%s1246_s24 + $0x10] ss:$8 sps:$4 sm:$0xff]   ;;  %v826_v26 = vcombine.high %v211_v22, %v211_v22  ;;  %v1068_v27 = vld [vmem:[%s1246_s24 + $0x20] ss:$8 sps:$4 sm:$0xff]   ;;  %v825_v28 = vcombine.low %v211_v22, %v211_v22  ;;  %s878_s24 = smul.u32 (%p1207_p4), 44, %s1195_s15 }
  0x1a   : > { %s1290_s12 = scalar_lea.vmem [#allocation2], %s947_s21  }
  0x1b   : > { %s1328_s27 = scalar_lea.vmem (%p1207_p4), %s1383_s3, %s878_s24  }
  0x1c   : > { %888 = vmatpush3.bf16.msra.mxu0 %v1046_v9  ;;  %943 = vmatpush3.bf16.msra.mxu1 %v1046_v9 }
  0x1d   : > { %889 = vmatprep.subr.bf16.mxu0 %v1047_v10  ;;  %936 = vmatprep.subr.bf16.mxu1 %v1047_v10 }
  0x20   : > { %890 = vmatpush3.bf16.msra.mxu0 %v1048_v13  ;;  %944 = vmatpush3.bf16.msra.mxu1 %v1048_v13 }
  0x21   : > { %891 = vmatprep.subr.bf16.mxu0 %v1049_v14  ;;  %937 = vmatprep.subr.bf16.mxu1 %v1049_v14 }
  0x24   : > { %892 = vmatpush3.bf16.msra.mxu0 %v1050_v15  ;;  %945 = vmatpush3.bf16.msra.mxu1 %v1050_v15 }
  0x25   : > { %893 = vmatprep.subr.bf16.mxu0 %v1051_v16  ;;  %938 = vmatprep.subr.bf16.mxu1 %v1051_v16 }
  0x28   : > { %894 = vmatpush3.bf16.msra.mxu0 %v1052_v17  ;;  %946 = vmatpush3.bf16.msra.mxu1 %v1052_v17 }
  0x2b   : > { %437 = vmatmul.mubr.bf16.vlgmr.msra.gmra.mrb[0].mxu0 %v1053_v18  ;;  %461 = vmatmul.mubr.bf16.vlgmr.msra.gmra.mrb[0].mxu1 %v1056_v19 }
  0x2c   : > { %444 = vmatprep.mubr.bf16.mxu0 %v1059_v20  ;;  %468 = vmatprep.mubr.bf16.mxu1 %v1061_v21 }
  0x33   : > { %445 = vmatmul.mubr.bf16.gmra.mrb[4].mxu0 %v1063_v23  ;;  %469 = vmatmul.mubr.bf16.gmra.mrb[4].mxu1 %v1064_v24 }
  0x34   : > { %452 = vmatprep.mubr.bf16.mxu0 %v1065_v25  ;;  %476 = vmatprep.mubr.bf16.mxu1 %v826_v26 }
  0x3b   : > { %453 = vmatmul.mubr.bf16.gmra.mrb[8].mxu0 %v1068_v27  ;;  %477 = vmatmul.mubr.bf16.gmra.mrb[8].mxu1 %v825_v28 }
  0xfe   : > { %v895_v29 = vpop.f32.mrb[0].mxu0  ;;  %v913_v30 = vpop.f32.mrb[0].mxu1 }
  0xff   : > { %v896_v32 = vpop.f32.mrb[1].mxu0  ;;  %v914_v33 = vpop.f32.mrb[1].mxu1 }
 0x100   : > { %v897_v34 = vadd.f32 %v896_v32, %v895_v29  ;;  %v915_v35 = vadd.f32 %v914_v33, %v913_v30  ;;  %v898_v36 = vpop.f32.mrb[2].mxu0  ;;  %v916_v37 = vpop.f32.mrb[2].mxu1 }
 0x101   : > { %v899_v38 = vpop.f32.mrb[3].mxu0  ;;  %v917_v39 = vpop.f32.mrb[3].mxu1 }
 0x102   : > { %v439_v40 = vadd.f32 %v897_v34, %v1284_v31  ;;  %v463_v41 = vadd.f32 %v915_v35, %v1284_v31  ;;  %v900_v42 = vadd.f32 %v899_v38, %v898_v36  ;;  %v918_v43 = vadd.f32 %v917_v39, %v916_v37 }
 0x104   : > { %v484_v44 = vmax.f32 %v439_v40, 0.0  ;;  %v490_v45 = vmax.f32 %v463_v41, 0.0  ;;  %v442_v46 = vadd.f32 %v900_v42, %v1284_v31  ;;  %v466_v47 = vadd.f32 %v918_v43, %v1284_v31 }
 0x106   : > { %v867_v48 = vpack.c.bf16 %v484_v44, %v484_v44  ;;  %v873_v49 = vpack.c.bf16 %v490_v45, %v490_v45  ;;  %v485_v50 = vmax.f32 %v442_v46, 0.0  ;;  %v491_v51 = vmax.f32 %v466_v47, 0.0  ;;  %v901_v52 = vpop.f32.mrb[4].mxu0  ;;  %v919_v53 = vpop.f32.mrb[4].mxu1 }
 0x107   : > { %v902_v54 = vpop.f32.mrb[5].mxu0  ;;  %v920_v55 = vpop.f32.mrb[5].mxu1 }
 0x108   : > { %541 = vst.msk [vmem:[%s1290_s12] sm:$0xf] %vm540_vm0, %v867_v48  ;;  %547 = vst.msk [vmem:[%s1290_s12 + $0x18] sm:$0xf] %vm540_vm0, %v873_v49  ;;  %v868_v56 = vpack.c.bf16 %v485_v50, %v485_v50  ;;  %v874_v57 = vpack.c.bf16 %v491_v51, %v491_v51  ;;  %v903_v58 = vadd.f32 %v902_v54, %v901_v52  ;;  %v904_v60 = vpop.f32.mrb[6].mxu0  ;;  %v922_v61 = vpop.f32.mrb[6].mxu1 }
 0x109   : > { %v921_v59 = vadd.f32 %v920_v55, %v919_v53  ;;  %v905_v62 = vpop.f32.mrb[7].mxu0  ;;  %v923_v63 = vpop.f32.mrb[7].mxu1 }
 0x10a   : > { %542 = vst.msk [vmem:[%s1290_s12 + $0x4] sm:$0xf] %vm540_vm0, %v868_v56  ;;  %548 = vst.msk [vmem:[%s1290_s12 + $0x1c] sm:$0xf] %vm540_vm0, %v874_v57  ;;  %v447_v0 = vadd.f32 %v903_v58, %v1284_v31  ;;  %v906_v2 = vadd.f32 %v905_v62, %v904_v60  ;;  %v924_v3 = vadd.f32 %v923_v63, %v922_v61 }
 0x10b   : > { %v471_v1 = vadd.f32 %v921_v59, %v1284_v31 }
 0x10c   : > { %v486_v4 = vmax.f32 %v447_v0, 0.0  ;;  %v450_v6 = vadd.f32 %v906_v2, %v1284_v31  ;;  %v474_v7 = vadd.f32 %v924_v3, %v1284_v31 }
 0x10d   : > { %v492_v5 = vmax.f32 %v471_v1, 0.0 }
 0x10e   : > { %v869_v8 = vpack.c.bf16 %v486_v4, %v486_v4  ;;  %v487_v10 = vmax.f32 %v450_v6, 0.0  ;;  %v493_v11 = vmax.f32 %v474_v7, 0.0  ;;  %v907_v12 = vpop.f32.mrb[8].mxu0  ;;  %v925_v13 = vpop.f32.mrb[8].mxu1 }
 0x10f   : > { %v875_v9 = vpack.c.bf16 %v492_v5, %v492_v5  ;;  %v908_v14 = vpop.f32.mrb[9].mxu0  ;;  %v926_v15 = vpop.f32.mrb[9].mxu1 }
 0x110   : > { %543 = vst.msk [vmem:[%s1290_s12 + $0x8] sm:$0xf] %vm540_vm0, %v869_v8  ;;  %v870_v16 = vpack.c.bf16 %v487_v10, %v487_v10  ;;  %v876_v17 = vpack.c.bf16 %v493_v11, %v493_v11  ;;  %v909_v18 = vadd.f32 %v908_v14, %v907_v12  ;;  %v927_v19 = vadd.f32 %v926_v15, %v925_v13  ;;  %v910_v20 = vpop.f32.mrb[10].mxu0  ;;  %v928_v21 = vpop.f32.mrb[10].mxu1 }
 0x111   : > { %549 = vst.msk [vmem:[%s1290_s12 + $0x20] sm:$0xf] %vm540_vm0, %v875_v9  ;;  %v911_v22 = vpop.f32.mrb[11].mxu0  ;;  %v929_v23 = vpop.f32.mrb[11].mxu1 }
 0x112   : > { %544 = vst.msk [vmem:[%s1290_s12 + $0xc] sm:$0xf] %vm540_vm0, %v870_v16  ;;  %550 = vst.msk [vmem:[%s1290_s12 + $0x24] sm:$0xf] %vm540_vm0, %v876_v17  ;;  %v455_v24 = vadd.f32 %v909_v18, %v1284_v31  ;;  %v479_v25 = vadd.f32 %v927_v19, %v1284_v31  ;;  %v912_v26 = vadd.f32 %v911_v22, %v910_v20 }
 0x114   : > { %v488_v27 = vmax.f32 %v455_v24, 0.0  ;;  %v494_v28 = vmax.f32 %v479_v25, 0.0  ;;  %v458_v29 = vadd.f32 %v912_v26, %v1284_v31  ;;  %558 = sbr.rel (!%p1207_p4) target bundleno = 352 (0x160), region = 36 }
 0x116   : > { %v871_v30 = vpack.c.bf16 %v488_v27, %v488_v27  ;;  %v877_v32 = vpack.c.bf16 %v494_v28, %v494_v28  ;;  %v489_v33 = vmax.f32 %v458_v29, 0.0 }
 0x118   : > { %545 = vst.msk [vmem:[%s1290_s12 + $0x10] sm:$0xf] %vm540_vm0, %v871_v30  ;;  %551 = vst.msk [vmem:[%s1290_s12 + $0x28] sm:$0xf] %vm540_vm0, %v877_v32  ;;  %v872_v34 = vpack.c.bf16 %v489_v33, %v489_v33 }
 0x11a   : > { %546 = vst.msk [vmem:[%s1290_s12 + $0x14] sm:$0xf] %vm540_vm0, %v872_v34 }
 0x11b   : > { %s1392_s22 = smov (!%p561_p8, %s560_s22), 11 }
 0x11c   : > { %s854_s28 = sshll.u32 %s1392_s22, 6 }
 0x11d   : > { %p857_p9 = scmp.eq.s32.totalorder %s854_s28, 0 }
 0x11e   : > { %1070 = sdivrem.u32 (!%p857_p9), %s1392_s22, 11 }
 0x11f   : > { %569 = sbr.rel (%p857_p9) target bundleno = 352 (0x160), region = 40 }
 0x127   : > { %s1334_s20 = spop.drf %1070 }
 0x128   : > { %p858_p10 = scmp.le.s32.totalorder %s1334_s20, 0 }
 0x129   : > { %s1385_s15 = smov (!%p858_p10), %s1328_s27  ;;  %s1386_s23 = smov (!%p858_p10), %s1290_s12 }
 0x12a   : > { %764 = sbr.rel (%p858_p10) target bundleno = 323 (0x143), region = 112  ;;  %s1343_s29 = smov (!%p858_p10), 0  }
 0x12b   : > { %s1345_s30 = smov (!%p858_p10), 0  }
 0x131 LB: >> { %v586_v31 = vld [vmem:[%s1136_s23] sm:$0xf]  ;;  %v588_v35 = vld [vmem:[%s1136_s23 + $0x4] sm:$0xf]  ;;  %v590_v36 = vld [vmem:[%s1136_s23 + $0x8] sm:$0xf]  ;;  %s1144_s30 = sphi %s1345_s30, %s580_s30   ;;  %s1140_s29 = sphi %s1343_s29, %s1387_s29   ;;  %s1136_s23 = sphi %s1386_s23, %s613_s23   ;;  %s1132_s15 = sphi %s1385_s15, %s614_s15  }
 0x132   : >> { %587 = vst [vmem:[%s1132_s15] sm:$0xf] %v586_v31  ;;  %589 = vst [vmem:[%s1132_s15 + $0x4] sm:$0xf] %v588_v35  ;;  %v592_v37 = vld [vmem:[%s1136_s23 + $0xc] sm:$0xf]  ;;  %s608_s4 = sadd.s32 1, %s1140_s29 }
 0x133   : >> { %591 = vst [vmem:[%s1132_s15 + $0x8] sm:$0xf] %v590_v36  ;;  %v594_v38 = vld [vmem:[%s1136_s23 + $0x10] sm:$0xf]  ;;  %v596_v39 = vld [vmem:[%s1136_s23 + $0x14] sm:$0xf]  ;;  %p609_p11 = scmp.ge.s32.totalorder %s608_s4, %s1334_s20 }
 0x134   : >> { %593 = vst [vmem:[%s1132_s15 + $0xc] sm:$0xf] %v592_v37  ;;  %595 = vst [vmem:[%s1132_s15 + $0x10] sm:$0xf] %v594_v38  ;;  %v598_v40 = vld [vmem:[%s1136_s23 + $0x18] sm:$0xf] }
 0x135   : >> { %597 = vst [vmem:[%s1132_s15 + $0x14] sm:$0xf] %v596_v39  ;;  %v600_v41 = vld [vmem:[%s1136_s23 + $0x1c] sm:$0xf]  ;;  %v602_v42 = vld [vmem:[%s1136_s23 + $0x20] sm:$0xf] }
 0x136   : >> { %599 = vst [vmem:[%s1132_s15 + $0x18] sm:$0xf] %v598_v40  ;;  %601 = vst [vmem:[%s1132_s15 + $0x1c] sm:$0xf] %v600_v41  ;;  %v604_v43 = vld [vmem:[%s1136_s23 + $0x24] sm:$0xf] }
 0x137   : >> { %603 = vst [vmem:[%s1132_s15 + $0x20] sm:$0xf] %v602_v42  ;;  %v606_v44 = vld [vmem:[%s1136_s23 + $0x28] sm:$0xf]  ;;  %605 = vst [vmem:[%s1132_s15 + $0x24] sm:$0xf] %v604_v43 }
 0x138   : >> { %607 = vst [vmem:[%s1132_s15 + $0x28] sm:$0xf] %v606_v44  ;;  %s1394_s4 = smov (%p609_p11, %s608_s4), 0  ;;  %s580_s30 = sadd.s32 1, %s1144_s30  }
 0x139   : >> { %s611_s5 = smul.u32 44, %s1394_s4  ;;  %p579_p12 = scmp.ge.s32.totalorder %s580_s30, %s1334_s20 }
 0x13a   : >> { %s1387_s29 = smov %s1394_s4 }
 0x13b   : >> { %s613_s23 = scalar_lea.vmem %s1290_s12, %s611_s5 [#allocation2]   ;;  %s614_s15 = scalar_lea.vmem %s1328_s27, %s611_s5  }
 0x13c   : > { %582 = sbr.rel (!%p579_p12) target bundleno = 305 (0x131), region = 118 }
 0x143 PF: > { %1072 = sdivrem.u32 %s1392_s22, 11 }
 0x144   : > { %s859_s6 = smul.u32 44, %s1334_s20 }
 0x146   : > { %s619_s7 = scalar_lea.vmem %s1290_s12, %s859_s6 [#allocation2]   ;;  %s621_s8 = scalar_lea.vmem %s1328_s27, %s859_s6  }
 0x14c   : > { %s1073_s9 = spop.drf %1072 }
 0x14d   : > { %p861_p13 = scmp.le.s32.totalorder %s1073_s9, 0 }
 0x14e   : > { %s1146_s10 = smov (!%p861_p13), %s621_s8   ;;  %s1150_s11 = smov (!%p861_p13), %s619_s7  }
 0x14f   : > { %778 = sbr.rel (%p861_p13) target bundleno = 352 (0x160), region = 123  ;;  %s1154_s14 = smov (!%p861_p13), 0  }
 0x150   : > { %s1158_s17 = smov (!%p861_p13), 0  }
 0x156 LB: >> { %v631_v45 = vld [vmem:[%s1152_s11] sm:$0xf]  ;;  %s633_s18 = sadd.s32 1, %s1156_s14  ;;  %s625_s17 = sadd.s32 1, %s1160_s17   ;;  %s1160_s17 = sphi %s1158_s17, %s625_s17   ;;  %s1156_s14 = sphi %s1154_s14, %s1155_s14   ;;  %s1152_s11 = sphi %s1150_s11, %s638_s11   ;;  %s1148_s10 = sphi %s1146_s10, %s639_s10  }
 0x157   : >> { %632 = vst [vmem:[%s1148_s10] sm:$0xf] %v631_v45  ;;  %p634_p0 = scmp.ge.s32.totalorder %s633_s18, %s1073_s9  ;;  %p624_p1 = scmp.ge.s32.totalorder %s625_s17, %s1073_s9 }
 0x159   : >> { %s1396_s18 = smov (%p634_p0, %s633_s18), 0  ;;  %627 = sbr.rel (!%p624_p1) target bundleno = 342 (0x156), region = 129 }
 0x15a   : >> { %s862_s21 = sshll.u32 %s1396_s18, 2  ;;  %s1155_s14 = smov %s1396_s18  }
 0x15b   : >> { %s638_s11 = scalar_lea.vmem %s619_s7, %s862_s21 [#allocation2]   ;;  %s639_s10 = scalar_lea.vmem %s621_s8, %s862_s21  }
 0x160 PF: > { %p10_p2 = scmp.ge.s32.totalorder %s1197_s16, 4   ;;  %s1388_s12 = smov %s1124_s13 }
 0x161   : > { %s1389_s13 = smov %s1205_s19  ;;  %s1390_s14 = smov %s1197_s16 }
 0x162   :  { %12 = sbr.rel (!%p10_p2) target bundleno = 2 (0x2), region = 140 }

// kernel: _lambda_.5
= control target key start
LH: loop header
LB: loop body
LE: loop exit
PB: predicated region body
PF: predicated region fallthrough
CT: control target
= control target key end

     0   :  { %v369_v36 = vlaneseq  ;;  %v3981_v37 = vmov 1966171168   ;;  %s5240_s0 = inlined_call_operand.vmem [shape: bf16[2,2592], index: 0, kind: input, shape index: {}]   ;;  %s5241_s1 = inlined_call_operand.vmem [shape: bf16[2,4], index: 1, kind: input, shape index: {}]   ;;  %s5242_s2 = inlined_call_operand.vmem [shape: bf16[2592,200], index: 2, kind: input, shape index: {}]   ;;  %s5243_s3 = inlined_call_operand.vmem [shape: f32[1,200], index: 3, kind: input, shape index: {}]   ;;  %s5244_s4 = inlined_call_operand.vmem [shape: bf16[200,64], index: 4, kind: input, shape index: {}]   ;;  %s5245_s5 = inlined_call_operand.vmem [shape: bf16[4,64], index: 5, kind: input, shape index: {}]   ;;  %s5246_s6 = inlined_call_operand.vmem [shape: f32[1,64], index: 6, kind: input, shape index: {}]   ;;  %s5247_s7 = inlined_call_operand.vmem [shape: bf16[64,64], index: 7, kind: input, shape index: {}]   ;;  %s5248_s8 = inlined_call_operand.vmem [shape: f32[1,64], index: 8, kind: input, shape index: {}]   ;;  %s5249_s9 = inlined_call_operand.vmem [shape: bf16[64,5], index: 9, kind: input, shape index: {}]   ;;  %s5250_s10 = inlined_call_operand.vmem [shape: f32[1,5], index: 10, kind: input, shape index: {}]   ;;  %s5251_s11 = inlined_call_operand.hbm [shape: f32[2,5], index: 11, kind: output, shape index: {}]  }
   0x1   :  { %v3447_v0 = vld [vmem:[%s5242_s2 + $0x4] ss:$8 sps:$4 sm:$0xff]   ;;  %v3451_v2 = vld [vmem:[%s5242_s2] ss:$8 sps:$4 sm:$0xff]   ;;  %v3453_v4 = vld [vmem:[%s5242_s2 + $0x14] ss:$8 sps:$4 sm:$0xff]   ;;  %v384_v38 = vunpack.c.l.s4 %v3981_v37 }
   0x2   :  { %v3449_v1 = vld [vmem:[%s5242_s2 + $0x404] ss:$8 sps:$4 sm:$0xff]   ;;  %2163 = vmatprep.subr.bf16.mxu1 %v3447_v0  ;;  %v3452_v3 = vld [vmem:[%s5242_s2 + $0x400] ss:$8 sps:$4 sm:$0xff]   ;;  %v3455_v5 = vld [vmem:[%s5242_s2 + $0x414] ss:$8 sps:$4 sm:$0xff]  }
   0x3   :  { %2327 = vmatprep.subr.bf16.mxu0 %v3449_v1  ;;  %2164 = vmatpush1.bf16.msra.mxu1 %v3451_v2  ;;  %v3457_v6 = vld [vmem:[%s5242_s2 + $0x10] ss:$8 sps:$4 sm:$0xff]   ;;  %v3459_v8 = vld [vmem:[%s5242_s2 + $0x24] ss:$8 sps:$4 sm:$0xff]   ;;  %v3463_v10 = vld [vmem:[%s5242_s2 + $0x20] ss:$8 sps:$4 sm:$0xff]   ;;  %v385_v43 = vunpack.c.0.s8 %v384_v38 }
   0x4   :  { %2328 = vmatpush1.bf16.msra.mxu0 %v3452_v3  ;;  %2165 = vmatprep.subr.bf16.mxu1 %v3453_v4  ;;  %v3458_v7 = vld [vmem:[%s5242_s2 + $0x410] ss:$8 sps:$4 sm:$0xff]   ;;  %v3461_v9 = vld [vmem:[%s5242_s2 + $0x424] ss:$8 sps:$4 sm:$0xff]   ;;  %v3464_v11 = vld [vmem:[%s5242_s2 + $0x420] ss:$8 sps:$4 sm:$0xff]  }
   0x5   :  { %2329 = vmatprep.subr.bf16.mxu0 %v3455_v5  ;;  %v3465_v12 = vld [vmem:[%s5242_s2 + $0x34] ss:$8 sps:$4 sm:$0xff]   ;;  %v3469_v14 = vld [vmem:[%s5242_s2 + $0x30] ss:$8 sps:$4 sm:$0xff]   ;;  %v3471_v16 = vld [vmem:[%s5242_s2 + $0x44] ss:$8 sps:$4 sm:$0xff]  }
   0x6   :  { %v3467_v13 = vld [vmem:[%s5242_s2 + $0x434] ss:$8 sps:$4 sm:$0xff]   ;;  %v3470_v15 = vld [vmem:[%s5242_s2 + $0x430] ss:$8 sps:$4 sm:$0xff]   ;;  %v3473_v17 = vld [vmem:[%s5242_s2 + $0x444] ss:$8 sps:$4 sm:$0xff]  }
   0x7   :  { %2166 = vmatpush1.bf16.msra.mxu1 %v3457_v6  ;;  %v3475_v18 = vld [vmem:[%s5242_s2 + $0x40] ss:$8 sps:$4 sm:$0xff]   ;;  %v3477_v20 = vld [vmem:[%s5242_s2 + $0x54] ss:$8 sps:$4 sm:$0xff]   ;;  %v3481_v22 = vld [vmem:[%s5242_s2 + $0x50] ss:$8 sps:$4 sm:$0xff]  }
   0x8   :  { %2330 = vmatpush1.bf16.msra.mxu0 %v3458_v7  ;;  %2167 = vmatprep.subr.bf16.mxu1 %v3459_v8  ;;  %v3476_v19 = vld [vmem:[%s5242_s2 + $0x440] ss:$8 sps:$4 sm:$0xff]   ;;  %v3479_v21 = vld [vmem:[%s5242_s2 + $0x454] ss:$8 sps:$4 sm:$0xff]   ;;  %v3482_v23 = vld [vmem:[%s5242_s2 + $0x450] ss:$8 sps:$4 sm:$0xff]  }
   0x9   :  { %2331 = vmatprep.subr.bf16.mxu0 %v3461_v9  ;;  %v3483_v24 = vld [vmem:[%s5242_s2 + $0x64] ss:$8 sps:$4 sm:$0xff]   ;;  %v3487_v26 = vld [vmem:[%s5242_s2 + $0x60] ss:$8 sps:$4 sm:$0xff]   ;;  %v3489_v28 = vld [vmem:[%s5242_s2 + $0x74] ss:$8 sps:$4 sm:$0xff]  }
   0xa   :  { %v3485_v25 = vld [vmem:[%s5242_s2 + $0x464] ss:$8 sps:$4 sm:$0xff]   ;;  %v3488_v27 = vld [vmem:[%s5242_s2 + $0x460] ss:$8 sps:$4 sm:$0xff]   ;;  %v3491_v29 = vld [vmem:[%s5242_s2 + $0x474] ss:$8 sps:$4 sm:$0xff]  }
   0xb   :  { %2168 = vmatpush1.bf16.msra.mxu1 %v3463_v10  ;;  %v3493_v30 = vld [vmem:[%s5242_s2 + $0x70] ss:$8 sps:$4 sm:$0xff]   ;;  %v3495_v32 = vld [vmem:[%s5242_s2 + $0x84] ss:$8 sps:$4 sm:$0xff]   ;;  %v3499_v34 = vld [vmem:[%s5242_s2 + $0x80] ss:$8 sps:$4 sm:$0xff]  }
   0xc   :  { %2332 = vmatpush1.bf16.msra.mxu0 %v3464_v11  ;;  %2169 = vmatprep.subr.bf16.mxu1 %v3465_v12  ;;  %v3494_v31 = vld [vmem:[%s5242_s2 + $0x470] ss:$8 sps:$4 sm:$0xff]   ;;  %v3497_v33 = vld [vmem:[%s5242_s2 + $0x484] ss:$8 sps:$4 sm:$0xff]   ;;  %v3500_v35 = vld [vmem:[%s5242_s2 + $0x480] ss:$8 sps:$4 sm:$0xff]  }
   0xd   :  { %2333 = vmatprep.subr.bf16.mxu0 %v3467_v13  ;;  %v3501_v39 = vld [vmem:[%s5242_s2 + $0x94] ss:$8 sps:$4 sm:$0xff]   ;;  %v3505_v41 = vld [vmem:[%s5242_s2 + $0x90] ss:$8 sps:$4 sm:$0xff]   ;;  %v4163_v42 = vshrl.u32 %v369_v36, 7  ;;  %v4192_v52 = vld [vmem:[%s5240_s0] sm:$0xff] }
   0xe   :  { %v3503_v40 = vld [vmem:[%s5242_s2 + $0x494] ss:$8 sps:$4 sm:$0xff]   ;;  %v3506_v44 = vld [vmem:[%s5242_s2 + $0x490] ss:$8 sps:$4 sm:$0xff]   ;;  %v3507_v45 = vld [vmem:[%s5242_s2 + $0xa4] ss:$8 sps:$4 sm:$0xff]  }
   0xf   :  { %2170 = vmatpush1.bf16.msra.mxu1 %v3469_v14  ;;  %v3509_v46 = vld [vmem:[%s5242_s2 + $0x4a4] ss:$8 sps:$4 sm:$0xff]   ;;  %v3511_v47 = vld [vmem:[%s5242_s2 + $0xa0] ss:$8 sps:$4 sm:$0xff]   ;;  %v4181_v49 = vsub.s32 %v385_v43, %v4163_v42  ;;  %v3513_v50 = vld [vmem:[%s5242_s2 + $0xb4] ss:$8 sps:$4 sm:$0xff]  }
  0x10   :  { %2334 = vmatpush1.bf16.msra.mxu0 %v3470_v15  ;;  %2171 = vmatprep.subr.bf16.mxu1 %v3471_v16  ;;  %v3512_v48 = vld [vmem:[%s5242_s2 + $0x4a0] ss:$8 sps:$4 sm:$0xff]   ;;  %v3515_v51 = vld [vmem:[%s5242_s2 + $0x4b4] ss:$8 sps:$4 sm:$0xff]   ;;  %v3517_v53 = vld [vmem:[%s5242_s2 + $0xb0] ss:$8 sps:$4 sm:$0xff]  }
  0x11   :  { %2335 = vmatprep.subr.bf16.mxu0 %v3473_v17  ;;  %v389_v54 = vrot.slane %v4192_v52, %v4181_v49  ;;  %v3518_v55 = vld [vmem:[%s5242_s2 + $0x4b0] ss:$8 sps:$4 sm:$0xff]   ;;  %v4205_v56 = vld [vmem:[%s5240_s0 + $0x8] sm:$0xff]  ;;  %v3525_v1 = vld [vmem:[%s5242_s2 + $0xd4] ss:$8 sps:$4 sm:$0xff]  }
  0x12   :  { %v3519_v57 = vld [vmem:[%s5242_s2 + $0xc4] ss:$8 sps:$4 sm:$0xff]   ;;  %v438_v60 = vrot.slane %v4205_v56, %v4181_v49  ;;  %v3523_v63 = vld [vmem:[%s5242_s2 + $0xc0] ss:$8 sps:$4 sm:$0xff]   ;;  %v3527_v2 = vld [vmem:[%s5242_s2 + $0x4d4] ss:$8 sps:$4 sm:$0xff]  }
  0x13   :  { %2172 = vmatpush1.bf16.msra.mxu1 %v3475_v18  ;;  %v3521_v58 = vld [vmem:[%s5242_s2 + $0x4c4] ss:$8 sps:$4 sm:$0xff]   ;;  %v397_v59 = vcombine.high %v389_v54, %v389_v54  ;;  %v3524_v0 = vld [vmem:[%s5242_s2 + $0x4c0] ss:$8 sps:$4 sm:$0xff]   ;;  %v3529_v4 = vld [vmem:[%s5242_s2 + $0xd0] ss:$8 sps:$4 sm:$0xff]   ;;  %v4266_v16 = vrot.slane %v389_v54, %v4181_v49 }
  0x14   :  { %2336 = vmatpush1.bf16.msra.mxu0 %v3476_v19  ;;  %2173 = vmatprep.subr.bf16.mxu1 %v3477_v20  ;;  %v446_v62 = vcombine.high %v438_v60, %v438_v60  ;;  %v3530_v5 = vld [vmem:[%s5242_s2 + $0x4d0] ss:$8 sps:$4 sm:$0xff]   ;;  %v3531_v6 = vld [vmem:[%s5242_s2 + $0xe4] ss:$8 sps:$4 sm:$0xff]   ;;  %v3535_v8 = vld [vmem:[%s5242_s2 + $0xe0] ss:$8 sps:$4 sm:$0xff]   ;;  %v4269_v17 = vrot.slane %v438_v60, %v4181_v49 }
  0x15   :  { %2337 = vmatprep.subr.bf16.mxu0 %v3479_v21  ;;  %v419_v61 = vrot.slane %v397_v59, %v4181_v49  ;;  %v3533_v7 = vld [vmem:[%s5242_s2 + $0x4e4] ss:$8 sps:$4 sm:$0xff]   ;;  %v3536_v9 = vld [vmem:[%s5242_s2 + $0x4e0] ss:$8 sps:$4 sm:$0xff]   ;;  %v3537_v10 = vld [vmem:[%s5242_s2 + $0xf4] ss:$8 sps:$4 sm:$0xff]  }
  0x16   :  { %v468_v3 = vrot.slane %v446_v62, %v4181_v49  ;;  %v3539_v11 = vld [vmem:[%s5242_s2 + $0x4f4] ss:$8 sps:$4 sm:$0xff]   ;;  %v3541_v12 = vld [vmem:[%s5242_s2 + $0xf0] ss:$8 sps:$4 sm:$0xff]   ;;  %v3546_v14 = vld [vmem:[%s5242_s2 + $0x104] ss:$8 sps:$4 sm:$0xff]  }
  0x17   :  { %2174 = vmatpush1.bf16.msra.mxu1 %v3481_v22  ;;  %2195 = vmatprep.mubr.bf16.mxu1 %v419_v61  ;;  %v3542_v13 = vld [vmem:[%s5242_s2 + $0x4f0] ss:$8 sps:$4 sm:$0xff]   ;;  %v3550_v15 = vld [vmem:[%s5242_s2 + $0x504] ss:$8 sps:$4 sm:$0xff]   ;;  %v3544_v18 = vld [vmem:[%s5242_s2 + $0x100] ss:$8 sps:$4 sm:$0xff]   ;;  %v429_v22 = vcombine.high %v419_v61, %v419_v61 }
  0x18   :  { %2338 = vmatpush1.bf16.msra.mxu0 %v3482_v23  ;;  %2175 = vmatprep.subr.bf16.mxu1 %v3483_v24  ;;  %v3548_v19 = vld [vmem:[%s5242_s2 + $0x500] ss:$8 sps:$4 sm:$0xff]   ;;  %v3553_v20 = vld [vmem:[%s5242_s2 + $0x114] ss:$8 sps:$4 sm:$0xff]   ;;  %v478_v23 = vcombine.high %v468_v3, %v468_v3  ;;  %v3551_v24 = vld [vmem:[%s5242_s2 + $0x110] ss:$8 sps:$4 sm:$0xff]  }
  0x19   :  { %2339 = vmatprep.subr.bf16.mxu0 %v3485_v25  ;;  %2359 = vmatprep.mubr.bf16.mxu0 %v468_v3  ;;  %v3556_v21 = vld [vmem:[%s5242_s2 + $0x514] ss:$8 sps:$4 sm:$0xff]   ;;  %v3554_v25 = vld [vmem:[%s5242_s2 + $0x510] ss:$8 sps:$4 sm:$0xff]   ;;  %v3569_v36 = vld [vmem:[%s5242_s2 + $0x140] ss:$8 sps:$4 sm:$0xff]  }
  0x1a   :  { %v3572_v37 = vld [vmem:[%s5242_s2 + $0x540] ss:$8 sps:$4 sm:$0xff]   ;;  %v3577_v38 = vld [vmem:[%s5242_s2 + $0x154] ss:$8 sps:$4 sm:$0xff]   ;;  %v3583_v43 = vld [vmem:[%s5242_s2 + $0x164] ss:$8 sps:$4 sm:$0xff]  }
  0x1b   :  { %2176 = vmatpush1.bf16.msra.mxu1 %v3487_v26  ;;  %v3559_v26 = vld [vmem:[%s5242_s2 + $0x124] ss:$8 sps:$4 sm:$0xff]   ;;  %v3604_v59 = vld [vmem:[%s5242_s2 + $0x594] ss:$8 sps:$4 sm:$0xff]   ;;  %v3599_v60 = vld [vmem:[%s5242_s2 + $0x190] ss:$8 sps:$4 sm:$0xff]  }
  0x1c   :  { %2340 = vmatpush1.bf16.msra.mxu0 %v3488_v27  ;;  %2177 = vmatprep.subr.bf16.mxu1 %v3489_v28  ;;  %v3562_v27 = vld [vmem:[%s5242_s2 + $0x524] ss:$8 sps:$4 sm:$0xff]   ;;  %v3557_v28 = vld [vmem:[%s5242_s2 + $0x120] ss:$8 sps:$4 sm:$0xff]   ;;  %v3602_v61 = vld [vmem:[%s5242_s2 + $0x590] ss:$8 sps:$4 sm:$0xff]  }
  0x1d   :  { %2341 = vmatprep.subr.bf16.mxu0 %v3491_v29  ;;  %v3560_v29 = vld [vmem:[%s5242_s2 + $0x520] ss:$8 sps:$4 sm:$0xff]   ;;  %v3598_v54 = vld [vmem:[%s5242_s2 + $0x584] ss:$8 sps:$4 sm:$0xff]   ;;  %v3616_v3 = vld [vmem:[%s5242_s2 + $0x5b4] ss:$8 sps:$4 sm:$0xff]  }
  0x1e   :  { %v3607_v62 = vld [vmem:[%s5242_s2 + $0x1a4] ss:$8 sps:$4 sm:$0xff]  }
  0x1f   :  { %2178 = vmatpush1.bf16.msra.mxu1 %v3493_v30  ;;  %v3565_v30 = vld [vmem:[%s5242_s2 + $0x134] ss:$8 sps:$4 sm:$0xff]  }
  0x20   :  { %2342 = vmatpush1.bf16.msra.mxu0 %v3494_v31  ;;  %2179 = vmatprep.subr.bf16.mxu1 %v3495_v32  ;;  %v3568_v31 = vld [vmem:[%s5242_s2 + $0x534] ss:$8 sps:$4 sm:$0xff]   ;;  %v3563_v32 = vld [vmem:[%s5242_s2 + $0x130] ss:$8 sps:$4 sm:$0xff]  }
  0x21   :  { %2343 = vmatprep.subr.bf16.mxu0 %v3497_v33  ;;  %v3566_v33 = vld [vmem:[%s5242_s2 + $0x530] ss:$8 sps:$4 sm:$0xff]  }
  0x23   :  { %2180 = vmatpush1.bf16.msra.mxu1 %v3499_v34  ;;  %v3571_v34 = vld [vmem:[%s5242_s2 + $0x144] ss:$8 sps:$4 sm:$0xff]  }
  0x24   :  { %2344 = vmatpush1.bf16.msra.mxu0 %v3500_v35  ;;  %2181 = vmatprep.subr.bf16.mxu1 %v3501_v39  ;;  %v3574_v35 = vld [vmem:[%s5242_s2 + $0x544] ss:$8 sps:$4 sm:$0xff]   ;;  %v3580_v39 = vld [vmem:[%s5242_s2 + $0x554] ss:$8 sps:$4 sm:$0xff]  }
  0x25   :  { %2345 = vmatprep.subr.bf16.mxu0 %v3503_v40  ;;  %v3575_v40 = vld [vmem:[%s5242_s2 + $0x150] ss:$8 sps:$4 sm:$0xff]  }
  0x27   :  { %2182 = vmatpush1.bf16.msra.mxu1 %v3505_v41  ;;  %v3578_v41 = vld [vmem:[%s5242_s2 + $0x550] ss:$8 sps:$4 sm:$0xff]  }
  0x28   :  { %2346 = vmatpush1.bf16.msra.mxu0 %v3506_v44  ;;  %2183 = vmatprep.subr.bf16.mxu1 %v3507_v45  ;;  %v3586_v44 = vld [vmem:[%s5242_s2 + $0x564] ss:$8 sps:$4 sm:$0xff]   ;;  %v3581_v45 = vld [vmem:[%s5242_s2 + $0x160] ss:$8 sps:$4 sm:$0xff]  }
  0x29   :  { %2347 = vmatprep.subr.bf16.mxu0 %v3509_v46  ;;  %v3584_v46 = vld [vmem:[%s5242_s2 + $0x560] ss:$8 sps:$4 sm:$0xff]  }
  0x2b   :  { %2184 = vmatpush1.bf16.msra.mxu1 %v3511_v47  ;;  %v3589_v47 = vld [vmem:[%s5242_s2 + $0x174] ss:$8 sps:$4 sm:$0xff]  }
  0x2c   :  { %2348 = vmatpush1.bf16.msra.mxu0 %v3512_v48  ;;  %2185 = vmatprep.subr.bf16.mxu1 %v3513_v50  ;;  %v3592_v48 = vld [vmem:[%s5242_s2 + $0x574] ss:$8 sps:$4 sm:$0xff]   ;;  %v3587_v50 = vld [vmem:[%s5242_s2 + $0x170] ss:$8 sps:$4 sm:$0xff]  }
  0x2d   :  { %2349 = vmatprep.subr.bf16.mxu0 %v3515_v51  ;;  %v3590_v51 = vld [vmem:[%s5242_s2 + $0x570] ss:$8 sps:$4 sm:$0xff]  }
  0x2f   :  { %2186 = vmatpush1.bf16.msra.mxu1 %v3517_v53  ;;  %v3595_v53 = vld [vmem:[%s5242_s2 + $0x184] ss:$8 sps:$4 sm:$0xff]  }
  0x30   :  { %2350 = vmatpush1.bf16.msra.mxu0 %v3518_v55  ;;  %2187 = vmatprep.subr.bf16.mxu1 %v3519_v57  ;;  %v3593_v55 = vld [vmem:[%s5242_s2 + $0x180] ss:$8 sps:$4 sm:$0xff]  }
  0x31   :  { %2351 = vmatprep.subr.bf16.mxu0 %v3521_v58  ;;  %v3596_v57 = vld [vmem:[%s5242_s2 + $0x580] ss:$8 sps:$4 sm:$0xff]   ;;  %v3601_v58 = vld [vmem:[%s5242_s2 + $0x194] ss:$8 sps:$4 sm:$0xff]  }
  0x33   :  { %2188 = vmatpush1.bf16.msra.mxu1 %v3523_v63  ;;  %v3610_v63 = vld [vmem:[%s5242_s2 + $0x5a4] ss:$8 sps:$4 sm:$0xff]  }
  0x34   :  { %2352 = vmatpush1.bf16.msra.mxu0 %v3524_v0  ;;  %2189 = vmatprep.subr.bf16.mxu1 %v3525_v1  ;;  %v3605_v0 = vld [vmem:[%s5242_s2 + $0x1a0] ss:$8 sps:$4 sm:$0xff]  }
  0x35   :  { %2353 = vmatprep.subr.bf16.mxu0 %v3527_v2  ;;  %v3608_v1 = vld [vmem:[%s5242_s2 + $0x5a0] ss:$8 sps:$4 sm:$0xff]   ;;  %v3613_v2 = vld [vmem:[%s5242_s2 + $0x1b4] ss:$8 sps:$4 sm:$0xff]  }
  0x37   :  { %2190 = vmatpush1.bf16.msra.mxu1 %v3529_v4  ;;  %v3611_v4 = vld [vmem:[%s5242_s2 + $0x1b0] ss:$8 sps:$4 sm:$0xff]  }
  0x38   :  { %2354 = vmatpush1.bf16.msra.mxu0 %v3530_v5  ;;  %2191 = vmatprep.subr.bf16.mxu1 %v3531_v6  ;;  %v3614_v5 = vld [vmem:[%s5242_s2 + $0x5b0] ss:$8 sps:$4 sm:$0xff]   ;;  %v3619_v6 = vld [vmem:[%s5242_s2 + $0x1c4] ss:$8 sps:$4 sm:$0xff]  }
  0x39   :  { %2355 = vmatprep.subr.bf16.mxu0 %v3533_v7  ;;  %v3622_v7 = vld [vmem:[%s5242_s2 + $0x5c4] ss:$8 sps:$4 sm:$0xff]  }
  0x3b   :  { %2192 = vmatpush1.bf16.msra.mxu1 %v3535_v8  ;;  %v3617_v8 = vld [vmem:[%s5242_s2 + $0x1c0] ss:$8 sps:$4 sm:$0xff]  }
  0x3c   :  { %2356 = vmatpush1.bf16.msra.mxu0 %v3536_v9  ;;  %2193 = vmatprep.subr.bf16.mxu1 %v3537_v10  ;;  %v3620_v9 = vld [vmem:[%s5242_s2 + $0x5c0] ss:$8 sps:$4 sm:$0xff]   ;;  %v3625_v10 = vld [vmem:[%s5242_s2 + $0x1d4] ss:$8 sps:$4 sm:$0xff]  }
  0x3d   :  { %2357 = vmatprep.subr.bf16.mxu0 %v3539_v11  ;;  %v3628_v11 = vld [vmem:[%s5242_s2 + $0x5d4] ss:$8 sps:$4 sm:$0xff]  }
  0x3f   :  { %2194 = vmatpush1.bf16.msra.mxu1 %v3541_v12  ;;  %v3623_v12 = vld [vmem:[%s5242_s2 + $0x1d0] ss:$8 sps:$4 sm:$0xff]  }
  0x40   :  { %2358 = vmatpush1.bf16.msra.mxu0 %v3542_v13  ;;  %2204 = vmatprep.subr.bf16.mxu1 %v3546_v14  ;;  %v3626_v13 = vld [vmem:[%s5242_s2 + $0x5d0] ss:$8 sps:$4 sm:$0xff]   ;;  %v3631_v14 = vld [vmem:[%s5242_s2 + $0x1e4] ss:$8 sps:$4 sm:$0xff]  }
  0x41   :  { %2368 = vmatprep.subr.bf16.mxu0 %v3550_v15  ;;  %v3634_v15 = vld [vmem:[%s5242_s2 + $0x5e4] ss:$8 sps:$4 sm:$0xff]  }
  0x42   :  { %2196 = vmatmul.mubr.bf16.vlgmr.msra.gmra.mrb[0].mxu1 %v4266_v16 }
  0x43   :  { %2360 = vmatmul.mubr.bf16.vlgmr.msra.gmra.mrb[0].mxu0 %v4269_v17  ;;  %2205 = vmatpush1.bf16.msra.mxu1 %v3544_v18  ;;  %v382_v18 = vcombine.high %v4192_v52, %v4192_v52  ;;  %v3640_v52 = vld [vmem:[%s5242_s2 + $0x5f4] ss:$8 sps:$4 sm:$0xff]  }
  0x44   :  { %2369 = vmatpush1.bf16.msra.mxu0 %v3548_v19  ;;  %2206 = vmatprep.subr.bf16.mxu1 %v3553_v20  ;;  %v431_v19 = vcombine.high %v4205_v56, %v4205_v56  ;;  %v3629_v20 = vld [vmem:[%s5242_s2 + $0x1e0] ss:$8 sps:$4 sm:$0xff]  }
  0x45   :  { %2370 = vmatprep.subr.bf16.mxu0 %v3556_v21  ;;  %2236 = vmatprep.mubr.bf16.mxu1 %v429_v22  ;;  %v3632_v21 = vld [vmem:[%s5242_s2 + $0x5e0] ss:$8 sps:$4 sm:$0xff]   ;;  %v3637_v22 = vld [vmem:[%s5242_s2 + $0x1f4] ss:$8 sps:$4 sm:$0xff]   ;;  %v4458_v56 = vrot.slane %v382_v18, %v4181_v49  ;;  %v3707_v18 = vld [vmem:[%s5242_s2 + $0x2b0] ss:$8 sps:$4 sm:$0xff]  }
  0x46   :  { %2400 = vmatprep.mubr.bf16.mxu0 %v478_v23  ;;  %v4461_v23 = vrot.slane %v431_v19, %v4181_v49  ;;  %v3710_v19 = vld [vmem:[%s5242_s2 + $0x6b0] ss:$8 sps:$4 sm:$0xff]  }
  0x47   :  { %2207 = vmatpush1.bf16.msra.mxu1 %v3551_v24  ;;  %v3635_v24 = vld [vmem:[%s5242_s2 + $0x1f0] ss:$8 sps:$4 sm:$0xff]  }
  0x48   :  { %2371 = vmatpush1.bf16.msra.mxu0 %v3554_v25  ;;  %2208 = vmatprep.subr.bf16.mxu1 %v3559_v26  ;;  %v3638_v25 = vld [vmem:[%s5242_s2 + $0x5f0] ss:$8 sps:$4 sm:$0xff]   ;;  %v3643_v26 = vld [vmem:[%s5242_s2 + $0x204] ss:$8 sps:$4 sm:$0xff]  }
  0x49   :  { %2372 = vmatprep.subr.bf16.mxu0 %v3562_v27  ;;  %v3646_v27 = vld [vmem:[%s5242_s2 + $0x604] ss:$8 sps:$4 sm:$0xff]  }
  0x4b   :  { %2209 = vmatpush1.bf16.msra.mxu1 %v3557_v28  ;;  %v398_v28 = vcombine.high %v4458_v56, %v4458_v56 }
  0x4c   :  { %2373 = vmatpush1.bf16.msra.mxu0 %v3560_v29  ;;  %2210 = vmatprep.subr.bf16.mxu1 %v3565_v30  ;;  %v447_v29 = vcombine.high %v4461_v23, %v4461_v23  ;;  %v427_v30 = vcombine.high %v4266_v16, %v4266_v16  ;;  %v3652_v16 = vld [vmem:[%s5242_s2 + $0x614] ss:$8 sps:$4 sm:$0xff]  }
  0x4d   :  { %2374 = vmatprep.subr.bf16.mxu0 %v3568_v31  ;;  %v476_v31 = vcombine.high %v4269_v17, %v4269_v17  ;;  %v4496_v17 = vrot.slane %v398_v28, %v4181_v49  ;;  %v3727_v28 = vld [vmem:[%s5242_s2 + $0x2e4] ss:$8 sps:$4 sm:$0xff]  }
  0x4f   :  { %2211 = vmatpush1.bf16.msra.mxu1 %v3563_v32  ;;  %v3641_v32 = vld [vmem:[%s5242_s2 + $0x200] ss:$8 sps:$4 sm:$0xff]  }
  0x50   :  { %2375 = vmatpush1.bf16.msra.mxu0 %v3566_v33  ;;  %2212 = vmatprep.subr.bf16.mxu1 %v3571_v34  ;;  %v3644_v33 = vld [vmem:[%s5242_s2 + $0x600] ss:$8 sps:$4 sm:$0xff]   ;;  %v3649_v34 = vld [vmem:[%s5242_s2 + $0x214] ss:$8 sps:$4 sm:$0xff]  }
  0x51   :  { %2376 = vmatprep.subr.bf16.mxu0 %v3574_v35  ;;  %v4499_v35 = vrot.slane %v447_v29, %v4181_v49  ;;  %v3730_v29 = vld [vmem:[%s5242_s2 + $0x6e4] ss:$8 sps:$4 sm:$0xff]  }
  0x53   :  { %2213 = vmatpush1.bf16.msra.mxu1 %v3569_v36  ;;  %v3647_v36 = vld [vmem:[%s5242_s2 + $0x210] ss:$8 sps:$4 sm:$0xff]  }
  0x54   :  { %2377 = vmatpush1.bf16.msra.mxu0 %v3572_v37  ;;  %2214 = vmatprep.subr.bf16.mxu1 %v3577_v38  ;;  %v3650_v37 = vld [vmem:[%s5242_s2 + $0x610] ss:$8 sps:$4 sm:$0xff]   ;;  %v3655_v38 = vld [vmem:[%s5242_s2 + $0x224] ss:$8 sps:$4 sm:$0xff]  }
  0x55   :  { %2378 = vmatprep.subr.bf16.mxu0 %v3580_v39  ;;  %v3658_v39 = vld [vmem:[%s5242_s2 + $0x624] ss:$8 sps:$4 sm:$0xff]  }
  0x57   :  { %2215 = vmatpush1.bf16.msra.mxu1 %v3575_v40  ;;  %v3653_v40 = vld [vmem:[%s5242_s2 + $0x220] ss:$8 sps:$4 sm:$0xff]  }
  0x58   :  { %2379 = vmatpush1.bf16.msra.mxu0 %v3578_v41  ;;  %2216 = vmatprep.subr.bf16.mxu1 %v3583_v43  ;;  %v3656_v41 = vld [vmem:[%s5242_s2 + $0x620] ss:$8 sps:$4 sm:$0xff]   ;;  %v3661_v43 = vld [vmem:[%s5242_s2 + $0x234] ss:$8 sps:$4 sm:$0xff]  }
  0x59   :  { %2380 = vmatprep.subr.bf16.mxu0 %v3586_v44  ;;  %v3664_v44 = vld [vmem:[%s5242_s2 + $0x634] ss:$8 sps:$4 sm:$0xff]  }
  0x5b   :  { %2217 = vmatpush1.bf16.msra.mxu1 %v3581_v45  ;;  %v3659_v45 = vld [vmem:[%s5242_s2 + $0x230] ss:$8 sps:$4 sm:$0xff]  }
  0x5c   :  { %2381 = vmatpush1.bf16.msra.mxu0 %v3584_v46  ;;  %2218 = vmatprep.subr.bf16.mxu1 %v3589_v47  ;;  %v3662_v46 = vld [vmem:[%s5242_s2 + $0x630] ss:$8 sps:$4 sm:$0xff]   ;;  %v3667_v47 = vld [vmem:[%s5242_s2 + $0x244] ss:$8 sps:$4 sm:$0xff]  }
  0x5d   :  { %2382 = vmatprep.subr.bf16.mxu0 %v3592_v48  ;;  %v3670_v48 = vld [vmem:[%s5242_s2 + $0x644] ss:$8 sps:$4 sm:$0xff]  }
  0x5f   :  { %2219 = vmatpush1.bf16.msra.mxu1 %v3587_v50  ;;  %v3665_v50 = vld [vmem:[%s5242_s2 + $0x240] ss:$8 sps:$4 sm:$0xff]  }
  0x60   :  { %2383 = vmatpush1.bf16.msra.mxu0 %v3590_v51  ;;  %2220 = vmatprep.subr.bf16.mxu1 %v3595_v53  ;;  %v3668_v51 = vld [vmem:[%s5242_s2 + $0x640] ss:$8 sps:$4 sm:$0xff]   ;;  %v3673_v53 = vld [vmem:[%s5242_s2 + $0x254] ss:$8 sps:$4 sm:$0xff]  }
  0x61   :  { %2384 = vmatprep.subr.bf16.mxu0 %v3598_v54  ;;  %v3676_v54 = vld [vmem:[%s5242_s2 + $0x654] ss:$8 sps:$4 sm:$0xff]  }
  0x63   :  { %2221 = vmatpush1.bf16.msra.mxu1 %v3593_v55  ;;  %v3671_v55 = vld [vmem:[%s5242_s2 + $0x250] ss:$8 sps:$4 sm:$0xff]  }
  0x64   :  { %2385 = vmatpush1.bf16.msra.mxu0 %v3596_v57  ;;  %2222 = vmatprep.subr.bf16.mxu1 %v3601_v58  ;;  %v3674_v57 = vld [vmem:[%s5242_s2 + $0x650] ss:$8 sps:$4 sm:$0xff]   ;;  %v3679_v58 = vld [vmem:[%s5242_s2 + $0x264] ss:$8 sps:$4 sm:$0xff]  }
  0x65   :  { %2386 = vmatprep.subr.bf16.mxu0 %v3604_v59  ;;  %v3682_v59 = vld [vmem:[%s5242_s2 + $0x664] ss:$8 sps:$4 sm:$0xff]  }
  0x67   :  { %2223 = vmatpush1.bf16.msra.mxu1 %v3599_v60  ;;  %v3677_v60 = vld [vmem:[%s5242_s2 + $0x260] ss:$8 sps:$4 sm:$0xff]  }
  0x68   :  { %2387 = vmatpush1.bf16.msra.mxu0 %v3602_v61  ;;  %2224 = vmatprep.subr.bf16.mxu1 %v3607_v62  ;;  %v3680_v61 = vld [vmem:[%s5242_s2 + $0x660] ss:$8 sps:$4 sm:$0xff]   ;;  %v3685_v62 = vld [vmem:[%s5242_s2 + $0x274] ss:$8 sps:$4 sm:$0xff]  }
  0x69   :  { %2388 = vmatprep.subr.bf16.mxu0 %v3610_v63  ;;  %v3688_v63 = vld [vmem:[%s5242_s2 + $0x674] ss:$8 sps:$4 sm:$0xff]  }
  0x6b   :  { %2225 = vmatpush1.bf16.msra.mxu1 %v3605_v0  ;;  %v3683_v0 = vld [vmem:[%s5242_s2 + $0x270] ss:$8 sps:$4 sm:$0xff]  }
  0x6c   :  { %2389 = vmatpush1.bf16.msra.mxu0 %v3608_v1  ;;  %2226 = vmatprep.subr.bf16.mxu1 %v3613_v2  ;;  %v3686_v1 = vld [vmem:[%s5242_s2 + $0x670] ss:$8 sps:$4 sm:$0xff]   ;;  %v3691_v2 = vld [vmem:[%s5242_s2 + $0x284] ss:$8 sps:$4 sm:$0xff]  }
  0x6d   :  { %2390 = vmatprep.subr.bf16.mxu0 %v3616_v3  ;;  %v3694_v3 = vld [vmem:[%s5242_s2 + $0x684] ss:$8 sps:$4 sm:$0xff]  }
  0x6f   :  { %2227 = vmatpush1.bf16.msra.mxu1 %v3611_v4  ;;  %v3689_v4 = vld [vmem:[%s5242_s2 + $0x280] ss:$8 sps:$4 sm:$0xff]  }
  0x70   :  { %2391 = vmatpush1.bf16.msra.mxu0 %v3614_v5  ;;  %2228 = vmatprep.subr.bf16.mxu1 %v3619_v6  ;;  %v3692_v5 = vld [vmem:[%s5242_s2 + $0x680] ss:$8 sps:$4 sm:$0xff]   ;;  %v3697_v6 = vld [vmem:[%s5242_s2 + $0x294] ss:$8 sps:$4 sm:$0xff]  }
  0x71   :  { %2392 = vmatprep.subr.bf16.mxu0 %v3622_v7  ;;  %v3700_v7 = vld [vmem:[%s5242_s2 + $0x694] ss:$8 sps:$4 sm:$0xff]  }
  0x73   :  { %2229 = vmatpush1.bf16.msra.mxu1 %v3617_v8  ;;  %v3695_v8 = vld [vmem:[%s5242_s2 + $0x290] ss:$8 sps:$4 sm:$0xff]  }
  0x74   :  { %2393 = vmatpush1.bf16.msra.mxu0 %v3620_v9  ;;  %2230 = vmatprep.subr.bf16.mxu1 %v3625_v10  ;;  %v3698_v9 = vld [vmem:[%s5242_s2 + $0x690] ss:$8 sps:$4 sm:$0xff]   ;;  %v3703_v10 = vld [vmem:[%s5242_s2 + $0x2a4] ss:$8 sps:$4 sm:$0xff]  }
  0x75   :  { %2394 = vmatprep.subr.bf16.mxu0 %v3628_v11  ;;  %v3706_v11 = vld [vmem:[%s5242_s2 + $0x6a4] ss:$8 sps:$4 sm:$0xff]  }
  0x77   :  { %2231 = vmatpush1.bf16.msra.mxu1 %v3623_v12  ;;  %v3701_v12 = vld [vmem:[%s5242_s2 + $0x2a0] ss:$8 sps:$4 sm:$0xff]  }
  0x78   :  { %2395 = vmatpush1.bf16.msra.mxu0 %v3626_v13  ;;  %2232 = vmatprep.subr.bf16.mxu1 %v3631_v14  ;;  %v3704_v13 = vld [vmem:[%s5242_s2 + $0x6a0] ss:$8 sps:$4 sm:$0xff]   ;;  %v3709_v14 = vld [vmem:[%s5242_s2 + $0x2b4] ss:$8 sps:$4 sm:$0xff]  }
  0x79   :  { %2396 = vmatprep.subr.bf16.mxu0 %v3634_v15  ;;  %v3712_v15 = vld [vmem:[%s5242_s2 + $0x6b4] ss:$8 sps:$4 sm:$0xff]  }
  0x7b   :  { %2233 = vmatpush1.bf16.msra.mxu1 %v3629_v20  ;;  %v3715_v20 = vld [vmem:[%s5242_s2 + $0x2c4] ss:$8 sps:$4 sm:$0xff]  }
  0x7c   :  { %2397 = vmatpush1.bf16.msra.mxu0 %v3632_v21  ;;  %2234 = vmatprep.subr.bf16.mxu1 %v3637_v22  ;;  %v3718_v21 = vld [vmem:[%s5242_s2 + $0x6c4] ss:$8 sps:$4 sm:$0xff]   ;;  %v3713_v22 = vld [vmem:[%s5242_s2 + $0x2c0] ss:$8 sps:$4 sm:$0xff]  }
  0x7d   :  { %2398 = vmatprep.subr.bf16.mxu0 %v3640_v52  ;;  %v3716_v52 = vld [vmem:[%s5242_s2 + $0x6c0] ss:$8 sps:$4 sm:$0xff]  }
  0x7f   :  { %2235 = vmatpush1.bf16.msra.mxu1 %v3635_v24  ;;  %v3721_v24 = vld [vmem:[%s5242_s2 + $0x2d4] ss:$8 sps:$4 sm:$0xff]  }
  0x80   :  { %2399 = vmatpush1.bf16.msra.mxu0 %v3638_v25  ;;  %2245 = vmatprep.subr.bf16.mxu1 %v3643_v26  ;;  %v3724_v25 = vld [vmem:[%s5242_s2 + $0x6d4] ss:$8 sps:$4 sm:$0xff]   ;;  %v3719_v26 = vld [vmem:[%s5242_s2 + $0x2d0] ss:$8 sps:$4 sm:$0xff]  }
  0x81   :  { %2409 = vmatprep.subr.bf16.mxu0 %v3646_v27  ;;  %v3722_v27 = vld [vmem:[%s5242_s2 + $0x6d0] ss:$8 sps:$4 sm:$0xff]  }
  0x82   :  { %2237 = vmatmul.mubr.bf16.vlgmr.msra.gmra.mrb[0].mxu1 %v427_v30  ;;  %v3725_v30 = vld [vmem:[%s5242_s2 + $0x2e0] ss:$8 sps:$4 sm:$0xff]  }
  0x83   :  { %2401 = vmatmul.mubr.bf16.vlgmr.msra.gmra.mrb[0].mxu0 %v476_v31  ;;  %2246 = vmatpush1.bf16.msra.mxu1 %v3641_v32  ;;  %v3728_v31 = vld [vmem:[%s5242_s2 + $0x6e0] ss:$8 sps:$4 sm:$0xff]   ;;  %v3733_v32 = vld [vmem:[%s5242_s2 + $0x2f4] ss:$8 sps:$4 sm:$0xff]  }
  0x84   :  { %2410 = vmatpush1.bf16.msra.mxu0 %v3644_v33  ;;  %2247 = vmatprep.subr.bf16.mxu1 %v3649_v34  ;;  %v3736_v33 = vld [vmem:[%s5242_s2 + $0x6f4] ss:$8 sps:$4 sm:$0xff]   ;;  %v3731_v34 = vld [vmem:[%s5242_s2 + $0x2f0] ss:$8 sps:$4 sm:$0xff]  }
  0x85   :  { %2411 = vmatprep.subr.bf16.mxu0 %v3652_v16  ;;  %2277 = vmatprep.mubr.bf16.mxu1 %v4496_v17  ;;  %v3734_v16 = vld [vmem:[%s5242_s2 + $0x6f0] ss:$8 sps:$4 sm:$0xff]  }
  0x86   :  { %2441 = vmatprep.mubr.bf16.mxu0 %v4499_v35 }
  0x87   :  { %2248 = vmatpush1.bf16.msra.mxu1 %v3647_v36  ;;  %v3739_v36 = vld [vmem:[%s5242_s2 + $0x304] ss:$8 sps:$4 sm:$0xff]  }
  0x88   :  { %2412 = vmatpush1.bf16.msra.mxu0 %v3650_v37  ;;  %2249 = vmatprep.subr.bf16.mxu1 %v3655_v38  ;;  %v3742_v37 = vld [vmem:[%s5242_s2 + $0x704] ss:$8 sps:$4 sm:$0xff]   ;;  %v4685_v38 = vrot.slane %v4458_v56, %v4181_v49  ;;  %v3748_v56 = vld [vmem:[%s5242_s2 + $0x714] ss:$8 sps:$4 sm:$0xff]  }
  0x89   :  { %2413 = vmatprep.subr.bf16.mxu0 %v3658_v39  ;;  %v4689_v39 = vrot.slane %v4461_v23, %v4181_v49  ;;  %v3743_v23 = vld [vmem:[%s5242_s2 + $0x310] ss:$8 sps:$4 sm:$0xff]  }
  0x8b   :  { %2250 = vmatpush1.bf16.msra.mxu1 %v3653_v40  ;;  %v3737_v40 = vld [vmem:[%s5242_s2 + $0x300] ss:$8 sps:$4 sm:$0xff]  }
  0x8c   :  { %2414 = vmatpush1.bf16.msra.mxu0 %v3656_v41  ;;  %2251 = vmatprep.subr.bf16.mxu1 %v3661_v43  ;;  %v3740_v41 = vld [vmem:[%s5242_s2 + $0x700] ss:$8 sps:$4 sm:$0xff]   ;;  %v3745_v43 = vld [vmem:[%s5242_s2 + $0x314] ss:$8 sps:$4 sm:$0xff]  }
  0x8d   :  { %2415 = vmatprep.subr.bf16.mxu0 %v3664_v44  ;;  %v3746_v44 = vld [vmem:[%s5242_s2 + $0x710] ss:$8 sps:$4 sm:$0xff]  }
  0x8f   :  { %2252 = vmatpush1.bf16.msra.mxu1 %v3659_v45  ;;  %v430_v45 = vcombine.high %v4496_v17, %v4496_v17  ;;  %v3749_v17 = vld [vmem:[%s5242_s2 + $0x320] ss:$8 sps:$4 sm:$0xff]  }
  0x90   :  { %2416 = vmatpush1.bf16.msra.mxu0 %v3662_v46  ;;  %2253 = vmatprep.subr.bf16.mxu1 %v3667_v47  ;;  %v479_v46 = vcombine.high %v4499_v35, %v4499_v35  ;;  %v3751_v47 = vld [vmem:[%s5242_s2 + $0x324] ss:$8 sps:$4 sm:$0xff]   ;;  %v3752_v35 = vld [vmem:[%s5242_s2 + $0x720] ss:$8 sps:$4 sm:$0xff]  }
  0x91   :  { %2417 = vmatprep.subr.bf16.mxu0 %v3670_v48  ;;  %v3754_v48 = vld [vmem:[%s5242_s2 + $0x724] ss:$8 sps:$4 sm:$0xff]  }
  0x93   :  { %2254 = vmatpush1.bf16.msra.mxu1 %v3665_v50  ;;  %v3757_v50 = vld [vmem:[%s5242_s2 + $0x334] ss:$8 sps:$4 sm:$0xff]  }
  0x94   :  { %2418 = vmatpush1.bf16.msra.mxu0 %v3668_v51  ;;  %2255 = vmatprep.subr.bf16.mxu1 %v3673_v53  ;;  %v3760_v51 = vld [vmem:[%s5242_s2 + $0x734] ss:$8 sps:$4 sm:$0xff]   ;;  %v3755_v53 = vld [vmem:[%s5242_s2 + $0x330] ss:$8 sps:$4 sm:$0xff]  }
  0x95   :  { %2419 = vmatprep.subr.bf16.mxu0 %v3676_v54  ;;  %v3758_v54 = vld [vmem:[%s5242_s2 + $0x730] ss:$8 sps:$4 sm:$0xff]  }
  0x97   :  { %2256 = vmatpush1.bf16.msra.mxu1 %v3671_v55  ;;  %v3763_v55 = vld [vmem:[%s5242_s2 + $0x344] ss:$8 sps:$4 sm:$0xff]  }
  0x98   :  { %2420 = vmatpush1.bf16.msra.mxu0 %v3674_v57  ;;  %2257 = vmatprep.subr.bf16.mxu1 %v3679_v58  ;;  %v3766_v57 = vld [vmem:[%s5242_s2 + $0x744] ss:$8 sps:$4 sm:$0xff]   ;;  %v3761_v58 = vld [vmem:[%s5242_s2 + $0x340] ss:$8 sps:$4 sm:$0xff]  }
  0x99   :  { %2421 = vmatprep.subr.bf16.mxu0 %v3682_v59  ;;  %v3764_v59 = vld [vmem:[%s5242_s2 + $0x740] ss:$8 sps:$4 sm:$0xff]  }
  0x9b   :  { %2258 = vmatpush1.bf16.msra.mxu1 %v3677_v60  ;;  %v3769_v60 = vld [vmem:[%s5242_s2 + $0x354] ss:$8 sps:$4 sm:$0xff]  }
  0x9c   :  { %2422 = vmatpush1.bf16.msra.mxu0 %v3680_v61  ;;  %2259 = vmatprep.subr.bf16.mxu1 %v3685_v62  ;;  %v3772_v61 = vld [vmem:[%s5242_s2 + $0x754] ss:$8 sps:$4 sm:$0xff]   ;;  %v3767_v62 = vld [vmem:[%s5242_s2 + $0x350] ss:$8 sps:$4 sm:$0xff]  }
  0x9d   :  { %2423 = vmatprep.subr.bf16.mxu0 %v3688_v63  ;;  %v3770_v63 = vld [vmem:[%s5242_s2 + $0x750] ss:$8 sps:$4 sm:$0xff]  }
  0x9f   :  { %2260 = vmatpush1.bf16.msra.mxu1 %v3683_v0  ;;  %v3775_v0 = vld [vmem:[%s5242_s2 + $0x364] ss:$8 sps:$4 sm:$0xff]  }
  0xa0   :  { %2424 = vmatpush1.bf16.msra.mxu0 %v3686_v1  ;;  %2261 = vmatprep.subr.bf16.mxu1 %v3691_v2  ;;  %v3778_v1 = vld [vmem:[%s5242_s2 + $0x764] ss:$8 sps:$4 sm:$0xff]   ;;  %v3773_v2 = vld [vmem:[%s5242_s2 + $0x360] ss:$8 sps:$4 sm:$0xff]  }
  0xa1   :  { %2425 = vmatprep.subr.bf16.mxu0 %v3694_v3  ;;  %v3776_v3 = vld [vmem:[%s5242_s2 + $0x760] ss:$8 sps:$4 sm:$0xff]  }
  0xa3   :  { %2262 = vmatpush1.bf16.msra.mxu1 %v3689_v4  ;;  %v3781_v4 = vld [vmem:[%s5242_s2 + $0x374] ss:$8 sps:$4 sm:$0xff]  }
  0xa4   :  { %2426 = vmatpush1.bf16.msra.mxu0 %v3692_v5  ;;  %2263 = vmatprep.subr.bf16.mxu1 %v3697_v6  ;;  %v3784_v5 = vld [vmem:[%s5242_s2 + $0x774] ss:$8 sps:$4 sm:$0xff]   ;;  %v3779_v6 = vld [vmem:[%s5242_s2 + $0x370] ss:$8 sps:$4 sm:$0xff]  }
  0xa5   :  { %2427 = vmatprep.subr.bf16.mxu0 %v3700_v7  ;;  %v3782_v7 = vld [vmem:[%s5242_s2 + $0x770] ss:$8 sps:$4 sm:$0xff]  }
  0xa7   :  { %2264 = vmatpush1.bf16.msra.mxu1 %v3695_v8  ;;  %v3787_v8 = vld [vmem:[%s5242_s2 + $0x384] ss:$8 sps:$4 sm:$0xff]  }
  0xa8   :  { %2428 = vmatpush1.bf16.msra.mxu0 %v3698_v9  ;;  %2265 = vmatprep.subr.bf16.mxu1 %v3703_v10  ;;  %v3790_v9 = vld [vmem:[%s5242_s2 + $0x784] ss:$8 sps:$4 sm:$0xff]   ;;  %v3785_v10 = vld [vmem:[%s5242_s2 + $0x380] ss:$8 sps:$4 sm:$0xff]  }
  0xa9   :  { %2429 = vmatprep.subr.bf16.mxu0 %v3706_v11  ;;  %v3788_v11 = vld [vmem:[%s5242_s2 + $0x780] ss:$8 sps:$4 sm:$0xff]  }
  0xab   :  { %2266 = vmatpush1.bf16.msra.mxu1 %v3701_v12 }
  0xac   :  { %2430 = vmatpush1.bf16.msra.mxu0 %v3704_v13  ;;  %2267 = vmatprep.subr.bf16.mxu1 %v3709_v14 }
  0xad   :  { %2431 = vmatprep.subr.bf16.mxu0 %v3712_v15 }
  0xaf   :  { %2268 = vmatpush1.bf16.msra.mxu1 %v3707_v18 }
  0xb0   :  { %2432 = vmatpush1.bf16.msra.mxu0 %v3710_v19  ;;  %2269 = vmatprep.subr.bf16.mxu1 %v3715_v20 }
  0xb1   :  { %2433 = vmatprep.subr.bf16.mxu0 %v3718_v21 }
  0xb3   :  { %2270 = vmatpush1.bf16.msra.mxu1 %v3713_v22 }
  0xb4   :  { %2434 = vmatpush1.bf16.msra.mxu0 %v3716_v52  ;;  %2271 = vmatprep.subr.bf16.mxu1 %v3721_v24 }
  0xb5   :  { %2435 = vmatprep.subr.bf16.mxu0 %v3724_v25 }
  0xb7   :  { %2272 = vmatpush1.bf16.msra.mxu1 %v3719_v26 }
  0xb8   :  { %2436 = vmatpush1.bf16.msra.mxu0 %v3722_v27  ;;  %2273 = vmatprep.subr.bf16.mxu1 %v3727_v28 }
  0xb9   :  { %2437 = vmatprep.subr.bf16.mxu0 %v3730_v29 }
  0xbb   :  { %2274 = vmatpush1.bf16.msra.mxu1 %v3725_v30 }
  0xbc   :  { %2438 = vmatpush1.bf16.msra.mxu0 %v3728_v31  ;;  %2275 = vmatprep.subr.bf16.mxu1 %v3733_v32 }
  0xbd   :  { %2439 = vmatprep.subr.bf16.mxu0 %v3736_v33 }
  0xbf   :  { %2276 = vmatpush1.bf16.msra.mxu1 %v3731_v34 }
  0xc0   :  { %2440 = vmatpush1.bf16.msra.mxu0 %v3734_v16  ;;  %2286 = vmatprep.subr.bf16.mxu1 %v3739_v36 }
  0xc1   :  { %2450 = vmatprep.subr.bf16.mxu0 %v3742_v37 }
  0xc2   :  { %2278 = vmatmul.mubr.bf16.vlgmr.msra.gmra.mrb[0].mxu1 %v4685_v38 }
  0xc3   :  { %2442 = vmatmul.mubr.bf16.vlgmr.msra.gmra.mrb[0].mxu0 %v4689_v39  ;;  %2287 = vmatpush1.bf16.msra.mxu1 %v3737_v40 }
  0xc4   :  { %2451 = vmatpush1.bf16.msra.mxu0 %v3740_v41  ;;  %2288 = vmatprep.subr.bf16.mxu1 %v3745_v43 }
  0xc5   :  { %2452 = vmatprep.subr.bf16.mxu0 %v3748_v56  ;;  %2318 = vmatprep.mubr.bf16.mxu1 %v430_v45 }
  0xc6   :  { %2482 = vmatprep.mubr.bf16.mxu0 %v479_v46 }
  0xc7   :  { %2289 = vmatpush1.bf16.msra.mxu1 %v3743_v23 }
  0xc8   :  { %2453 = vmatpush1.bf16.msra.mxu0 %v3746_v44  ;;  %2290 = vmatprep.subr.bf16.mxu1 %v3751_v47 }
  0xc9   :  { %2454 = vmatprep.subr.bf16.mxu0 %v3754_v48 }
  0xcb   :  { %2291 = vmatpush1.bf16.msra.mxu1 %v3749_v17 }
  0xcc   :  { %2455 = vmatpush1.bf16.msra.mxu0 %v3752_v35  ;;  %2292 = vmatprep.subr.bf16.mxu1 %v3757_v50 }
  0xcd   :  { %2456 = vmatprep.subr.bf16.mxu0 %v3760_v51 }
  0xcf   :  { %2293 = vmatpush1.bf16.msra.mxu1 %v3755_v53 }
  0xd0   :  { %2457 = vmatpush1.bf16.msra.mxu0 %v3758_v54  ;;  %2294 = vmatprep.subr.bf16.mxu1 %v3763_v55 }
  0xd1   :  { %2458 = vmatprep.subr.bf16.mxu0 %v3766_v57 }
  0xd3   :  { %2295 = vmatpush1.bf16.msra.mxu1 %v3761_v58 }
  0xd4   :  { %2459 = vmatpush1.bf16.msra.mxu0 %v3764_v59  ;;  %2296 = vmatprep.subr.bf16.mxu1 %v3769_v60 }
  0xd5   :  { %2460 = vmatprep.subr.bf16.mxu0 %v3772_v61 }
  0xd7   :  { %2297 = vmatpush1.bf16.msra.mxu1 %v3767_v62 }
  0xd8   :  { %2461 = vmatpush1.bf16.msra.mxu0 %v3770_v63  ;;  %2298 = vmatprep.subr.bf16.mxu1 %v3775_v0 }
  0xd9   :  { %2462 = vmatprep.subr.bf16.mxu0 %v3778_v1 }
  0xdb   :  { %2299 = vmatpush1.bf16.msra.mxu1 %v3773_v2 }
  0xdc   :  { %2463 = vmatpush1.bf16.msra.mxu0 %v3776_v3  ;;  %2300 = vmatprep.subr.bf16.mxu1 %v3781_v4 }
  0xdd   :  { %2464 = vmatprep.subr.bf16.mxu0 %v3784_v5 }
  0xdf   :  { %2301 = vmatpush1.bf16.msra.mxu1 %v3779_v6 }
  0xe0   :  { %2465 = vmatpush1.bf16.msra.mxu0 %v3782_v7 }
  0xe1   :  { %16 = vsyncpa [#allocation3], 0  ;;  %2302 = vmatprep.subr.bf16.mxu1 %v3787_v8  ;;  %2466 = vmatprep.subr.bf16.mxu0 %v3790_v9  ;;  %v3793_v12 = vld [vmem:[%s5242_s2 + $0x394] ss:$8 sps:$4 sm:$0xff]   ;;  %v3791_v14 = vld [vmem:[%s5242_s2 + $0x390] ss:$8 sps:$4 sm:$0xff]   ;;  %v428_v48 = vcombine.high %v4685_v38, %v4685_v38  ;;  %v477_v17 = vcombine.high %v4689_v39, %v4689_v39 }
  0xe2   :  { %v3796_v13 = vld [vmem:[%s5242_s2 + $0x794] ss:$8 sps:$4 sm:$0xff]   ;;  %v3794_v15 = vld [vmem:[%s5242_s2 + $0x790] ss:$8 sps:$4 sm:$0xff]   ;;  %v3799_v18 = vld [vmem:[%s5242_s2 + $0x3a4] ss:$8 sps:$4 sm:$0xff]  }
  0xe3   :  { %2303 = vmatpush1.bf16.msra.mxu1 %v3785_v10  ;;  %v3802_v19 = vld [vmem:[%s5242_s2 + $0x7a4] ss:$8 sps:$4 sm:$0xff]   ;;  %v3797_v20 = vld [vmem:[%s5242_s2 + $0x3a0] ss:$8 sps:$4 sm:$0xff]   ;;  %v3805_v22 = vld [vmem:[%s5242_s2 + $0x3b4] ss:$8 sps:$4 sm:$0xff]  }
  0xe4   :  { %2467 = vmatpush1.bf16.msra.mxu0 %v3788_v11  ;;  %2304 = vmatprep.subr.bf16.mxu1 %v3793_v12  ;;  %v3800_v21 = vld [vmem:[%s5242_s2 + $0x7a0] ss:$8 sps:$4 sm:$0xff]   ;;  %v3808_v52 = vld [vmem:[%s5242_s2 + $0x7b4] ss:$8 sps:$4 sm:$0xff]   ;;  %v3803_v24 = vld [vmem:[%s5242_s2 + $0x3b0] ss:$8 sps:$4 sm:$0xff]  }
  0xe5   :  { %2468 = vmatprep.subr.bf16.mxu0 %v3796_v13  ;;  %v3806_v25 = vld [vmem:[%s5242_s2 + $0x7b0] ss:$8 sps:$4 sm:$0xff]   ;;  %v3811_v26 = vld [vmem:[%s5242_s2 + $0x3c4] ss:$8 sps:$4 sm:$0xff]   ;;  %v3809_v28 = vld [vmem:[%s5242_s2 + $0x3c0] ss:$8 sps:$4 sm:$0xff]  }
  0xe6   :  { %v3814_v27 = vld [vmem:[%s5242_s2 + $0x7c4] ss:$8 sps:$4 sm:$0xff]   ;;  %v3812_v29 = vld [vmem:[%s5242_s2 + $0x7c0] ss:$8 sps:$4 sm:$0xff]   ;;  %v3817_v30 = vld [vmem:[%s5242_s2 + $0x3d4] ss:$8 sps:$4 sm:$0xff]  }
  0xe7   :  { %2305 = vmatpush1.bf16.msra.mxu1 %v3791_v14  ;;  %v3820_v31 = vld [vmem:[%s5242_s2 + $0x7d4] ss:$8 sps:$4 sm:$0xff]   ;;  %v3815_v32 = vld [vmem:[%s5242_s2 + $0x3d0] ss:$8 sps:$4 sm:$0xff]   ;;  %v3823_v34 = vld [vmem:[%s5242_s2 + $0x3e4] ss:$8 sps:$4 sm:$0xff]  }
  0xe8   :  { %2469 = vmatpush1.bf16.msra.mxu0 %v3794_v15  ;;  %2306 = vmatprep.subr.bf16.mxu1 %v3799_v18  ;;  %v3818_v33 = vld [vmem:[%s5242_s2 + $0x7d0] ss:$8 sps:$4 sm:$0xff]   ;;  %v3826_v16 = vld [vmem:[%s5242_s2 + $0x7e4] ss:$8 sps:$4 sm:$0xff]   ;;  %v3821_v37 = vld [vmem:[%s5242_s2 + $0x3e0] ss:$8 sps:$4 sm:$0xff]  }
  0xe9   :  { %2470 = vmatprep.subr.bf16.mxu0 %v3802_v19  ;;  %v42_v36 = vld [vmem:[%s5240_s0 + $0x10] sm:$0x1f]  ;;  %v3824_v40 = vld [vmem:[%s5242_s2 + $0x7e0] ss:$8 sps:$4 sm:$0xff]   ;;  %v3835_v46 = vld [vmem:[%s5242_s2 + $0x804] ss:$8 sps:$4 sm:$0xff]  }
  0xea   :  { %v4875_v41 = vrot.slane %v42_v36, %v4181_v49  ;;  %v3829_v43 = vld [vmem:[%s5242_s2 + $0x3f4] ss:$8 sps:$4 sm:$0xff]   ;;  %v3827_v23 = vld [vmem:[%s5242_s2 + $0x3f0] ss:$8 sps:$4 sm:$0xff]   ;;  %v3926_v47 = vld [vmem:[%s5242_s2 + $0xa04] ss:$8 sps:$4 sm:$0xff]   ;;  %v480_v50 = vcombine.high %v42_v36, %v42_v36 }
  0xeb   :  { %2307 = vmatpush1.bf16.msra.mxu1 %v3797_v20  ;;  %v3832_v56 = vld [vmem:[%s5242_s2 + $0x7f4] ss:$8 sps:$4 sm:$0xff]   ;;  %v3830_v44 = vld [vmem:[%s5242_s2 + $0x7f0] ss:$8 sps:$4 sm:$0xff]   ;;  %v3833_v35 = vld [vmem:[%s5242_s2 + $0x800] ss:$8 sps:$4 sm:$0xff]  }
  0xec   :  { %2471 = vmatpush1.bf16.msra.mxu0 %v3800_v21  ;;  %2308 = vmatprep.subr.bf16.mxu1 %v3805_v22  ;;  %v495_v45 = vcombine.high %v4875_v41, %v4875_v41  ;;  %v3838_v53 = vld [vmem:[%s5242_s2 + $0x814] ss:$8 sps:$4 sm:$0xff]   ;;  %v3924_v38 = vld [vmem:[%s5242_s2 + $0xa00] ss:$8 sps:$4 sm:$0xff]   ;;  %v3836_v54 = vld [vmem:[%s5242_s2 + $0x810] ss:$8 sps:$4 sm:$0xff]   ;;  %v494_v55 = vrot.slane %v480_v50, %v4181_v49 }
  0xed   :  { %2472 = vmatprep.subr.bf16.mxu0 %v3808_v52  ;;  %v3932_v39 = vld [vmem:[%s5242_s2 + $0xa14] ss:$8 sps:$4 sm:$0xff]   ;;  %v3841_v57 = vld [vmem:[%s5242_s2 + $0x824] ss:$8 sps:$4 sm:$0xff]   ;;  %v3930_v58 = vld [vmem:[%s5242_s2 + $0xa10] ss:$8 sps:$4 sm:$0xff]  }
  0xee   :  { %v4905_v51 = vrot.slane %v495_v45, %v4181_v49  ;;  %v3982_v59 = vmov 0   ;;  %v3839_v60 = vld [vmem:[%s5242_s2 + $0x820] ss:$8 sps:$4 sm:$0xff]   ;;  %v509_v61 = vrot.slane %v494_v55, %v4181_v49  ;;  %v3844_v62 = vld [vmem:[%s5242_s2 + $0x834] ss:$8 sps:$4 sm:$0xff]   ;;  %vm2159_vm0 = vcmask 261120  }
  0xef   :  { %2309 = vmatpush1.bf16.msra.mxu1 %v3803_v24  ;;  %v3842_v63 = vld [vmem:[%s5242_s2 + $0x830] ss:$8 sps:$4 sm:$0xff]   ;;  %v3847_v0 = vld [vmem:[%s5242_s2 + $0x844] ss:$8 sps:$4 sm:$0xff]   ;;  %v3845_v1 = vld [vmem:[%s5242_s2 + $0x840] ss:$8 sps:$4 sm:$0xff]  }
  0xf0   :  { %2473 = vmatpush1.bf16.msra.mxu0 %v3806_v25  ;;  %2310 = vmatprep.subr.bf16.mxu1 %v3811_v26  ;;  %v3850_v2 = vld [vmem:[%s5242_s2 + $0x854] ss:$8 sps:$4 sm:$0xff]   ;;  %v3848_v3 = vld [vmem:[%s5242_s2 + $0x850] ss:$8 sps:$4 sm:$0xff]   ;;  %v3853_v4 = vld [vmem:[%s5242_s2 + $0x864] ss:$8 sps:$4 sm:$0xff]  }
  0xf1   :  { %2474 = vmatprep.subr.bf16.mxu0 %v3814_v27  ;;  %v3851_v5 = vld [vmem:[%s5242_s2 + $0x860] ss:$8 sps:$4 sm:$0xff]   ;;  %v3856_v6 = vld [vmem:[%s5242_s2 + $0x874] ss:$8 sps:$4 sm:$0xff]   ;;  %v3854_v7 = vld [vmem:[%s5242_s2 + $0x870] ss:$8 sps:$4 sm:$0xff]   ;;  %v5015_v27 = vrot.slane %v4875_v41, %v4181_v49 }
  0xf2   :  { %v3859_v8 = vld [vmem:[%s5242_s2 + $0x884] ss:$8 sps:$4 sm:$0xff]   ;;  %v3857_v9 = vld [vmem:[%s5242_s2 + $0x880] ss:$8 sps:$4 sm:$0xff]   ;;  %v3862_v10 = vld [vmem:[%s5242_s2 + $0x894] ss:$8 sps:$4 sm:$0xff]  }
  0xf3   :  { %2311 = vmatpush1.bf16.msra.mxu1 %v3809_v28  ;;  %v3860_v11 = vld [vmem:[%s5242_s2 + $0x890] ss:$8 sps:$4 sm:$0xff]   ;;  %v3865_v12 = vld [vmem:[%s5242_s2 + $0x8a4] ss:$8 sps:$4 sm:$0xff]   ;;  %v3863_v13 = vld [vmem:[%s5242_s2 + $0x8a0] ss:$8 sps:$4 sm:$0xff]  }
  0xf4   :  { %2475 = vmatpush1.bf16.msra.mxu0 %v3812_v29  ;;  %2312 = vmatprep.subr.bf16.mxu1 %v3817_v30  ;;  %v3868_v14 = vld [vmem:[%s5242_s2 + $0x8b4] ss:$8 sps:$4 sm:$0xff]   ;;  %v3866_v15 = vld [vmem:[%s5242_s2 + $0x8b0] ss:$8 sps:$4 sm:$0xff]   ;;  %v3871_v18 = vld [vmem:[%s5242_s2 + $0x8c4] ss:$8 sps:$4 sm:$0xff]   ;;  %v518_v29 = vcombine.high %v4905_v51, %v4905_v51 }
  0xf5   :  { %2476 = vmatprep.subr.bf16.mxu0 %v3820_v31  ;;  %v3869_v19 = vld [vmem:[%s5242_s2 + $0x8c0] ss:$8 sps:$4 sm:$0xff]   ;;  %v3874_v20 = vld [vmem:[%s5242_s2 + $0x8d4] ss:$8 sps:$4 sm:$0xff]   ;;  %v3872_v21 = vld [vmem:[%s5242_s2 + $0x8d0] ss:$8 sps:$4 sm:$0xff]  }
  0xf6   :  { %v3877_v22 = vld [vmem:[%s5242_s2 + $0x8e4] ss:$8 sps:$4 sm:$0xff]   ;;  %v3875_v52 = vld [vmem:[%s5242_s2 + $0x8e0] ss:$8 sps:$4 sm:$0xff]   ;;  %v3880_v24 = vld [vmem:[%s5242_s2 + $0x8f4] ss:$8 sps:$4 sm:$0xff]  }
  0xf7   :  { %2313 = vmatpush1.bf16.msra.mxu1 %v3815_v32  ;;  %v3878_v25 = vld [vmem:[%s5242_s2 + $0x8f0] ss:$8 sps:$4 sm:$0xff]   ;;  %v3884_v26 = vld [vmem:[%s5242_s2 + $0x904] ss:$8 sps:$4 sm:$0xff]   ;;  %v3882_v28 = vld [vmem:[%s5242_s2 + $0x900] ss:$8 sps:$4 sm:$0xff]  }
  0xf8   :  { %2477 = vmatpush1.bf16.msra.mxu0 %v3818_v33  ;;  %2314 = vmatprep.subr.bf16.mxu1 %v3823_v34  ;;  %v3887_v30 = vld [vmem:[%s5242_s2 + $0x914] ss:$8 sps:$4 sm:$0xff]   ;;  %v3885_v49 = vld [vmem:[%s5242_s2 + $0x910] ss:$8 sps:$4 sm:$0xff]   ;;  %v3890_v31 = vld [vmem:[%s5242_s2 + $0x924] ss:$8 sps:$4 sm:$0xff]  }
  0xf9   :  { %2478 = vmatprep.subr.bf16.mxu0 %v3826_v16  ;;  %v3888_v32 = vld [vmem:[%s5242_s2 + $0x920] ss:$8 sps:$4 sm:$0xff]   ;;  %v3893_v33 = vld [vmem:[%s5242_s2 + $0x934] ss:$8 sps:$4 sm:$0xff]   ;;  %v3891_v34 = vld [vmem:[%s5242_s2 + $0x930] ss:$8 sps:$4 sm:$0xff]  }
  0xfa   :  { %v3896_v16 = vld [vmem:[%s5242_s2 + $0x944] ss:$8 sps:$4 sm:$0xff]   ;;  %v3894_v36 = vld [vmem:[%s5242_s2 + $0x940] ss:$8 sps:$4 sm:$0xff]   ;;  %vm2649_vm1 = vcmask 1041408   ;;  %vm3984_vm2 = vmmov 0  }
  0xfb   :  { %2315 = vmatpush1.bf16.msra.mxu1 %v3821_v37  ;;  %v3899_v37 = vld [vmem:[%s5242_s2 + $0x954] ss:$8 sps:$4 sm:$0xff]   ;;  %v3902_v41 = vld [vmem:[%s5242_s2 + $0x964] ss:$8 sps:$4 sm:$0xff]   ;;  %vm2645_vm3 = vcmask 31744   ;;  %vm2772_vm4 = vcmask 1043456  }
  0xfc   :  { %2479 = vmatpush1.bf16.msra.mxu0 %v3824_v40  ;;  %2316 = vmatprep.subr.bf16.mxu1 %v3829_v43  ;;  %v3897_v40 = vld [vmem:[%s5242_s2 + $0x950] ss:$8 sps:$4 sm:$0xff]   ;;  %v3900_v43 = vld [vmem:[%s5242_s2 + $0x960] ss:$8 sps:$4 sm:$0xff]   ;;  %vm2768_vm5 = vcmask 588800   ;;  %vm2865_vm6 = vcmask 523264  }
  0xfd   :  { %2480 = vmatprep.subr.bf16.mxu0 %v3832_v56  ;;  %v3905_v56 = vld [vmem:[%s5242_s2 + $0x974] ss:$8 sps:$4 sm:$0xff]   ;;  %v3906_v50 = vld [vmem:[%s5242_s2 + $0x980] ss:$8 sps:$4 sm:$0xff]   ;;  %s3985_s17 = smov [#allocation2]   ;;  %vm2993_vm7 = vcmask 33792  }
  0xfe   :  { %v3912_v55 = vld [vmem:[%s5242_s2 + $0x9a0] ss:$8 sps:$4 sm:$0xff]  }
  0xff   :  { %2317 = vmatpush1.bf16.msra.mxu1 %v3827_v23  ;;  %v2644_v23 = vld [vmem:[%s5245_s5] sm:$0x3] }
 0x100   :  { %2481 = vmatpush1.bf16.msra.mxu0 %v3830_v44  ;;  %2573 = vmatprep.subr.bf16.mxu1 %v3926_v47  ;;  %v3983_v44 = vmov 0.0   ;;  %v2651_v45 = vsel %vm2649_vm1, %v2644_v23, 0  ;;  %v3936_v47 = vld [vmem:[%s5244_s4] sm:$0xff]  }
 0x101   :  { %2491 = vmatprep.subr.bf16.mxu0 %v3835_v46  ;;  %v2643_v46 = vld [vmem:[%s5241_s1] sm:$0x1] }
 0x102   :  { %2319 = vmatmul.mubr.bf16.vlgmr.msra.gmra.mrb[0].mxu1 %v428_v48  ;;  %v3903_v48 = vld [vmem:[%s5242_s2 + $0x970] ss:$8 sps:$4 sm:$0xff]  }
 0x103   :  { %2483 = vmatmul.mubr.bf16.vlgmr.msra.gmra.mrb[0].mxu0 %v477_v17  ;;  %2574 = vmatpush1.bf16.msra.mxu1 %v3924_v38  ;;  %v3908_v17 = vld [vmem:[%s5242_s2 + $0x984] ss:$8 sps:$4 sm:$0xff]   ;;  %v3909_v38 = vld [vmem:[%s5242_s2 + $0x990] ss:$8 sps:$4 sm:$0xff]  }
 0x104   :  { %2492 = vmatpush1.bf16.msra.mxu0 %v3833_v35  ;;  %2523 = vmatprep.mubr.bf16.mxu0 %v4905_v51  ;;  %v3937_v35 = vld [vmem:[%s5244_s4 + $0x8] sm:$0xff]   ;;  %v3911_v51 = vld [vmem:[%s5242_s2 + $0x994] ss:$8 sps:$4 sm:$0xff]  }
 0x105   :  { %2493 = vmatprep.subr.bf16.mxu0 %v3838_v53  ;;  %2575 = vmatprep.subr.bf16.mxu1 %v3932_v39  ;;  %v3938_v53 = vld [vmem:[%s5244_s4 + $0x10] sm:$0xff]   ;;  %v3914_v39 = vld [vmem:[%s5242_s2 + $0x9a4] ss:$8 sps:$4 sm:$0xff]  }
 0x106   :  { %2605 = vmatprep.mubr.bf16.mxu1 %v3982_v59 }
 0x107   :  { %2576 = vmatpush1.bf16.msra.mxu1 %v3930_v58  ;;  %v3940_v58 = vld [vmem:[%s5244_s4 + $0x20] sm:$0xff]  }
 0x108   :  { %2494 = vmatpush1.bf16.msra.mxu0 %v3836_v54  ;;  %3374 = vmatprep.subr.bf16.mxu1 %v3983_v44  ;;  %v3939_v54 = vld [vmem:[%s5244_s4 + $0x18] sm:$0xff]  }
 0x109   :  { %2495 = vmatprep.subr.bf16.mxu0 %v3841_v57  ;;  %v3917_v57 = vld [vmem:[%s5242_s2 + $0x9b4] ss:$8 sps:$4 sm:$0xff]  }
 0x10a   :  { %3333 = vmatmul.mubr.msk.bf16.vlgmr.msra.gmra.mrb[4].mxu1 %vm2159_vm0, %v509_v61  ;;  %v3920_v61 = vld [vmem:[%s5242_s2 + $0x9c4] ss:$8 sps:$4 sm:$0xff]  }
 0x10b   :  { %3376 = vmatprep.mubr.msk.bf16.mxu1 %vm3984_vm2, %v3983_v44  ;;  %3375 = vmatpush3.bf16.msra.mxu1 %v2651_v45 }
 0x10c   :  { %2496 = vmatpush1.bf16.msra.mxu0 %v3839_v60  ;;  %2776 = vmatprep.subr.bf16.mxu1 %v3982_v59  ;;  %v3915_v60 = vld [vmem:[%s5242_s2 + $0x9b0] ss:$8 sps:$4 sm:$0xff]  }
 0x10d   :  { %2497 = vmatprep.subr.bf16.mxu0 %v3844_v62  ;;  %v3941_v62 = vld [vmem:[%s5244_s4 + $0x28] sm:$0xff]  }
 0x110   :  { %2498 = vmatpush1.bf16.msra.mxu0 %v3842_v63  ;;  %v3918_v63 = vld [vmem:[%s5242_s2 + $0x9c0] ss:$8 sps:$4 sm:$0xff]  }
 0x111   :  { %2499 = vmatprep.subr.bf16.mxu0 %v3847_v0  ;;  %v3923_v0 = vld [vmem:[%s5242_s2 + $0x9d4] ss:$8 sps:$4 sm:$0xff]  }
 0x112   :  { %3377 = vmatmul.mubr.msk.bf16.vlgmr.msra.gmra.mrb[8].mxu1 %vm2645_vm3, %v2643_v46 }
 0x113   :  { %2777 = vmatpush1.bf16.msra.mxu1 %v3936_v47 }
 0x114   :  { %2500 = vmatpush1.bf16.msra.mxu0 %v3845_v1  ;;  %2778 = vmatprep.subr.bf16.mxu1 %v3982_v59  ;;  %v3942_v1 = vld [vmem:[%s5244_s4 + $0x30] sm:$0xff]  }
 0x115   :  { %2501 = vmatprep.subr.bf16.mxu0 %v3850_v2  ;;  %v3921_v2 = vld [vmem:[%s5242_s2 + $0x9d0] ss:$8 sps:$4 sm:$0xff]  }
 0x117   :  { %2779 = vmatpush1.bf16.msra.mxu1 %v3937_v35  ;;  %v3952_v35 = vld [vmem:[%s5247_s7 + $0x18] sm:$0xff]  }
 0x118   :  { %2502 = vmatpush1.bf16.msra.mxu0 %v3848_v3  ;;  %2780 = vmatprep.subr.bf16.mxu1 %v3982_v59  ;;  %v3929_v3 = vld [vmem:[%s5242_s2 + $0x9e4] ss:$8 sps:$4 sm:$0xff]  }
 0x119   :  { %2503 = vmatprep.subr.bf16.mxu0 %v3853_v4  ;;  %v3943_v4 = vld [vmem:[%s5244_s4 + $0x38] sm:$0xff]  }
 0x11b   :  { %2781 = vmatpush1.bf16.msra.mxu1 %v3938_v53 }
 0x11c   :  { %2504 = vmatpush1.bf16.msra.mxu0 %v3851_v5  ;;  %2782 = vmatprep.subr.bf16.mxu1 %v3982_v59  ;;  %v3927_v5 = vld [vmem:[%s5242_s2 + $0x9e0] ss:$8 sps:$4 sm:$0xff]  }
 0x11d   :  { %2505 = vmatprep.subr.bf16.mxu0 %v3856_v6  ;;  %v3935_v6 = vld [vmem:[%s5242_s2 + $0x9f4] ss:$8 sps:$4 sm:$0xff]  }
 0x11f   :  { %2783 = vmatpush1.bf16.msra.mxu1 %v3939_v54 }
 0x120   :  { %2506 = vmatpush1.bf16.msra.mxu0 %v3854_v7  ;;  %2784 = vmatprep.subr.bf16.mxu1 %v3982_v59  ;;  %v3944_v7 = vld [vmem:[%s5244_s4 + $0x40] sm:$0xff]  }
 0x121   :  { %2507 = vmatprep.subr.bf16.mxu0 %v3859_v8  ;;  %v3933_v8 = vld [vmem:[%s5242_s2 + $0x9f0] ss:$8 sps:$4 sm:$0xff]  }
 0x123   :  { %2785 = vmatpush1.bf16.msra.mxu1 %v3940_v58  ;;  %v3953_v58 = vld [vmem:[%s5249_s9] sm:$0xff]  }
 0x124   :  { %2508 = vmatpush1.bf16.msra.mxu0 %v3857_v9  ;;  %2786 = vmatprep.subr.bf16.mxu1 %v3982_v59  ;;  %v517_v9 = vcombine.high %v5015_v27, %v5015_v27 }
 0x125   :  { %2509 = vmatprep.subr.bf16.mxu0 %v3862_v10  ;;  %v3945_v10 = vld [vmem:[%s5244_s4 + $0x48] sm:$0xff]  }
 0x127   :  { %2787 = vmatpush1.bf16.msra.mxu1 %v3941_v62  ;;  %v3955_v62 = vld [vmem:[%s5249_s9 + $0x10] sm:$0xff]  }
 0x128   :  { %2510 = vmatpush1.bf16.msra.mxu0 %v3860_v11  ;;  %2788 = vmatprep.subr.bf16.mxu1 %v3982_v59  ;;  %v3946_v11 = vld [vmem:[%s5244_s4 + $0x50] sm:$0xff]  }
 0x129   :  { %2511 = vmatprep.subr.bf16.mxu0 %v3865_v12 }
 0x12b   :  { %2789 = vmatpush1.bf16.msra.mxu1 %v3942_v1 }
 0x12c   :  { %2512 = vmatpush1.bf16.msra.mxu0 %v3863_v13  ;;  %2790 = vmatprep.subr.bf16.mxu1 %v3982_v59 }
 0x12d   :  { %2513 = vmatprep.subr.bf16.mxu0 %v3868_v14 }
 0x12f   :  { %2791 = vmatpush1.bf16.msra.mxu1 %v3943_v4 }
 0x130   :  { %2514 = vmatpush1.bf16.msra.mxu0 %v3866_v15  ;;  %2792 = vmatprep.subr.bf16.mxu1 %v3982_v59  ;;  %v3947_v15 = vld [vmem:[%s5244_s4 + $0x58] sm:$0xff]  }
 0x131   :  { %2515 = vmatprep.subr.bf16.mxu0 %v3871_v18 }
 0x133   :  { %2793 = vmatpush1.bf16.msra.mxu1 %v3944_v7 }
 0x134   :  { %2516 = vmatpush1.bf16.msra.mxu0 %v3869_v19  ;;  %2794 = vmatprep.subr.bf16.mxu1 %v3982_v59  ;;  %v3948_v19 = vld [vmem:[%s5244_s4 + $0x60] ss:$0 sps:$4 sm:$0xff]  }
 0x135   :  { %2517 = vmatprep.subr.bf16.mxu0 %v3874_v20  ;;  %v2774_v20 = vsel %vm2772_vm4, %v3948_v19, 0 }
 0x137   :  { %2795 = vmatpush1.bf16.msra.mxu1 %v3945_v10 }
 0x138   :  { %2518 = vmatpush1.bf16.msra.mxu0 %v3872_v21  ;;  %2796 = vmatprep.subr.bf16.mxu1 %v3982_v59 }
 0x139   :  { %2519 = vmatprep.subr.bf16.mxu0 %v3877_v22 }
 0x13b   :  { %2797 = vmatpush1.bf16.msra.mxu1 %v3946_v11 }
 0x13c   :  { %2520 = vmatpush1.bf16.msra.mxu0 %v3875_v52  ;;  %2798 = vmatprep.subr.bf16.mxu1 %v3982_v59 }
 0x13d   :  { %2521 = vmatprep.subr.bf16.mxu0 %v3880_v24 }
 0x13f   :  { %2799 = vmatpush1.bf16.msra.mxu1 %v3947_v15 }
 0x140   :  { %2522 = vmatpush1.bf16.msra.mxu0 %v3878_v25  ;;  %2800 = vmatprep.subr.bf16.mxu1 %v3982_v59  ;;  %v367_v59 = vld [vmem:[%s5243_s3] sm:$0x3] }
 0x141   :  { %2532 = vmatprep.subr.bf16.mxu0 %v3884_v26 }
 0x143   :  { %2524 = vmatmul.mubr.bf16.vlgmr.msra.gmra.mrb[0].mxu0 %v5015_v27  ;;  %2801 = vmatpush1.bf16.msra.mxu1 %v2774_v20 }
 0x144   :  { %2533 = vmatpush1.bf16.msra.mxu0 %v3882_v28  ;;  %2564 = vmatprep.mubr.bf16.mxu0 %v518_v29  ;;  %v371_v29 = vsub.s32 0, %v4163_v42 }
 0x145   :  { %2534 = vmatprep.subr.bf16.mxu0 %v3887_v30  ;;  %3380 = vmatprep.subr.bf16.mxu1 %v3983_v44  ;;  %v375_v30 = vsub.s32 1, %v4163_v42  ;;  %v3949_v42 = vld [vmem:[%s5247_s7] sm:$0xff]  }
 0x148   :  { %2535 = vmatpush1.bf16.msra.mxu0 %v3885_v49  ;;  %v372_v49 = vrot.slane %v367_v59, %v371_v29 }
 0x149   :  { %2536 = vmatprep.subr.bf16.mxu0 %v3890_v31  ;;  %v376_v31 = vrot.slane %v367_v59, %v375_v30 }
 0x14c   :  { %2537 = vmatpush1.bf16.msra.mxu0 %v3888_v32 }
 0x14d   :  { %2538 = vmatprep.subr.bf16.mxu0 %v3893_v33 }
 0x150   :  { %2539 = vmatpush1.bf16.msra.mxu0 %v3891_v34 }
 0x151   :  { %2540 = vmatprep.subr.bf16.mxu0 %v3896_v16 }
 0x154   :  { %2541 = vmatpush1.bf16.msra.mxu0 %v3894_v36 }
 0x155   :  { %2542 = vmatprep.subr.bf16.mxu0 %v3899_v37 }
 0x158   :  { %2543 = vmatpush1.bf16.msra.mxu0 %v3897_v40 }
 0x159   :  { %2544 = vmatprep.subr.bf16.mxu0 %v3902_v41 }
 0x15c   :  { %2545 = vmatpush1.bf16.msra.mxu0 %v3900_v43 }
 0x15d   :  { %2546 = vmatprep.subr.bf16.mxu0 %v3905_v56 }
 0x160   :  { %2547 = vmatpush1.bf16.msra.mxu0 %v3903_v48  ;;  %v3950_v48 = vld [vmem:[%s5247_s7 + $0x8] sm:$0xff]  }
 0x161   :  { %2548 = vmatprep.subr.bf16.mxu0 %v3908_v17  ;;  %v3951_v17 = vld [vmem:[%s5247_s7 + $0x10] sm:$0xff]  }
 0x164   :  { %2549 = vmatpush1.bf16.msra.mxu0 %v3906_v50 }
 0x165   :  { %2550 = vmatprep.subr.bf16.mxu0 %v3911_v51  ;;  %v3349_v51 = vld [vmem:[%s5246_s6] ss:$0 sm:$0xff] }
 0x168   :  { %2551 = vmatpush1.bf16.msra.mxu0 %v3909_v38 }
 0x169   :  { %2552 = vmatprep.subr.bf16.mxu0 %v3914_v39 }
 0x16c   :  { %2553 = vmatpush1.bf16.msra.mxu0 %v3912_v55 }
 0x16d   :  { %2554 = vmatprep.subr.bf16.mxu0 %v3917_v57 }
 0x170   :  { %2555 = vmatpush1.bf16.msra.mxu0 %v3915_v60 }
 0x171   :  { %2556 = vmatprep.subr.bf16.mxu0 %v3920_v61  ;;  %v3954_v61 = vld [vmem:[%s5249_s9 + $0x8] sm:$0xff]  }
 0x174   :  { %2557 = vmatpush1.bf16.msra.mxu0 %v3918_v63  ;;  %v3956_v63 = vld [vmem:[%s5249_s9 + $0x18] sm:$0xff]   ;;  %s3001_s9 = sshll.u32 %s3985_s17, 4  ;;  %s3002_s9 = int_to_ptr.vmem [resolvable:$true] %s3001_s9 }
 0x175   :  { %2558 = vmatprep.subr.bf16.mxu0 %v3923_v0  ;;  %v3350_v0 = vld [vmem:[%s5248_s8] ss:$0 sm:$0xff]  ;;  %s3957_s8 = scalar_lea.vmem %s3002_s9, 32  ;;  %p3962_p1 = scmp.lt.s32.totalorder %s3002_s9, %s3002_s9 }
 0x176   :  { %p3958_p0 = scmp.ne.s32.totalorder %s3002_s9, %s3957_s8  ;;  %p3963_p2 = scmp.lt.s32.totalorder %s3957_s8, %s3957_s8 }
 0x178   :  { %2559 = vmatpush1.bf16.msra.mxu0 %v3921_v2  ;;  %p3964_p3 = por %p3963_p2, %p3962_p1 }
 0x179   :  { %2560 = vmatprep.subr.bf16.mxu0 %v3929_v3 }
 0x17a   :  { %p3965_p4 = pnand %p3964_p3, %p3958_p0 }
 0x17c   :  { %2561 = vmatpush1.bf16.msra.mxu0 %v3927_v5 }
 0x17d   :  { %2562 = vmatprep.subr.bf16.mxu0 %v3935_v6 }
 0x180   :  { %2563 = vmatpush1.bf16.msra.mxu0 %v3933_v8 }
 0x183   :  { %2565 = vmatmul.mubr.bf16.vlgmr.msra.gmra.mrb[0].mxu0 %v517_v9 }
 0x1d5   :  { %v2320_v12 = vpop.f32.mrb[0].mxu1 }
 0x1d6   :  { %v2322_v13 = vpop.f32.mrb[1].mxu1  ;;  %v3404_v32 = vadd.f32 %v2320_v12, %v372_v49 }
 0x1d7   :  { %v2324_v14 = vpop.f32.mrb[2].mxu1  ;;  %v3407_v33 = vadd.f32 %v2322_v13, %v376_v31 }
 0x1d8   :  { %v2325_v18 = vpop.f32.mrb[3].mxu1 }
 0x1dd   :  { %v2607_v21 = vpop.f32.mrb[4].mxu1 }
 0x1de   :  { %v2609_v22 = vpop.f32.mrb[5].mxu1 }
 0x1df   :  { %v2611_v52 = vpop.f32.mrb[6].mxu1 }
 0x1e0   :  { %v2612_v24 = vpop.f32.mrb[7].mxu1 }
 0x1e5   :  { %v2687_v25 = vpop.f32.mrb[8].mxu1 }
 0x1e6   :  { %v3378_v26 = vpop.f32.mrb[9].mxu1 }
 0x1e7   :  { %v2690_v27 = vpop.f32.mrb[10].mxu1 }
 0x1e8   :  { %v3379_v28 = vpop.f32.mrb[11].mxu1 }
 0x256   :  { %v2566_v34 = vpop.f32.mrb[0].mxu0 }
 0x257   :  { %v3405_v16 = vadd.f32 %v3404_v32, %v2566_v34  ;;  %v2568_v36 = vpop.f32.mrb[1].mxu0 }
 0x258   :  { %v3408_v37 = vadd.f32 %v3407_v33, %v2568_v36  ;;  %v2570_v40 = vpop.f32.mrb[2].mxu0 }
 0x259   :  { %v3406_v41 = vadd.f32 %v3405_v16, %v2607_v21  ;;  %v2571_v43 = vpop.f32.mrb[3].mxu0 }
 0x25a   :  { %v3409_v56 = vadd.f32 %v3408_v37, %v2609_v22 }
 0x25b   :  { %v2614_v23 = vmax.f32 %v3406_v41, 0.0 }
 0x25c   :  { %v2615_v45 = vmax.f32 %v3409_v56, 0.0 }
 0x25d   :  { %v2616_v47 = vpack.c.bf16 %v2614_v23, %v2614_v23 }
 0x25e   :  { %v2617_v46 = vpack.c.bf16 %v2615_v45, %v2615_v45 }
 0x260   :  { %3348 = vmatprep.mubr.msk.bf16.mxu1 %vm2768_vm5, %v2617_v46 }
 0x261   :  { %2809 = vmatmul.mubr.bf16.vlgmr.msra.gmra.mrb[12].mxu1 %v2616_v47 }
 0x262   :  { %3381 = vmatpush3.bf16.msra.mxu1 %v3949_v42  ;;  %3388 = vmatprep.mubr.msk.bf16.mxu1 %vm3984_vm2, %v3983_v44 }
 0x263   :  { %3382 = vmatprep.subr.bf16.mxu1 %v3983_v44 }
 0x266   :  { %3383 = vmatpush3.bf16.msra.mxu1 %v3950_v48 }
 0x267   :  { %3384 = vmatprep.subr.bf16.mxu1 %v3983_v44 }
 0x26a   :  { %3385 = vmatpush3.bf16.msra.mxu1 %v3951_v17 }
 0x26b   :  { %3386 = vmatprep.subr.bf16.mxu1 %v3983_v44 }
 0x26e   :  { %3387 = vmatpush3.bf16.msra.mxu1 %v3952_v35 }
 0x26f   :  { %3392 = vmatprep.subr.bf16.mxu1 %v3983_v44 }
 0x334   :  { %v2810_v50 = vpop.f32.mrb[12].mxu1 }
 0x335   :  { %v2811_v53 = vadd.f32 %v2810_v50, %v2687_v25  ;;  %v2812_v38 = vpop.f32.mrb[13].mxu1 }
 0x336   :  { %v2813_v39 = vpop.f32.mrb[14].mxu1 }
 0x337   :  { %v2823_v54 = vadd.f32 %v3349_v51, %v2811_v53  ;;  %v2814_v55 = vpop.f32.mrb[15].mxu1 }
 0x339   :  { %v2824_v57 = vmax.f32 %v2823_v54, 0.0 }
 0x33b   :  { %v2825_v60 = vpack.c.bf16 %v2824_v57, %v2824_v57 }
 0x33d   :  { %3389 = vmatmul.mubr.msk.bf16.vlgmr.msra.gmra.mrb[16].mxu1 %vm2865_vm6, %v2825_v60 }
 0x33e   :  { %3393 = vmatpush3.bf16.msra.mxu1 %v3953_v58  ;;  %3400 = vmatprep.mubr.msk.bf16.mxu1 %vm3984_vm2, %v3983_v44 }
 0x33f   :  { %3394 = vmatprep.subr.bf16.mxu1 %v3983_v44 }
 0x342   :  { %3395 = vmatpush3.bf16.msra.mxu1 %v3954_v61 }
 0x343   :  { %3396 = vmatprep.subr.bf16.mxu1 %v3983_v44 }
 0x346   :  { %3397 = vmatpush3.bf16.msra.mxu1 %v3955_v62 }
 0x347   :  { %3398 = vmatprep.subr.bf16.mxu1 %v3983_v44  ;;  %v3356_v44 = vld [vmem:[%s5250_s10] ss:$0 sm:$0xff] }
 0x34a   :  { %3399 = vmatpush3.bf16.msra.mxu1 %v3956_v63 }
 0x410   :  { %v2903_v1 = vpop.f32.mrb[16].mxu1 }
 0x411   :  { %v2904_v2 = vadd.f32 %v3350_v0, %v2903_v1  ;;  %v3390_v3 = vpop.f32.mrb[17].mxu1 }
 0x412   :  { %v2906_v4 = vpop.f32.mrb[18].mxu1 }
 0x413   :  { %v2909_v5 = vmax.f32 %v2904_v2, 0.0  ;;  %v3391_v6 = vpop.f32.mrb[19].mxu1 }
 0x415   :  { %v2910_v7 = vpack.c.bf16 %v2909_v5, %v2909_v5 }
 0x417   :  { %3401 = vmatmul.mubr.msk.bf16.vlgmr.msra.gmra.mrb[20].mxu1 %vm2865_vm6, %v2910_v7 }
 0x4ea   :  { %v2987_v8 = vpop.f32.mrb[20].mxu1 }
 0x4eb   :  { %v2988_v9 = vadd.f32 %v3356_v44, %v2987_v8  ;;  %v3402_v10 = vpop.f32.mrb[21].mxu1 }
 0x4ec   :  { %v2990_v11 = vpop.f32.mrb[22].mxu1 }
 0x4ed   :  { %v3403_v12 = vpop.f32.mrb[23].mxu1  ;;  %2994 = vst.msk [vmem:[#allocation2] sm:$0x3] %vm2993_vm7, %v2988_v9 }
 0x4ee   :  { %3968 = shalt.err (!%p3965_p4)
}
 0x4ef   :  { %s3969_s10 = scalar_lea.hbm %s5251_s11, 32 }
 0x4f0   :  { %p3970_p5 = scmp.ne.s32.totalorder %s5251_s11, %s3969_s10  ;;  %p3973_p6 = scmp.lt.u32.totalorder %s3969_s10, %s5251_s11 }
 0x4f2   :  { %p3975_p7 = pnand %p3973_p6, %p3970_p5 }
 0x4f4   :  { %3978 = shalt.err (!%p3975_p7)
}
 0x4f5   :  { %3004 = dma.vmem_to_hbm [thread:$0]  %s3002_s9, 32, %s5251_s11, [#allocation3]  }
 0x4f6   :  { %3979 = dma.done.wait [#allocation3], 32  }
 0x4f7   :  { %3980 = vsyncadd [#allocation3], 4294967264 }
 0x4f8   :  { %3008 = vsyncpa [#allocation3], 1 }

</bundles_post_ra>
